<compile_context>
chip_gen: v7x
topology: tpu7x:2x2x1
jax: 0.10.0
libtpu: 0.0.40
codegen_flags: <defaults>
</compile_context>

<pallas_src>
import math

import jax
import jax.numpy as jnp
from jax import lax
from jax.experimental import pallas as pl
from jax.experimental.pallas import tpu as pltpu

# ----------------------------- configuration --------------------------------
N_HID = 32
N_LAYERS = 2
N_HEADS = 1
TIME_WINDOW = 2
TIMEFRAME = [f"t{i}" for i in range(TIME_WINDOW + 1)]
NTYPES = ["issue", "developer", "file"]
NT_IDX = {nt: i for i, nt in enumerate(NTYPES)}
NODE_NUM = {"issue": 16, "developer": 12, "file": 24}

# synthetic heterogeneous schema (every ntype is a destination of >=1 relation)
BASE_RELS = [
    ("developer", "report", "issue"),
    ("issue", "report_r", "developer"),
    ("developer", "created", "file"),
    ("file", "created_r", "developer"),
    ("file", "depend", "file"),
]
CANONICAL_ETYPES = [(s, f"{r}_{tt}", d)
                    for tt in TIMEFRAME for (s, r, d) in BASE_RELS]

N_REL = len(BASE_RELS)
N_TT = len(TIMEFRAME)
N_NT = len(NTYPES)

# Node buffers padded to NMAX=32 rows: multiple of 16 so every per-ntype row
# slice of the packed bf16 z-table is sublane-tile aligned (no relayouts).
NMAX = 32
NTM = N_NT * NMAX                                   # 96 rows: all ntypes stacked

# Batched GAT weight layout per (layer, timeframe):
#   cols [r*H, (r+1)*H) : W_r           cols AL_OFF+r : W_r @ attn_l_r^T
#                                       cols AR_OFF+r : W_r @ attn_r_r^T
AL_OFF = N_REL * N_HID
AR_OFF = AL_OFF + N_REL
W_COLS = AR_OFF + N_REL                             # 170

# relations grouped by destination ntype -> only one NFM accumulator pair live
RELS_BY_DST = {nt: [(r, s) for r, (s, _, d) in enumerate(BASE_RELS) if d == nt]
               for nt in NTYPES}


# ------------------------------ fused Pallas kernel ---------------------------
def _htgnn_fused_kernel(alpha_ref,                        # SMEM (L*NT,)
                        feat_ref,                         # (1, NTM, H)
                        gw_ref, gb_ref,                   # (L,1,H,W_COLS) bf16 / (L,1,R,1,H)
                        ew_ref,                           # (1, R, NMAX, NMAX)
                        biw_ref, bib_ref, siw_ref, sib_ref,
                        lng_ref, lnb_ref,                 # NFM / LN params (t-invariant)
                        out_ref):                         # (NTM, H) resident accumulator
    f32, bf16 = jnp.float32, jnp.bfloat16

    @pl.when(pl.program_id(0) == 0)
    def _init():
        out_ref[...] = jnp.zeros_like(out_ref)

    feat = feat_ref[0]                                    # (NTM, H) f32, this timeframe

    for l in range(N_LAYERS):
        # -- ONE wide MXU matmul: every relation projection for every ntype,
        #    with both attention vectors folded in as extra output columns --
        z = jnp.dot(feat.astype(bf16), gw_ref[l, 0],
                    preferred_element_type=f32)           # (NTM, W_COLS) f32
        ea = z[:, AL_OFF:W_COLS]                          # (NTM, 2*R) attention logits
        zb = z[:, :AL_OFF].astype(bf16)                   # (NTM, R*H), bf16 cast once

        new_rows = []
        for d_nt in NTYPES:                               # grouped by destination ntype
            i = NT_IDX[d_nt]
            d0 = i * NMAX
            s_sum = None
            s_sq = None
            # ---- intra-relation aggregation: GATConv (1 head, dense adjacency) ----
            for r, s_nt in RELS_BY_DST[d_nt]:
                s0 = NT_IDX[s_nt] * NMAX
                ew = ew_ref[0, r]                         # (NMAX, NMAX), 0 off-edge
                el = ea[s0:s0 + NMAX, r:r + 1]            # (NMAX, 1) src logits
                er = ea[d0:d0 + NMAX, N_REL + r:N_REL + r + 1]
                e = er + jnp.transpose(el)                # (NMAX_dst, NMAX_src)
                e = jnp.where(e > 0, e, 0.2 * e)          # GATConv leaky_relu(0.2)
                e = jnp.where(ew > 0, e, -1e30)           # edge-softmax mask from ew
                p = jnp.exp(e - jnp.max(e, axis=-1, keepdims=True))
                a = p / jnp.sum(p, axis=-1, keepdims=True)
                a = a * ew                                # edge weights, post-softmax
                z_src = zb[s0:s0 + NMAX, r * N_HID:(r + 1) * N_HID]
                msg = jnp.dot(a.astype(bf16), z_src,
                              preferred_element_type=f32) + gb_ref[l, 0, r]
                if s_sum is None:
                    s_sum, s_sq = msg, msg * msg
                else:
                    s_sum = s_sum + msg
                    s_sq = s_sq + msg * msg

            # ---- inter-relation NFM interaction + gated residual + LayerNorm ----
            deep = 0.5 * (s_sum * s_sum - s_sq)
            deep = jnp.dot(deep.astype(bf16), biw_ref[l, i],
                           preferred_element_type=f32) + bib_ref[l, i]
            deep = jnp.where(deep > 0, deep, 0.01 * deep)     # nn.LeakyReLU() default
            bias = jnp.dot(s_sum.astype(bf16), siw_ref[l, i],
                           preferred_element_type=f32) + sib_ref[l, i]
            bias = jnp.where(bias > 0, bias, 0.01 * bias)
            inter = deep + bias

            alpha = alpha_ref[l * N_NT + i]                   # SMEM scalar path
            y = inter + feat[d0:d0 + NMAX, :] * alpha
            mu = jnp.mean(y, axis=-1, keepdims=True)
            var = jnp.mean((y - mu) ** 2, axis=-1, keepdims=True)
            new_rows.append((y - mu) * lax.rsqrt(var + 1e-5)
                            * lng_ref[l, i] + lnb_ref[l, i])

        feat = jnp.concatenate(new_rows, axis=0)              # (NTM, H) for next layer

    # cross-timeframe sum folded into the kernel (resident output accumulator)
    out_ref[...] += feat


def _block_specs():
    # index_maps receive (grid_t, alpha_prefetch_ref)
    return [
        pl.BlockSpec((1, NTM, N_HID), lambda t, a: (t, 0, 0)),                      # feat0
        pl.BlockSpec((N_LAYERS, 1, N_HID, W_COLS), lambda t, a: (0, t, 0, 0)),      # gat W(+attn)
        pl.BlockSpec((N_LAYERS, 1, N_REL, 1, N_HID), lambda t, a: (0, t, 0, 0, 0)),  # gat bias
        pl.BlockSpec((1, N_REL, NMAX, NMAX), lambda t, a: (t, 0, 0, 0)),            # edge weights
        pl.BlockSpec((N_LAYERS, N_NT, N_HID, N_HID), lambda t, a: (0, 0, 0, 0)),    # bi_W
        pl.BlockSpec((N_LAYERS, N_NT, 1, N_HID), lambda t, a: (0, 0, 0, 0)),        # bi_b
        pl.BlockSpec((N_LAYERS, N_NT, N_HID, N_HID), lambda t, a: (0, 0, 0, 0)),    # si_W
        pl.BlockSpec((N_LAYERS, N_NT, 1, N_HID), lambda t, a: (0, 0, 0, 0)),        # si_b
        pl.BlockSpec((N_LAYERS, N_NT, 1, N_HID), lambda t, a: (0, 0, 0, 0)),        # ln_g
        pl.BlockSpec((N_LAYERS, N_NT, 1, N_HID), lambda t, a: (0, 0, 0, 0)),        # ln_b
    ]


@jax.jit
def htgnn_forward(packed, feat0):
    out = pl.pallas_call(
        _htgnn_fused_kernel,
        out_shape=jax.ShapeDtypeStruct((NTM, N_HID), jnp.float32),
        grid_spec=pltpu.PrefetchScalarGridSpec(
            num_scalar_prefetch=1,            # sigmoid(res_weight) scalars -> SMEM
            grid=(N_TT,),                     # sequential; output accumulated in-kernel
            in_specs=_block_specs(),
            out_specs=pl.BlockSpec((NTM, N_HID), lambda t, a: (0, 0)),
        ),
        compiler_params=pltpu.CompilerParams(dimension_semantics=("arbitrary",)),
    )(packed["alphas"], feat0,
      packed["gat_W"], packed["gat_b"], packed["ew"],
      packed["bi_W"], packed["bi_b"], packed["si_W"], packed["si_b"],
      packed["ln_g"], packed["ln_b"])
    return {nt: out[NT_IDX[nt] * NMAX: NT_IDX[nt] * NMAX + NODE_NUM[nt], :]
            for nt in NTYPES}


# ------------------------------ parameters & data -----------------------------
def init_params(key):
    keys = iter(jax.random.split(key, 4096))
    nk = lambda: next(keys)

    def xavier_uniform(shape, gain=1.0):
        fan_in, fan_out = shape[0], shape[-1]
        limit = gain * math.sqrt(6.0 / (fan_in + fan_out))
        return jax.random.uniform(nk(), shape, jnp.float32, -limit, limit)

    def xavier_normal(shape, gain=1.0):
        fan_in, fan_out = shape[0], shape[-1]
        std = gain * math.sqrt(2.0 / (fan_in + fan_out))
        return std * jax.random.normal(nk(), shape, dtype=jnp.float32)

    params = {"embed": {}, "layers": []}
    for nt in NTYPES:
        params["embed"][nt] = xavier_uniform((NODE_NUM[nt], N_HID))
    relu_gain = math.sqrt(2.0)
    for _ in range(N_LAYERS):
        layer = {"gat": {}, "ntype": {}}
        for (_, etype, _) in CANONICAL_ETYPES:
            layer["gat"][etype] = {
                "W": xavier_normal((N_HID, N_HID), gain=relu_gain),
                "attn_l": xavier_normal((1, N_HID), gain=relu_gain),
                "attn_r": xavier_normal((1, N_HID), gain=relu_gain),
                "bias": jnp.zeros((1, N_HID), jnp.float32),
            }
        for nt in NTYPES:
            layer["ntype"][nt] = {
                "bi_W": xavier_uniform((N_HID, N_HID)),
                "bi_b": jnp.zeros((1, N_HID), jnp.float32),
                "si_W": xavier_uniform((N_HID, N_HID)),
                "si_b": jnp.zeros((1, N_HID), jnp.float32),
                "res_w": jax.random.normal(nk(), (1, 1), dtype=jnp.float32),
                "ln_g": jnp.ones((1, N_HID), jnp.float32),
                "ln_b": jnp.zeros((1, N_HID), jnp.float32),
            }
        params["layers"].append(layer)
    return params


def pack_params(params):
    def gat_block(l, tt):
        ws, wls, wrs, bs = [], [], [], []
        for (_, rel, _) in BASE_RELS:
            g = params["layers"][l]["gat"][f"{rel}_{tt}"]
            ws.append(g["W"])
            wls.append(g["W"] @ g["attn_l"].T)      # (H, 1) folded "left" attention
            wrs.append(g["W"] @ g["attn_r"].T)      # (H, 1) folded "right" attention
            bs.append(g["bias"])
        w_cat = jnp.concatenate(ws + wls + wrs, axis=1)      # (H, W_COLS)
        b_cat = jnp.stack(bs, axis=0)                        # (R, 1, H)
        return w_cat, b_cat

    gat_w, gat_b = [], []
    for l in range(N_LAYERS):
        w_tt, b_tt = zip(*[gat_block(l, tt) for tt in TIMEFRAME])
        gat_w.append(jnp.stack(w_tt, axis=0))
        gat_b.append(jnp.stack(b_tt, axis=0))
    gat_w = jnp.stack(gat_w, axis=0)            # (L, TT, H, W_COLS)
    gat_b = jnp.stack(gat_b, axis=0)            # (L, TT, R, 1, H)

    def stack_nt(field):
        return jnp.stack([
            jnp.stack([params["layers"][l]["ntype"][nt][field] for nt in NTYPES],
                      axis=0)
            for l in range(N_LAYERS)], axis=0)

    alphas = jnp.stack([jax.nn.sigmoid(params["layers"][l]["ntype"][nt]["res_w"][0, 0])
                        for l in range(N_LAYERS) for nt in NTYPES]).astype(jnp.float32)

    return {
        "gat_W": gat_w.astype(jnp.bfloat16),     # projection + folded attention cols
        "gat_b": gat_b,
        "bi_W": stack_nt("bi_W").astype(jnp.bfloat16),   # (L, NT, H, H)
        "bi_b": stack_nt("bi_b"),                        # (L, NT, 1, H)
        "si_W": stack_nt("si_W").astype(jnp.bfloat16),
        "si_b": stack_nt("si_b"),
        "ln_g": stack_nt("ln_g"),
        "ln_b": stack_nt("ln_b"),
        "alphas": alphas,                                # (L*NT,) sigmoid(res_weight)
    }


def build_graph(key):
    graph = {}
    for (s, etype, d) in CANONICAL_ETYPES:
        key, k1, k2 = jax.random.split(key, 3)
        nd, ns = NODE_NUM[d], NODE_NUM[s]
        adj = (jax.random.uniform(k1, (nd, ns)) < 0.35).astype(jnp.float32)
        adj = adj.at[:, 0].set(1.0)  # every real dst node has >= 1 in-edge
        # edge weights in [0.5, 1.5] on edges, exactly 0 off-edge -> ew>0 is the mask
        ew = adj * jax.random.uniform(k2, (nd, ns), minval=0.5, maxval=1.5)
        graph[(s, etype, d)] = ew
    return graph


def pack_graph(graph):
    ew_all = jnp.zeros((N_TT, N_REL, NMAX, NMAX), jnp.float32)
    for t, tt in enumerate(TIMEFRAME):
        for r, (s, rel, d) in enumerate(BASE_RELS):
            ew = graph[(s, f"{rel}_{tt}", d)]
            nd, ns = ew.shape
            ew_all = ew_all.at[t, r, :nd, :ns].set(ew)
    return ew_all


def build_input_features(params, id_dict_with_time):
    # embedding scatter: ID_dict is identity (global id -> row id); rows beyond
    # NODE_NUM / inactive ids stay zero, rows beyond that are sublane padding.
    feat0 = jnp.zeros((N_TT, NTM, N_HID), jnp.float32)
    for t, tt in enumerate(TIMEFRAME):
        for nt in NTYPES:
            ids = id_dict_with_time[nt][tt]
            rows = params["embed"][nt][ids]
            feat0 = feat0.at[t, NT_IDX[nt] * NMAX + ids].set(rows)
    return feat0


# ----------------------------------- main -------------------------------------
if __name__ == "__main__":
    key = jax.random.PRNGKey(0)
    kp, kg = jax.random.split(key)
    params = init_params(kp)
    packed = pack_params(params)
    packed["ew"] = pack_graph(build_graph(kg))

    # nodes active at each timeframe (deterministic subsets)
    id_dict_with_time = {
        nt: {tt: jnp.arange(NODE_NUM[nt] - i, dtype=jnp.int32)
             for i, tt in enumerate(TIMEFRAME)}
        for nt in NTYPES
    }
    feat0 = build_input_features(params, id_dict_with_time)

    out = htgnn_forward(packed, feat0)
    out = jax.tree_util.tree_map(lambda x: x.block_until_ready(), out)

    for nt in NTYPES:
        assert out[nt].shape == (NODE_NUM[nt], N_HID)
        assert bool(jnp.all(jnp.isfinite(out[nt])))
    print("KERNEL_OK")
</pallas_src>

<mosaic_0001>
module attributes {stable_mosaic.version = 11 : i64} {
  func.func @_htgnn_fused_kernel(%arg0: i32, %arg1: memref<6xf32, #tpu.memory_space<smem>>, %arg2: memref<1x96x32xf32, #tpu.memory_space<vmem>>, %arg3: memref<2x1x32x170xbf16, #tpu.memory_space<vmem>>, %arg4: memref<2x1x5x1x32xf32, #tpu.memory_space<vmem>>, %arg5: memref<1x5x32x32xf32, #tpu.memory_space<vmem>>, %arg6: memref<2x3x32x32xbf16, #tpu.memory_space<vmem>>, %arg7: memref<2x3x1x32xf32, #tpu.memory_space<vmem>>, %arg8: memref<2x3x32x32xbf16, #tpu.memory_space<vmem>>, %arg9: memref<2x3x1x32xf32, #tpu.memory_space<vmem>>, %arg10: memref<2x3x1x32xf32, #tpu.memory_space<vmem>>, %arg11: memref<2x3x1x32xf32, #tpu.memory_space<vmem>>, %arg12: memref<96x32xf32, #tpu.memory_space<vmem>>) attributes {dimension_semantics = [#tpu.dimension_semantics<arbitrary>], iteration_bounds = array<i64: 3>, scalar_prefetch = 1 : i64, scratch_operands = 0 : i64, tpu.core_type = #tpu.core_type<tc>, window_params = [{transform_indices = @transform_0, window_bounds = array<i64: 1, 96, 32>}, {transform_indices = @transform_1, window_bounds = array<i64: 2, 1, 32, 170>}, {transform_indices = @transform_2, window_bounds = array<i64: 2, 1, 5, 1, 32>}, {transform_indices = @transform_3, window_bounds = array<i64: 1, 5, 32, 32>}, {pipeline_mode = #tpu.pipeline_mode<synchronous>, transform_indices = @transform_4, window_bounds = array<i64: 2, 3, 32, 32>}, {pipeline_mode = #tpu.pipeline_mode<synchronous>, transform_indices = @transform_5, window_bounds = array<i64: 2, 3, 1, 32>}, {pipeline_mode = #tpu.pipeline_mode<synchronous>, transform_indices = @transform_6, window_bounds = array<i64: 2, 3, 32, 32>}, {pipeline_mode = #tpu.pipeline_mode<synchronous>, transform_indices = @transform_7, window_bounds = array<i64: 2, 3, 1, 32>}, {pipeline_mode = #tpu.pipeline_mode<synchronous>, transform_indices = @transform_8, window_bounds = array<i64: 2, 3, 1, 32>}, {pipeline_mode = #tpu.pipeline_mode<synchronous>, transform_indices = @transform_9, window_bounds = array<i64: 2, 3, 1, 32>}, {pipeline_mode = #tpu.pipeline_mode<synchronous>, transform_indices = @transform_10, window_bounds = array<i64: 96, 32>}]} {
    %c0_i32 = arith.constant 0 : i32
    %0 = arith.cmpi eq, %arg0, %c0_i32 : i32
    %1 = arith.extui %0 : i1 to i32
    %c0_i32_0 = arith.constant 0 : i32
    %2 = arith.cmpi ne, %1, %c0_i32_0 : i32
    scf.if %2 {
      %cst_393 = arith.constant 0.000000e+00 : f32
      %754 = vector.broadcast %cst_393 : f32 to vector<96x32xf32>
      %c0_394 = arith.constant 0 : index
      %c0_395 = arith.constant 0 : index
      %755 = vector.load %arg12[%c0_394, %c0_395] : memref<96x32xf32, #tpu.memory_space<vmem>>, vector<96x32xf32>
      tpu.vector_store %arg12[%c0_394, %c0_395], %754 {strides = array<i32>} : memref<96x32xf32, #tpu.memory_space<vmem>>, vector<96x32xf32>,
    } else {
    }
    %c0 = arith.constant 0 : index
    %c0_1 = arith.constant 0 : index
    %c0_2 = arith.constant 0 : index
    %3 = vector.load %arg2[%c0, %c0_1, %c0_2] : memref<1x96x32xf32, #tpu.memory_space<vmem>>, vector<1x96x32xf32>
    %4 = vector.shape_cast %3 : vector<1x96x32xf32> to vector<96x32xf32>
    %5 = arith.truncf %4 : vector<96x32xf32> to vector<96x32xbf16>
    %c0_3 = arith.constant 0 : index
    %c0_4 = arith.constant 0 : index
    %c0_5 = arith.constant 0 : index
    %c0_6 = arith.constant 0 : index
    %6 = vector.load %arg3[%c0_3, %c0_4, %c0_5, %c0_6] : memref<2x1x32x170xbf16, #tpu.memory_space<vmem>>, vector<1x1x32x170xbf16>
    %7 = vector.shape_cast %6 : vector<1x1x32x170xbf16> to vector<32x170xbf16>
    %cst = arith.constant dense<0.000000e+00> : vector<96x170xf32>
    %8 = tpu.matmul %5, %7, %cst {dimension_numbers = #tpu.dot_dimension_numbers<[1], [0], [0], [1], [0, 0, 1, 1], [], []>} : vector<96x32xbf16>, vector<32x170xbf16>, vector<96x170xf32> -> vector<96x170xf32>
    %9 = vector.extract_strided_slice %8 {offsets = [0, 160], sizes = [96, 10], strides = [1, 1]} : vector<96x170xf32> to vector<96x10xf32>
    %10 = vector.extract_strided_slice %8 {offsets = [0, 0], sizes = [96, 160], strides = [1, 1]} : vector<96x170xf32> to vector<96x160xf32>
    %11 = arith.truncf %10 : vector<96x160xf32> to vector<96x160xbf16>
    %c0_7 = arith.constant 0 : index
    %c0_8 = arith.constant 0 : index
    %c0_9 = arith.constant 0 : index
    %c0_10 = arith.constant 0 : index
    %12 = vector.load %arg5[%c0_7, %c0_8, %c0_9, %c0_10] : memref<1x5x32x32xf32, #tpu.memory_space<vmem>>, vector<1x1x32x32xf32>
    %13 = vector.shape_cast %12 : vector<1x1x32x32xf32> to vector<32x32xf32>
    %14 = vector.extract_strided_slice %9 {offsets = [32, 0], sizes = [32, 1], strides = [1, 1]} : vector<96x10xf32> to vector<32x1xf32>
    %15 = vector.extract_strided_slice %9 {offsets = [0, 5], sizes = [32, 1], strides = [1, 1]} : vector<96x10xf32> to vector<32x1xf32>
    %16 = tpu.transpose %14, [1, 0] : vector<32x1xf32> -> vector<1x32xf32>
    %17 = vector.broadcast %15 : vector<32x1xf32> to vector<32x32xf32>
    %18 = vector.broadcast %16 : vector<1x32xf32> to vector<32x32xf32>
    %19 = arith.addf %17, %18 : vector<32x32xf32>
    %cst_11 = arith.constant 0.000000e+00 : f32
    %20 = vector.broadcast %cst_11 : f32 to vector<32x32xf32>
    %21 = arith.cmpf ogt, %19, %20 : vector<32x32xf32>
    %cst_12 = arith.constant 2.000000e-01 : f32
    %22 = vector.broadcast %cst_12 : f32 to vector<32x32xf32>
    %23 = arith.mulf %22, %19 : vector<32x32xf32>
    %24 = arith.select %21, %19, %23 : vector<32x32xi1>, vector<32x32xf32>
    %cst_13 = arith.constant 0.000000e+00 : f32
    %25 = vector.broadcast %cst_13 : f32 to vector<32x32xf32>
    %26 = arith.cmpf ogt, %13, %25 : vector<32x32xf32>
    %cst_14 = arith.constant -1.000000e+30 : f32
    %27 = vector.broadcast %cst_14 : f32 to vector<32x32xf32>
    %28 = arith.select %26, %24, %27 : vector<32x32xi1>, vector<32x32xf32>
    %cst_15 = arith.constant dense<0xFF800000> : vector<32xf32>
    %29 = vector.multi_reduction <maximumf>, %28, %cst_15 [1] : vector<32x32xf32> to vector<32xf32>
    %30 = vector.shape_cast %29 : vector<32xf32> to vector<32x1xf32>
    %31 = vector.broadcast %30 : vector<32x1xf32> to vector<32x32xf32>
    %32 = arith.subf %28, %31 : vector<32x32xf32>
    %33 = math.exp %32 : vector<32x32xf32>
    %cst_16 = arith.constant dense<0.000000e+00> : vector<32xf32>
    %34 = vector.multi_reduction <add>, %33, %cst_16 [1] : vector<32x32xf32> to vector<32xf32>
    %35 = vector.shape_cast %34 : vector<32xf32> to vector<32x1xf32>
    %36 = vector.broadcast %35 : vector<32x1xf32> to vector<32x32xf32>
    %37 = arith.divf %33, %36 : vector<32x32xf32>
    %38 = arith.mulf %37, %13 : vector<32x32xf32>
    %39 = vector.extract_strided_slice %11 {offsets = [32, 0], sizes = [32, 32], strides = [1, 1]} : vector<96x160xbf16> to vector<32x32xbf16>
    %40 = arith.truncf %38 : vector<32x32xf32> to vector<32x32xbf16>
    %cst_17 = arith.constant dense<0.000000e+00> : vector<32x32xf32>
    %41 = tpu.matmul %40, %39, %cst_17 {dimension_numbers = #tpu.dot_dimension_numbers<[1], [0], [0], [1], [0, 0, 1, 1], [], []>} : vector<32x32xbf16>, vector<32x32xbf16>, vector<32x32xf32> -> vector<32x32xf32>
    %c0_18 = arith.constant 0 : index
    %c0_19 = arith.constant 0 : index
    %c0_20 = arith.constant 0 : index
    %c0_21 = arith.constant 0 : index
    %c0_22 = arith.constant 0 : index
    %42 = vector.load %arg4[%c0_18, %c0_19, %c0_20, %c0_21, %c0_22] : memref<2x1x5x1x32xf32, #tpu.memory_space<vmem>>, vector<1x1x1x1x32xf32>
    %43 = vector.shape_cast %42 : vector<1x1x1x1x32xf32> to vector<1x32xf32>
    %44 = vector.broadcast %43 : vector<1x32xf32> to vector<32x32xf32>
    %45 = arith.addf %41, %44 : vector<32x32xf32>
    %46 = arith.mulf %45, %45 : vector<32x32xf32>
    %47 = arith.mulf %45, %45 : vector<32x32xf32>
    %48 = arith.subf %47, %46 : vector<32x32xf32>
    %cst_23 = arith.constant 5.000000e-01 : f32
    %49 = vector.broadcast %cst_23 : f32 to vector<32x32xf32>
    %50 = arith.mulf %49, %48 : vector<32x32xf32>
    %51 = arith.truncf %50 : vector<32x32xf32> to vector<32x32xbf16>
    %c0_24 = arith.constant 0 : index
    %c0_25 = arith.constant 0 : index
    %c0_26 = arith.constant 0 : index
    %c0_27 = arith.constant 0 : index
    %52 = vector.load %arg6[%c0_24, %c0_25, %c0_26, %c0_27] : memref<2x3x32x32xbf16, #tpu.memory_space<vmem>>, vector<1x1x32x32xbf16>
    %53 = vector.shape_cast %52 : vector<1x1x32x32xbf16> to vector<32x32xbf16>
    %cst_28 = arith.constant dense<0.000000e+00> : vector<32x32xf32>
    %54 = tpu.matmul %51, %53, %cst_28 {dimension_numbers = #tpu.dot_dimension_numbers<[1], [0], [0], [1], [0, 0, 1, 1], [], []>} : vector<32x32xbf16>, vector<32x32xbf16>, vector<32x32xf32> -> vector<32x32xf32>
    %c0_29 = arith.constant 0 : index
    %c0_30 = arith.constant 0 : index
    %c0_31 = arith.constant 0 : index
    %c0_32 = arith.constant 0 : index
    %55 = vector.load %arg7[%c0_29, %c0_30, %c0_31, %c0_32] : memref<2x3x1x32xf32, #tpu.memory_space<vmem>>, vector<1x1x1x32xf32>
    %56 = vector.shape_cast %55 : vector<1x1x1x32xf32> to vector<1x32xf32>
    %57 = vector.broadcast %56 : vector<1x32xf32> to vector<32x32xf32>
    %58 = arith.addf %54, %57 : vector<32x32xf32>
    %cst_33 = arith.constant 0.000000e+00 : f32
    %59 = vector.broadcast %cst_33 : f32 to vector<32x32xf32>
    %60 = arith.cmpf ogt, %58, %59 : vector<32x32xf32>
    %cst_34 = arith.constant 0.00999999977 : f32
    %61 = vector.broadcast %cst_34 : f32 to vector<32x32xf32>
    %62 = arith.mulf %61, %58 : vector<32x32xf32>
    %63 = arith.select %60, %58, %62 : vector<32x32xi1>, vector<32x32xf32>
    %64 = arith.truncf %45 : vector<32x32xf32> to vector<32x32xbf16>
    %c0_35 = arith.constant 0 : index
    %c0_36 = arith.constant 0 : index
    %c0_37 = arith.constant 0 : index
    %c0_38 = arith.constant 0 : index
    %65 = vector.load %arg8[%c0_35, %c0_36, %c0_37, %c0_38] : memref<2x3x32x32xbf16, #tpu.memory_space<vmem>>, vector<1x1x32x32xbf16>
    %66 = vector.shape_cast %65 : vector<1x1x32x32xbf16> to vector<32x32xbf16>
    %cst_39 = arith.constant dense<0.000000e+00> : vector<32x32xf32>
    %67 = tpu.matmul %64, %66, %cst_39 {dimension_numbers = #tpu.dot_dimension_numbers<[1], [0], [0], [1], [0, 0, 1, 1], [], []>} : vector<32x32xbf16>, vector<32x32xbf16>, vector<32x32xf32> -> vector<32x32xf32>
    %c0_40 = arith.constant 0 : index
    %c0_41 = arith.constant 0 : index
    %c0_42 = arith.constant 0 : index
    %c0_43 = arith.constant 0 : index
    %68 = vector.load %arg9[%c0_40, %c0_41, %c0_42, %c0_43] : memref<2x3x1x32xf32, #tpu.memory_space<vmem>>, vector<1x1x1x32xf32>
    %69 = vector.shape_cast %68 : vector<1x1x1x32xf32> to vector<1x32xf32>
    %70 = vector.broadcast %69 : vector<1x32xf32> to vector<32x32xf32>
    %71 = arith.addf %67, %70 : vector<32x32xf32>
    %cst_44 = arith.constant 0.000000e+00 : f32
    %72 = vector.broadcast %cst_44 : f32 to vector<32x32xf32>
    %73 = arith.cmpf ogt, %71, %72 : vector<32x32xf32>
    %cst_45 = arith.constant 0.00999999977 : f32
    %74 = vector.broadcast %cst_45 : f32 to vector<32x32xf32>
    %75 = arith.mulf %74, %71 : vector<32x32xf32>
    %76 = arith.select %73, %71, %75 : vector<32x32xi1>, vector<32x32xf32>
    %77 = arith.addf %63, %76 : vector<32x32xf32>
    %c0_46 = arith.constant 0 : index
    %78 = memref.load %arg1[%c0_46] : memref<6xf32, #tpu.memory_space<smem>>
    %79 = vector.extract_strided_slice %4 {offsets = [0, 0], sizes = [32, 32], strides = [1, 1]} : vector<96x32xf32> to vector<32x32xf32>
    %80 = vector.broadcast %78 : f32 to vector<32x32xf32>
    %81 = arith.mulf %79, %80 : vector<32x32xf32>
    %82 = arith.addf %77, %81 : vector<32x32xf32>
    %cst_47 = arith.constant dense<0.000000e+00> : vector<32xf32>
    %83 = vector.multi_reduction <add>, %82, %cst_47 [1] : vector<32x32xf32> to vector<32xf32>
    %84 = vector.shape_cast %83 : vector<32xf32> to vector<32x1xf32>
    %cst_48 = arith.constant 3.200000e+01 : f32
    %85 = vector.broadcast %cst_48 : f32 to vector<32x1xf32>
    %86 = arith.divf %84, %85 : vector<32x1xf32>
    %87 = vector.broadcast %86 : vector<32x1xf32> to vector<32x32xf32>
    %88 = arith.subf %82, %87 : vector<32x32xf32>
    %89 = arith.mulf %88, %88 : vector<32x32xf32>
    %cst_49 = arith.constant dense<0.000000e+00> : vector<32xf32>
    %90 = vector.multi_reduction <add>, %89, %cst_49 [1] : vector<32x32xf32> to vector<32xf32>
    %91 = vector.shape_cast %90 : vector<32xf32> to vector<32x1xf32>
    %cst_50 = arith.constant 3.200000e+01 : f32
    %92 = vector.broadcast %cst_50 : f32 to vector<32x1xf32>
    %93 = arith.divf %91, %92 : vector<32x1xf32>
    %94 = vector.broadcast %86 : vector<32x1xf32> to vector<32x32xf32>
    %95 = arith.subf %82, %94 : vector<32x32xf32>
    %cst_51 = arith.constant 9.99999974E-6 : f32
    %96 = vector.broadcast %cst_51 : f32 to vector<32x1xf32>
    %97 = arith.addf %93, %96 : vector<32x1xf32>
    %98 = math.rsqrt %97 : vector<32x1xf32>
    %99 = vector.broadcast %98 : vector<32x1xf32> to vector<32x32xf32>
    %100 = arith.mulf %95, %99 : vector<32x32xf32>
    %c0_52 = arith.constant 0 : index
    %c0_53 = arith.constant 0 : index
    %c0_54 = arith.constant 0 : index
    %c0_55 = arith.constant 0 : index
    %101 = vector.load %arg10[%c0_52, %c0_53, %c0_54, %c0_55] : memref<2x3x1x32xf32, #tpu.memory_space<vmem>>, vector<1x1x1x32xf32>
    %102 = vector.shape_cast %101 : vector<1x1x1x32xf32> to vector<1x32xf32>
    %103 = vector.broadcast %102 : vector<1x32xf32> to vector<32x32xf32>
    %104 = arith.mulf %100, %103 : vector<32x32xf32>
    %c0_56 = arith.constant 0 : index
    %c0_57 = arith.constant 0 : index
    %c0_58 = arith.constant 0 : index
    %c0_59 = arith.constant 0 : index
    %105 = vector.load %arg11[%c0_56, %c0_57, %c0_58, %c0_59] : memref<2x3x1x32xf32, #tpu.memory_space<vmem>>, vector<1x1x1x32xf32>
    %106 = vector.shape_cast %105 : vector<1x1x1x32xf32> to vector<1x32xf32>
    %107 = vector.broadcast %106 : vector<1x32xf32> to vector<32x32xf32>
    %108 = arith.addf %104, %107 : vector<32x32xf32>
    %c0_60 = arith.constant 0 : index
    %c1 = arith.constant 1 : index
    %c0_61 = arith.constant 0 : index
    %c0_62 = arith.constant 0 : index
    %109 = vector.load %arg5[%c0_60, %c1, %c0_61, %c0_62] : memref<1x5x32x32xf32, #tpu.memory_space<vmem>>, vector<1x1x32x32xf32>
    %110 = vector.shape_cast %109 : vector<1x1x32x32xf32> to vector<32x32xf32>
    %111 = vector.extract_strided_slice %9 {offsets = [0, 1], sizes = [32, 1], strides = [1, 1]} : vector<96x10xf32> to vector<32x1xf32>
    %112 = vector.extract_strided_slice %9 {offsets = [32, 6], sizes = [32, 1], strides = [1, 1]} : vector<96x10xf32> to vector<32x1xf32>
    %113 = tpu.transpose %111, [1, 0] : vector<32x1xf32> -> vector<1x32xf32>
    %114 = vector.broadcast %112 : vector<32x1xf32> to vector<32x32xf32>
    %115 = vector.broadcast %113 : vector<1x32xf32> to vector<32x32xf32>
    %116 = arith.addf %114, %115 : vector<32x32xf32>
    %cst_63 = arith.constant 0.000000e+00 : f32
    %117 = vector.broadcast %cst_63 : f32 to vector<32x32xf32>
    %118 = arith.cmpf ogt, %116, %117 : vector<32x32xf32>
    %cst_64 = arith.constant 2.000000e-01 : f32
    %119 = vector.broadcast %cst_64 : f32 to vector<32x32xf32>
    %120 = arith.mulf %119, %116 : vector<32x32xf32>
    %121 = arith.select %118, %116, %120 : vector<32x32xi1>, vector<32x32xf32>
    %cst_65 = arith.constant 0.000000e+00 : f32
    %122 = vector.broadcast %cst_65 : f32 to vector<32x32xf32>
    %123 = arith.cmpf ogt, %110, %122 : vector<32x32xf32>
    %cst_66 = arith.constant -1.000000e+30 : f32
    %124 = vector.broadcast %cst_66 : f32 to vector<32x32xf32>
    %125 = arith.select %123, %121, %124 : vector<32x32xi1>, vector<32x32xf32>
    %cst_67 = arith.constant dense<0xFF800000> : vector<32xf32>
    %126 = vector.multi_reduction <maximumf>, %125, %cst_67 [1] : vector<32x32xf32> to vector<32xf32>
    %127 = vector.shape_cast %126 : vector<32xf32> to vector<32x1xf32>
    %128 = vector.broadcast %127 : vector<32x1xf32> to vector<32x32xf32>
    %129 = arith.subf %125, %128 : vector<32x32xf32>
    %130 = math.exp %129 : vector<32x32xf32>
    %cst_68 = arith.constant dense<0.000000e+00> : vector<32xf32>
    %131 = vector.multi_reduction <add>, %130, %cst_68 [1] : vector<32x32xf32> to vector<32xf32>
    %132 = vector.shape_cast %131 : vector<32xf32> to vector<32x1xf32>
    %133 = vector.broadcast %132 : vector<32x1xf32> to vector<32x32xf32>
    %134 = arith.divf %130, %133 : vector<32x32xf32>
    %135 = arith.mulf %134, %110 : vector<32x32xf32>
    %136 = vector.extract_strided_slice %11 {offsets = [0, 32], sizes = [32, 32], strides = [1, 1]} : vector<96x160xbf16> to vector<32x32xbf16>
    %137 = arith.truncf %135 : vector<32x32xf32> to vector<32x32xbf16>
    %cst_69 = arith.constant dense<0.000000e+00> : vector<32x32xf32>
    %138 = tpu.matmul %137, %136, %cst_69 {dimension_numbers = #tpu.dot_dimension_numbers<[1], [0], [0], [1], [0, 0, 1, 1], [], []>} : vector<32x32xbf16>, vector<32x32xbf16>, vector<32x32xf32> -> vector<32x32xf32>
    %c0_70 = arith.constant 0 : index
    %c0_71 = arith.constant 0 : index
    %c1_72 = arith.constant 1 : index
    %c0_73 = arith.constant 0 : index
    %c0_74 = arith.constant 0 : index
    %139 = vector.load %arg4[%c0_70, %c0_71, %c1_72, %c0_73, %c0_74] : memref<2x1x5x1x32xf32, #tpu.memory_space<vmem>>, vector<1x1x1x1x32xf32>
    %140 = vector.shape_cast %139 : vector<1x1x1x1x32xf32> to vector<1x32xf32>
    %141 = vector.broadcast %140 : vector<1x32xf32> to vector<32x32xf32>
    %142 = arith.addf %138, %141 : vector<32x32xf32>
    %143 = arith.mulf %142, %142 : vector<32x32xf32>
    %c0_75 = arith.constant 0 : index
    %c3 = arith.constant 3 : index
    %c0_76 = arith.constant 0 : index
    %c0_77 = arith.constant 0 : index
    %144 = vector.load %arg5[%c0_75, %c3, %c0_76, %c0_77] : memref<1x5x32x32xf32, #tpu.memory_space<vmem>>, vector<1x1x32x32xf32>
    %145 = vector.shape_cast %144 : vector<1x1x32x32xf32> to vector<32x32xf32>
    %146 = vector.extract_strided_slice %9 {offsets = [64, 3], sizes = [32, 1], strides = [1, 1]} : vector<96x10xf32> to vector<32x1xf32>
    %147 = vector.extract_strided_slice %9 {offsets = [32, 8], sizes = [32, 1], strides = [1, 1]} : vector<96x10xf32> to vector<32x1xf32>
    %148 = tpu.transpose %146, [1, 0] : vector<32x1xf32> -> vector<1x32xf32>
    %149 = vector.broadcast %147 : vector<32x1xf32> to vector<32x32xf32>
    %150 = vector.broadcast %148 : vector<1x32xf32> to vector<32x32xf32>
    %151 = arith.addf %149, %150 : vector<32x32xf32>
    %cst_78 = arith.constant 0.000000e+00 : f32
    %152 = vector.broadcast %cst_78 : f32 to vector<32x32xf32>
    %153 = arith.cmpf ogt, %151, %152 : vector<32x32xf32>
    %cst_79 = arith.constant 2.000000e-01 : f32
    %154 = vector.broadcast %cst_79 : f32 to vector<32x32xf32>
    %155 = arith.mulf %154, %151 : vector<32x32xf32>
    %156 = arith.select %153, %151, %155 : vector<32x32xi1>, vector<32x32xf32>
    %cst_80 = arith.constant 0.000000e+00 : f32
    %157 = vector.broadcast %cst_80 : f32 to vector<32x32xf32>
    %158 = arith.cmpf ogt, %145, %157 : vector<32x32xf32>
    %cst_81 = arith.constant -1.000000e+30 : f32
    %159 = vector.broadcast %cst_81 : f32 to vector<32x32xf32>
    %160 = arith.select %158, %156, %159 : vector<32x32xi1>, vector<32x32xf32>
    %cst_82 = arith.constant dense<0xFF800000> : vector<32xf32>
    %161 = vector.multi_reduction <maximumf>, %160, %cst_82 [1] : vector<32x32xf32> to vector<32xf32>
    %162 = vector.shape_cast %161 : vector<32xf32> to vector<32x1xf32>
    %163 = vector.broadcast %162 : vector<32x1xf32> to vector<32x32xf32>
    %164 = arith.subf %160, %163 : vector<32x32xf32>
    %165 = math.exp %164 : vector<32x32xf32>
    %cst_83 = arith.constant dense<0.000000e+00> : vector<32xf32>
    %166 = vector.multi_reduction <add>, %165, %cst_83 [1] : vector<32x32xf32> to vector<32xf32>
    %167 = vector.shape_cast %166 : vector<32xf32> to vector<32x1xf32>
    %168 = vector.broadcast %167 : vector<32x1xf32> to vector<32x32xf32>
    %169 = arith.divf %165, %168 : vector<32x32xf32>
    %170 = arith.mulf %169, %145 : vector<32x32xf32>
    %171 = vector.extract_strided_slice %11 {offsets = [64, 96], sizes = [32, 32], strides = [1, 1]} : vector<96x160xbf16> to vector<32x32xbf16>
    %172 = arith.truncf %170 : vector<32x32xf32> to vector<32x32xbf16>
    %cst_84 = arith.constant dense<0.000000e+00> : vector<32x32xf32>
    %173 = tpu.matmul %172, %171, %cst_84 {dimension_numbers = #tpu.dot_dimension_numbers<[1], [0], [0], [1], [0, 0, 1, 1], [], []>} : vector<32x32xbf16>, vector<32x32xbf16>, vector<32x32xf32> -> vector<32x32xf32>
    %c0_85 = arith.constant 0 : index
    %c0_86 = arith.constant 0 : index
    %c3_87 = arith.constant 3 : index
    %c0_88 = arith.constant 0 : index
    %c0_89 = arith.constant 0 : index
    %174 = vector.load %arg4[%c0_85, %c0_86, %c3_87, %c0_88, %c0_89] : memref<2x1x5x1x32xf32, #tpu.memory_space<vmem>>, vector<1x1x1x1x32xf32>
    %175 = vector.shape_cast %174 : vector<1x1x1x1x32xf32> to vector<1x32xf32>
    %176 = vector.broadcast %175 : vector<1x32xf32> to vector<32x32xf32>
    %177 = arith.addf %173, %176 : vector<32x32xf32>
    %178 = arith.addf %142, %177 : vector<32x32xf32>
    %179 = arith.mulf %177, %177 : vector<32x32xf32>
    %180 = arith.addf %143, %179 : vector<32x32xf32>
    %181 = arith.mulf %178, %178 : vector<32x32xf32>
    %182 = arith.subf %181, %180 : vector<32x32xf32>
    %cst_90 = arith.constant 5.000000e-01 : f32
    %183 = vector.broadcast %cst_90 : f32 to vector<32x32xf32>
    %184 = arith.mulf %183, %182 : vector<32x32xf32>
    %185 = arith.truncf %184 : vector<32x32xf32> to vector<32x32xbf16>
    %c0_91 = arith.constant 0 : index
    %c1_92 = arith.constant 1 : index
    %c0_93 = arith.constant 0 : index
    %c0_94 = arith.constant 0 : index
    %186 = vector.load %arg6[%c0_91, %c1_92, %c0_93, %c0_94] : memref<2x3x32x32xbf16, #tpu.memory_space<vmem>>, vector<1x1x32x32xbf16>
    %187 = vector.shape_cast %186 : vector<1x1x32x32xbf16> to vector<32x32xbf16>
    %cst_95 = arith.constant dense<0.000000e+00> : vector<32x32xf32>
    %188 = tpu.matmul %185, %187, %cst_95 {dimension_numbers = #tpu.dot_dimension_numbers<[1], [0], [0], [1], [0, 0, 1, 1], [], []>} : vector<32x32xbf16>, vector<32x32xbf16>, vector<32x32xf32> -> vector<32x32xf32>
    %c0_96 = arith.constant 0 : index
    %c1_97 = arith.constant 1 : index
    %c0_98 = arith.constant 0 : index
    %c0_99 = arith.constant 0 : index
    %189 = vector.load %arg7[%c0_96, %c1_97, %c0_98, %c0_99] : memref<2x3x1x32xf32, #tpu.memory_space<vmem>>, vector<1x1x1x32xf32>
    %190 = vector.shape_cast %189 : vector<1x1x1x32xf32> to vector<1x32xf32>
    %191 = vector.broadcast %190 : vector<1x32xf32> to vector<32x32xf32>
    %192 = arith.addf %188, %191 : vector<32x32xf32>
    %cst_100 = arith.constant 0.000000e+00 : f32
    %193 = vector.broadcast %cst_100 : f32 to vector<32x32xf32>
    %194 = arith.cmpf ogt, %192, %193 : vector<32x32xf32>
    %cst_101 = arith.constant 0.00999999977 : f32
    %195 = vector.broadcast %cst_101 : f32 to vector<32x32xf32>
    %196 = arith.mulf %195, %192 : vector<32x32xf32>
    %197 = arith.select %194, %192, %196 : vector<32x32xi1>, vector<32x32xf32>
    %198 = arith.truncf %178 : vector<32x32xf32> to vector<32x32xbf16>
    %c0_102 = arith.constant 0 : index
    %c1_103 = arith.constant 1 : index
    %c0_104 = arith.constant 0 : index
    %c0_105 = arith.constant 0 : index
    %199 = vector.load %arg8[%c0_102, %c1_103, %c0_104, %c0_105] : memref<2x3x32x32xbf16, #tpu.memory_space<vmem>>, vector<1x1x32x32xbf16>
    %200 = vector.shape_cast %199 : vector<1x1x32x32xbf16> to vector<32x32xbf16>
    %cst_106 = arith.constant dense<0.000000e+00> : vector<32x32xf32>
    %201 = tpu.matmul %198, %200, %cst_106 {dimension_numbers = #tpu.dot_dimension_numbers<[1], [0], [0], [1], [0, 0, 1, 1], [], []>} : vector<32x32xbf16>, vector<32x32xbf16>, vector<32x32xf32> -> vector<32x32xf32>
    %c0_107 = arith.constant 0 : index
    %c1_108 = arith.constant 1 : index
    %c0_109 = arith.constant 0 : index
    %c0_110 = arith.constant 0 : index
    %202 = vector.load %arg9[%c0_107, %c1_108, %c0_109, %c0_110] : memref<2x3x1x32xf32, #tpu.memory_space<vmem>>, vector<1x1x1x32xf32>
    %203 = vector.shape_cast %202 : vector<1x1x1x32xf32> to vector<1x32xf32>
    %204 = vector.broadcast %203 : vector<1x32xf32> to vector<32x32xf32>
    %205 = arith.addf %201, %204 : vector<32x32xf32>
    %cst_111 = arith.constant 0.000000e+00 : f32
    %206 = vector.broadcast %cst_111 : f32 to vector<32x32xf32>
    %207 = arith.cmpf ogt, %205, %206 : vector<32x32xf32>
    %cst_112 = arith.constant 0.00999999977 : f32
    %208 = vector.broadcast %cst_112 : f32 to vector<32x32xf32>
    %209 = arith.mulf %208, %205 : vector<32x32xf32>
    %210 = arith.select %207, %205, %209 : vector<32x32xi1>, vector<32x32xf32>
    %211 = arith.addf %197, %210 : vector<32x32xf32>
    %c1_113 = arith.constant 1 : index
    %212 = memref.load %arg1[%c1_113] : memref<6xf32, #tpu.memory_space<smem>>
    %213 = vector.extract_strided_slice %4 {offsets = [32, 0], sizes = [32, 32], strides = [1, 1]} : vector<96x32xf32> to vector<32x32xf32>
    %214 = vector.broadcast %212 : f32 to vector<32x32xf32>
    %215 = arith.mulf %213, %214 : vector<32x32xf32>
    %216 = arith.addf %211, %215 : vector<32x32xf32>
    %cst_114 = arith.constant dense<0.000000e+00> : vector<32xf32>
    %217 = vector.multi_reduction <add>, %216, %cst_114 [1] : vector<32x32xf32> to vector<32xf32>
    %218 = vector.shape_cast %217 : vector<32xf32> to vector<32x1xf32>
    %cst_115 = arith.constant 3.200000e+01 : f32
    %219 = vector.broadcast %cst_115 : f32 to vector<32x1xf32>
    %220 = arith.divf %218, %219 : vector<32x1xf32>
    %221 = vector.broadcast %220 : vector<32x1xf32> to vector<32x32xf32>
    %222 = arith.subf %216, %221 : vector<32x32xf32>
    %223 = arith.mulf %222, %222 : vector<32x32xf32>
    %cst_116 = arith.constant dense<0.000000e+00> : vector<32xf32>
    %224 = vector.multi_reduction <add>, %223, %cst_116 [1] : vector<32x32xf32> to vector<32xf32>
    %225 = vector.shape_cast %224 : vector<32xf32> to vector<32x1xf32>
    %cst_117 = arith.constant 3.200000e+01 : f32
    %226 = vector.broadcast %cst_117 : f32 to vector<32x1xf32>
    %227 = arith.divf %225, %226 : vector<32x1xf32>
    %228 = vector.broadcast %220 : vector<32x1xf32> to vector<32x32xf32>
    %229 = arith.subf %216, %228 : vector<32x32xf32>
    %cst_118 = arith.constant 9.99999974E-6 : f32
    %230 = vector.broadcast %cst_118 : f32 to vector<32x1xf32>
    %231 = arith.addf %227, %230 : vector<32x1xf32>
    %232 = math.rsqrt %231 : vector<32x1xf32>
    %233 = vector.broadcast %232 : vector<32x1xf32> to vector<32x32xf32>
    %234 = arith.mulf %229, %233 : vector<32x32xf32>
    %c0_119 = arith.constant 0 : index
    %c1_120 = arith.constant 1 : index
    %c0_121 = arith.constant 0 : index
    %c0_122 = arith.constant 0 : index
    %235 = vector.load %arg10[%c0_119, %c1_120, %c0_121, %c0_122] : memref<2x3x1x32xf32, #tpu.memory_space<vmem>>, vector<1x1x1x32xf32>
    %236 = vector.shape_cast %235 : vector<1x1x1x32xf32> to vector<1x32xf32>
    %237 = vector.broadcast %236 : vector<1x32xf32> to vector<32x32xf32>
    %238 = arith.mulf %234, %237 : vector<32x32xf32>
    %c0_123 = arith.constant 0 : index
    %c1_124 = arith.constant 1 : index
    %c0_125 = arith.constant 0 : index
    %c0_126 = arith.constant 0 : index
    %239 = vector.load %arg11[%c0_123, %c1_124, %c0_125, %c0_126] : memref<2x3x1x32xf32, #tpu.memory_space<vmem>>, vector<1x1x1x32xf32>
    %240 = vector.shape_cast %239 : vector<1x1x1x32xf32> to vector<1x32xf32>
    %241 = vector.broadcast %240 : vector<1x32xf32> to vector<32x32xf32>
    %242 = arith.addf %238, %241 : vector<32x32xf32>
    %c0_127 = arith.constant 0 : index
    %c2 = arith.constant 2 : index
    %c0_128 = arith.constant 0 : index
    %c0_129 = arith.constant 0 : index
    %243 = vector.load %arg5[%c0_127, %c2, %c0_128, %c0_129] : memref<1x5x32x32xf32, #tpu.memory_space<vmem>>, vector<1x1x32x32xf32>
    %244 = vector.shape_cast %243 : vector<1x1x32x32xf32> to vector<32x32xf32>
    %245 = vector.extract_strided_slice %9 {offsets = [32, 2], sizes = [32, 1], strides = [1, 1]} : vector<96x10xf32> to vector<32x1xf32>
    %246 = vector.extract_strided_slice %9 {offsets = [64, 7], sizes = [32, 1], strides = [1, 1]} : vector<96x10xf32> to vector<32x1xf32>
    %247 = tpu.transpose %245, [1, 0] : vector<32x1xf32> -> vector<1x32xf32>
    %248 = vector.broadcast %246 : vector<32x1xf32> to vector<32x32xf32>
    %249 = vector.broadcast %247 : vector<1x32xf32> to vector<32x32xf32>
    %250 = arith.addf %248, %249 : vector<32x32xf32>
    %cst_130 = arith.constant 0.000000e+00 : f32
    %251 = vector.broadcast %cst_130 : f32 to vector<32x32xf32>
    %252 = arith.cmpf ogt, %250, %251 : vector<32x32xf32>
    %cst_131 = arith.constant 2.000000e-01 : f32
    %253 = vector.broadcast %cst_131 : f32 to vector<32x32xf32>
    %254 = arith.mulf %253, %250 : vector<32x32xf32>
    %255 = arith.select %252, %250, %254 : vector<32x32xi1>, vector<32x32xf32>
    %cst_132 = arith.constant 0.000000e+00 : f32
    %256 = vector.broadcast %cst_132 : f32 to vector<32x32xf32>
    %257 = arith.cmpf ogt, %244, %256 : vector<32x32xf32>
    %cst_133 = arith.constant -1.000000e+30 : f32
    %258 = vector.broadcast %cst_133 : f32 to vector<32x32xf32>
    %259 = arith.select %257, %255, %258 : vector<32x32xi1>, vector<32x32xf32>
    %cst_134 = arith.constant dense<0xFF800000> : vector<32xf32>
    %260 = vector.multi_reduction <maximumf>, %259, %cst_134 [1] : vector<32x32xf32> to vector<32xf32>
    %261 = vector.shape_cast %260 : vector<32xf32> to vector<32x1xf32>
    %262 = vector.broadcast %261 : vector<32x1xf32> to vector<32x32xf32>
    %263 = arith.subf %259, %262 : vector<32x32xf32>
    %264 = math.exp %263 : vector<32x32xf32>
    %cst_135 = arith.constant dense<0.000000e+00> : vector<32xf32>
    %265 = vector.multi_reduction <add>, %264, %cst_135 [1] : vector<32x32xf32> to vector<32xf32>
    %266 = vector.shape_cast %265 : vector<32xf32> to vector<32x1xf32>
    %267 = vector.broadcast %266 : vector<32x1xf32> to vector<32x32xf32>
    %268 = arith.divf %264, %267 : vector<32x32xf32>
    %269 = arith.mulf %268, %244 : vector<32x32xf32>
    %270 = vector.extract_strided_slice %11 {offsets = [32, 64], sizes = [32, 32], strides = [1, 1]} : vector<96x160xbf16> to vector<32x32xbf16>
    %271 = arith.truncf %269 : vector<32x32xf32> to vector<32x32xbf16>
    %cst_136 = arith.constant dense<0.000000e+00> : vector<32x32xf32>
    %272 = tpu.matmul %271, %270, %cst_136 {dimension_numbers = #tpu.dot_dimension_numbers<[1], [0], [0], [1], [0, 0, 1, 1], [], []>} : vector<32x32xbf16>, vector<32x32xbf16>, vector<32x32xf32> -> vector<32x32xf32>
    %c0_137 = arith.constant 0 : index
    %c0_138 = arith.constant 0 : index
    %c2_139 = arith.constant 2 : index
    %c0_140 = arith.constant 0 : index
    %c0_141 = arith.constant 0 : index
    %273 = vector.load %arg4[%c0_137, %c0_138, %c2_139, %c0_140, %c0_141] : memref<2x1x5x1x32xf32, #tpu.memory_space<vmem>>, vector<1x1x1x1x32xf32>
    %274 = vector.shape_cast %273 : vector<1x1x1x1x32xf32> to vector<1x32xf32>
    %275 = vector.broadcast %274 : vector<1x32xf32> to vector<32x32xf32>
    %276 = arith.addf %272, %275 : vector<32x32xf32>
    %277 = arith.mulf %276, %276 : vector<32x32xf32>
    %c0_142 = arith.constant 0 : index
    %c4 = arith.constant 4 : index
    %c0_143 = arith.constant 0 : index
    %c0_144 = arith.constant 0 : index
    %278 = vector.load %arg5[%c0_142, %c4, %c0_143, %c0_144] : memref<1x5x32x32xf32, #tpu.memory_space<vmem>>, vector<1x1x32x32xf32>
    %279 = vector.shape_cast %278 : vector<1x1x32x32xf32> to vector<32x32xf32>
    %280 = vector.extract_strided_slice %9 {offsets = [64, 4], sizes = [32, 1], strides = [1, 1]} : vector<96x10xf32> to vector<32x1xf32>
    %281 = vector.extract_strided_slice %9 {offsets = [64, 9], sizes = [32, 1], strides = [1, 1]} : vector<96x10xf32> to vector<32x1xf32>
    %282 = tpu.transpose %280, [1, 0] : vector<32x1xf32> -> vector<1x32xf32>
    %283 = vector.broadcast %281 : vector<32x1xf32> to vector<32x32xf32>
    %284 = vector.broadcast %282 : vector<1x32xf32> to vector<32x32xf32>
    %285 = arith.addf %283, %284 : vector<32x32xf32>
    %cst_145 = arith.constant 0.000000e+00 : f32
    %286 = vector.broadcast %cst_145 : f32 to vector<32x32xf32>
    %287 = arith.cmpf ogt, %285, %286 : vector<32x32xf32>
    %cst_146 = arith.constant 2.000000e-01 : f32
    %288 = vector.broadcast %cst_146 : f32 to vector<32x32xf32>
    %289 = arith.mulf %288, %285 : vector<32x32xf32>
    %290 = arith.select %287, %285, %289 : vector<32x32xi1>, vector<32x32xf32>
    %cst_147 = arith.constant 0.000000e+00 : f32
    %291 = vector.broadcast %cst_147 : f32 to vector<32x32xf32>
    %292 = arith.cmpf ogt, %279, %291 : vector<32x32xf32>
    %cst_148 = arith.constant -1.000000e+30 : f32
    %293 = vector.broadcast %cst_148 : f32 to vector<32x32xf32>
    %294 = arith.select %292, %290, %293 : vector<32x32xi1>, vector<32x32xf32>
    %cst_149 = arith.constant dense<0xFF800000> : vector<32xf32>
    %295 = vector.multi_reduction <maximumf>, %294, %cst_149 [1] : vector<32x32xf32> to vector<32xf32>
    %296 = vector.shape_cast %295 : vector<32xf32> to vector<32x1xf32>
    %297 = vector.broadcast %296 : vector<32x1xf32> to vector<32x32xf32>
    %298 = arith.subf %294, %297 : vector<32x32xf32>
    %299 = math.exp %298 : vector<32x32xf32>
    %cst_150 = arith.constant dense<0.000000e+00> : vector<32xf32>
    %300 = vector.multi_reduction <add>, %299, %cst_150 [1] : vector<32x32xf32> to vector<32xf32>
    %301 = vector.shape_cast %300 : vector<32xf32> to vector<32x1xf32>
    %302 = vector.broadcast %301 : vector<32x1xf32> to vector<32x32xf32>
    %303 = arith.divf %299, %302 : vector<32x32xf32>
    %304 = arith.mulf %303, %279 : vector<32x32xf32>
    %305 = vector.extract_strided_slice %11 {offsets = [64, 128], sizes = [32, 32], strides = [1, 1]} : vector<96x160xbf16> to vector<32x32xbf16>
    %306 = arith.truncf %304 : vector<32x32xf32> to vector<32x32xbf16>
    %cst_151 = arith.constant dense<0.000000e+00> : vector<32x32xf32>
    %307 = tpu.matmul %306, %305, %cst_151 {dimension_numbers = #tpu.dot_dimension_numbers<[1], [0], [0], [1], [0, 0, 1, 1], [], []>} : vector<32x32xbf16>, vector<32x32xbf16>, vector<32x32xf32> -> vector<32x32xf32>
    %c0_152 = arith.constant 0 : index
    %c0_153 = arith.constant 0 : index
    %c4_154 = arith.constant 4 : index
    %c0_155 = arith.constant 0 : index
    %c0_156 = arith.constant 0 : index
    %308 = vector.load %arg4[%c0_152, %c0_153, %c4_154, %c0_155, %c0_156] : memref<2x1x5x1x32xf32, #tpu.memory_space<vmem>>, vector<1x1x1x1x32xf32>
    %309 = vector.shape_cast %308 : vector<1x1x1x1x32xf32> to vector<1x32xf32>
    %310 = vector.broadcast %309 : vector<1x32xf32> to vector<32x32xf32>
    %311 = arith.addf %307, %310 : vector<32x32xf32>
    %312 = arith.addf %276, %311 : vector<32x32xf32>
    %313 = arith.mulf %311, %311 : vector<32x32xf32>
    %314 = arith.addf %277, %313 : vector<32x32xf32>
    %315 = arith.mulf %312, %312 : vector<32x32xf32>
    %316 = arith.subf %315, %314 : vector<32x32xf32>
    %cst_157 = arith.constant 5.000000e-01 : f32
    %317 = vector.broadcast %cst_157 : f32 to vector<32x32xf32>
    %318 = arith.mulf %317, %316 : vector<32x32xf32>
    %319 = arith.truncf %318 : vector<32x32xf32> to vector<32x32xbf16>
    %c0_158 = arith.constant 0 : index
    %c2_159 = arith.constant 2 : index
    %c0_160 = arith.constant 0 : index
    %c0_161 = arith.constant 0 : index
    %320 = vector.load %arg6[%c0_158, %c2_159, %c0_160, %c0_161] : memref<2x3x32x32xbf16, #tpu.memory_space<vmem>>, vector<1x1x32x32xbf16>
    %321 = vector.shape_cast %320 : vector<1x1x32x32xbf16> to vector<32x32xbf16>
    %cst_162 = arith.constant dense<0.000000e+00> : vector<32x32xf32>
    %322 = tpu.matmul %319, %321, %cst_162 {dimension_numbers = #tpu.dot_dimension_numbers<[1], [0], [0], [1], [0, 0, 1, 1], [], []>} : vector<32x32xbf16>, vector<32x32xbf16>, vector<32x32xf32> -> vector<32x32xf32>
    %c0_163 = arith.constant 0 : index
    %c2_164 = arith.constant 2 : index
    %c0_165 = arith.constant 0 : index
    %c0_166 = arith.constant 0 : index
    %323 = vector.load %arg7[%c0_163, %c2_164, %c0_165, %c0_166] : memref<2x3x1x32xf32, #tpu.memory_space<vmem>>, vector<1x1x1x32xf32>
    %324 = vector.shape_cast %323 : vector<1x1x1x32xf32> to vector<1x32xf32>
    %325 = vector.broadcast %324 : vector<1x32xf32> to vector<32x32xf32>
    %326 = arith.addf %322, %325 : vector<32x32xf32>
    %cst_167 = arith.constant 0.000000e+00 : f32
    %327 = vector.broadcast %cst_167 : f32 to vector<32x32xf32>
    %328 = arith.cmpf ogt, %326, %327 : vector<32x32xf32>
    %cst_168 = arith.constant 0.00999999977 : f32
    %329 = vector.broadcast %cst_168 : f32 to vector<32x32xf32>
    %330 = arith.mulf %329, %326 : vector<32x32xf32>
    %331 = arith.select %328, %326, %330 : vector<32x32xi1>, vector<32x32xf32>
    %332 = arith.truncf %312 : vector<32x32xf32> to vector<32x32xbf16>
    %c0_169 = arith.constant 0 : index
    %c2_170 = arith.constant 2 : index
    %c0_171 = arith.constant 0 : index
    %c0_172 = arith.constant 0 : index
    %333 = vector.load %arg8[%c0_169, %c2_170, %c0_171, %c0_172] : memref<2x3x32x32xbf16, #tpu.memory_space<vmem>>, vector<1x1x32x32xbf16>
    %334 = vector.shape_cast %333 : vector<1x1x32x32xbf16> to vector<32x32xbf16>
    %cst_173 = arith.constant dense<0.000000e+00> : vector<32x32xf32>
    %335 = tpu.matmul %332, %334, %cst_173 {dimension_numbers = #tpu.dot_dimension_numbers<[1], [0], [0], [1], [0, 0, 1, 1], [], []>} : vector<32x32xbf16>, vector<32x32xbf16>, vector<32x32xf32> -> vector<32x32xf32>
    %c0_174 = arith.constant 0 : index
    %c2_175 = arith.constant 2 : index
    %c0_176 = arith.constant 0 : index
    %c0_177 = arith.constant 0 : index
    %336 = vector.load %arg9[%c0_174, %c2_175, %c0_176, %c0_177] : memref<2x3x1x32xf32, #tpu.memory_space<vmem>>, vector<1x1x1x32xf32>
    %337 = vector.shape_cast %336 : vector<1x1x1x32xf32> to vector<1x32xf32>
    %338 = vector.broadcast %337 : vector<1x32xf32> to vector<32x32xf32>
    %339 = arith.addf %335, %338 : vector<32x32xf32>
    %cst_178 = arith.constant 0.000000e+00 : f32
    %340 = vector.broadcast %cst_178 : f32 to vector<32x32xf32>
    %341 = arith.cmpf ogt, %339, %340 : vector<32x32xf32>
    %cst_179 = arith.constant 0.00999999977 : f32
    %342 = vector.broadcast %cst_179 : f32 to vector<32x32xf32>
    %343 = arith.mulf %342, %339 : vector<32x32xf32>
    %344 = arith.select %341, %339, %343 : vector<32x32xi1>, vector<32x32xf32>
    %345 = arith.addf %331, %344 : vector<32x32xf32>
    %c2_180 = arith.constant 2 : index
    %346 = memref.load %arg1[%c2_180] : memref<6xf32, #tpu.memory_space<smem>>
    %347 = vector.extract_strided_slice %4 {offsets = [64, 0], sizes = [32, 32], strides = [1, 1]} : vector<96x32xf32> to vector<32x32xf32>
    %348 = vector.broadcast %346 : f32 to vector<32x32xf32>
    %349 = arith.mulf %347, %348 : vector<32x32xf32>
    %350 = arith.addf %345, %349 : vector<32x32xf32>
    %cst_181 = arith.constant dense<0.000000e+00> : vector<32xf32>
    %351 = vector.multi_reduction <add>, %350, %cst_181 [1] : vector<32x32xf32> to vector<32xf32>
    %352 = vector.shape_cast %351 : vector<32xf32> to vector<32x1xf32>
    %cst_182 = arith.constant 3.200000e+01 : f32
    %353 = vector.broadcast %cst_182 : f32 to vector<32x1xf32>
    %354 = arith.divf %352, %353 : vector<32x1xf32>
    %355 = vector.broadcast %354 : vector<32x1xf32> to vector<32x32xf32>
    %356 = arith.subf %350, %355 : vector<32x32xf32>
    %357 = arith.mulf %356, %356 : vector<32x32xf32>
    %cst_183 = arith.constant dense<0.000000e+00> : vector<32xf32>
    %358 = vector.multi_reduction <add>, %357, %cst_183 [1] : vector<32x32xf32> to vector<32xf32>
    %359 = vector.shape_cast %358 : vector<32xf32> to vector<32x1xf32>
    %cst_184 = arith.constant 3.200000e+01 : f32
    %360 = vector.broadcast %cst_184 : f32 to vector<32x1xf32>
    %361 = arith.divf %359, %360 : vector<32x1xf32>
    %362 = vector.broadcast %354 : vector<32x1xf32> to vector<32x32xf32>
    %363 = arith.subf %350, %362 : vector<32x32xf32>
    %cst_185 = arith.constant 9.99999974E-6 : f32
    %364 = vector.broadcast %cst_185 : f32 to vector<32x1xf32>
    %365 = arith.addf %361, %364 : vector<32x1xf32>
    %366 = math.rsqrt %365 : vector<32x1xf32>
    %367 = vector.broadcast %366 : vector<32x1xf32> to vector<32x32xf32>
    %368 = arith.mulf %363, %367 : vector<32x32xf32>
    %c0_186 = arith.constant 0 : index
    %c2_187 = arith.constant 2 : index
    %c0_188 = arith.constant 0 : index
    %c0_189 = arith.constant 0 : index
    %369 = vector.load %arg10[%c0_186, %c2_187, %c0_188, %c0_189] : memref<2x3x1x32xf32, #tpu.memory_space<vmem>>, vector<1x1x1x32xf32>
    %370 = vector.shape_cast %369 : vector<1x1x1x32xf32> to vector<1x32xf32>
    %371 = vector.broadcast %370 : vector<1x32xf32> to vector<32x32xf32>
    %372 = arith.mulf %368, %371 : vector<32x32xf32>
    %c0_190 = arith.constant 0 : index
    %c2_191 = arith.constant 2 : index
    %c0_192 = arith.constant 0 : index
    %c0_193 = arith.constant 0 : index
    %373 = vector.load %arg11[%c0_190, %c2_191, %c0_192, %c0_193] : memref<2x3x1x32xf32, #tpu.memory_space<vmem>>, vector<1x1x1x32xf32>
    %374 = vector.shape_cast %373 : vector<1x1x1x32xf32> to vector<1x32xf32>
    %375 = vector.broadcast %374 : vector<1x32xf32> to vector<32x32xf32>
    %376 = arith.addf %372, %375 : vector<32x32xf32>
    %377 = tpu.concatenate %108, %242, %376 in 0 : vector<32x32xf32>, vector<32x32xf32>, vector<32x32xf32> -> vector<96x32xf32>
    %378 = arith.truncf %377 : vector<96x32xf32> to vector<96x32xbf16>
    %c1_194 = arith.constant 1 : index
    %c0_195 = arith.constant 0 : index
    %c0_196 = arith.constant 0 : index
    %c0_197 = arith.constant 0 : index
    %379 = vector.load %arg3[%c1_194, %c0_195, %c0_196, %c0_197] : memref<2x1x32x170xbf16, #tpu.memory_space<vmem>>, vector<1x1x32x170xbf16>
    %380 = vector.shape_cast %379 : vector<1x1x32x170xbf16> to vector<32x170xbf16>
    %cst_198 = arith.constant dense<0.000000e+00> : vector<96x170xf32>
    %381 = tpu.matmul %378, %380, %cst_198 {dimension_numbers = #tpu.dot_dimension_numbers<[1], [0], [0], [1], [0, 0, 1, 1], [], []>} : vector<96x32xbf16>, vector<32x170xbf16>, vector<96x170xf32> -> vector<96x170xf32>
    %382 = vector.extract_strided_slice %381 {offsets = [0, 160], sizes = [96, 10], strides = [1, 1]} : vector<96x170xf32> to vector<96x10xf32>
    %383 = vector.extract_strided_slice %381 {offsets = [0, 0], sizes = [96, 160], strides = [1, 1]} : vector<96x170xf32> to vector<96x160xf32>
    %384 = arith.truncf %383 : vector<96x160xf32> to vector<96x160xbf16>
    %c0_199 = arith.constant 0 : index
    %c0_200 = arith.constant 0 : index
    %c0_201 = arith.constant 0 : index
    %c0_202 = arith.constant 0 : index
    %385 = vector.load %arg5[%c0_199, %c0_200, %c0_201, %c0_202] : memref<1x5x32x32xf32, #tpu.memory_space<vmem>>, vector<1x1x32x32xf32>
    %386 = vector.shape_cast %385 : vector<1x1x32x32xf32> to vector<32x32xf32>
    %387 = vector.extract_strided_slice %382 {offsets = [32, 0], sizes = [32, 1], strides = [1, 1]} : vector<96x10xf32> to vector<32x1xf32>
    %388 = vector.extract_strided_slice %382 {offsets = [0, 5], sizes = [32, 1], strides = [1, 1]} : vector<96x10xf32> to vector<32x1xf32>
    %389 = tpu.transpose %387, [1, 0] : vector<32x1xf32> -> vector<1x32xf32>
    %390 = vector.broadcast %388 : vector<32x1xf32> to vector<32x32xf32>
    %391 = vector.broadcast %389 : vector<1x32xf32> to vector<32x32xf32>
    %392 = arith.addf %390, %391 : vector<32x32xf32>
    %cst_203 = arith.constant 0.000000e+00 : f32
    %393 = vector.broadcast %cst_203 : f32 to vector<32x32xf32>
    %394 = arith.cmpf ogt, %392, %393 : vector<32x32xf32>
    %cst_204 = arith.constant 2.000000e-01 : f32
    %395 = vector.broadcast %cst_204 : f32 to vector<32x32xf32>
    %396 = arith.mulf %395, %392 : vector<32x32xf32>
    %397 = arith.select %394, %392, %396 : vector<32x32xi1>, vector<32x32xf32>
    %cst_205 = arith.constant 0.000000e+00 : f32
    %398 = vector.broadcast %cst_205 : f32 to vector<32x32xf32>
    %399 = arith.cmpf ogt, %386, %398 : vector<32x32xf32>
    %cst_206 = arith.constant -1.000000e+30 : f32
    %400 = vector.broadcast %cst_206 : f32 to vector<32x32xf32>
    %401 = arith.select %399, %397, %400 : vector<32x32xi1>, vector<32x32xf32>
    %cst_207 = arith.constant dense<0xFF800000> : vector<32xf32>
    %402 = vector.multi_reduction <maximumf>, %401, %cst_207 [1] : vector<32x32xf32> to vector<32xf32>
    %403 = vector.shape_cast %402 : vector<32xf32> to vector<32x1xf32>
    %404 = vector.broadcast %403 : vector<32x1xf32> to vector<32x32xf32>
    %405 = arith.subf %401, %404 : vector<32x32xf32>
    %406 = math.exp %405 : vector<32x32xf32>
    %cst_208 = arith.constant dense<0.000000e+00> : vector<32xf32>
    %407 = vector.multi_reduction <add>, %406, %cst_208 [1] : vector<32x32xf32> to vector<32xf32>
    %408 = vector.shape_cast %407 : vector<32xf32> to vector<32x1xf32>
    %409 = vector.broadcast %408 : vector<32x1xf32> to vector<32x32xf32>
    %410 = arith.divf %406, %409 : vector<32x32xf32>
    %411 = arith.mulf %410, %386 : vector<32x32xf32>
    %412 = vector.extract_strided_slice %384 {offsets = [32, 0], sizes = [32, 32], strides = [1, 1]} : vector<96x160xbf16> to vector<32x32xbf16>
    %413 = arith.truncf %411 : vector<32x32xf32> to vector<32x32xbf16>
    %cst_209 = arith.constant dense<0.000000e+00> : vector<32x32xf32>
    %414 = tpu.matmul %413, %412, %cst_209 {dimension_numbers = #tpu.dot_dimension_numbers<[1], [0], [0], [1], [0, 0, 1, 1], [], []>} : vector<32x32xbf16>, vector<32x32xbf16>, vector<32x32xf32> -> vector<32x32xf32>
    %c1_210 = arith.constant 1 : index
    %c0_211 = arith.constant 0 : index
    %c0_212 = arith.constant 0 : index
    %c0_213 = arith.constant 0 : index
    %c0_214 = arith.constant 0 : index
    %415 = vector.load %arg4[%c1_210, %c0_211, %c0_212, %c0_213, %c0_214] : memref<2x1x5x1x32xf32, #tpu.memory_space<vmem>>, vector<1x1x1x1x32xf32>
    %416 = vector.shape_cast %415 : vector<1x1x1x1x32xf32> to vector<1x32xf32>
    %417 = vector.broadcast %416 : vector<1x32xf32> to vector<32x32xf32>
    %418 = arith.addf %414, %417 : vector<32x32xf32>
    %419 = arith.mulf %418, %418 : vector<32x32xf32>
    %420 = arith.mulf %418, %418 : vector<32x32xf32>
    %421 = arith.subf %420, %419 : vector<32x32xf32>
    %cst_215 = arith.constant 5.000000e-01 : f32
    %422 = vector.broadcast %cst_215 : f32 to vector<32x32xf32>
    %423 = arith.mulf %422, %421 : vector<32x32xf32>
    %424 = arith.truncf %423 : vector<32x32xf32> to vector<32x32xbf16>
    %c1_216 = arith.constant 1 : index
    %c0_217 = arith.constant 0 : index
    %c0_218 = arith.constant 0 : index
    %c0_219 = arith.constant 0 : index
    %425 = vector.load %arg6[%c1_216, %c0_217, %c0_218, %c0_219] : memref<2x3x32x32xbf16, #tpu.memory_space<vmem>>, vector<1x1x32x32xbf16>
    %426 = vector.shape_cast %425 : vector<1x1x32x32xbf16> to vector<32x32xbf16>
    %cst_220 = arith.constant dense<0.000000e+00> : vector<32x32xf32>
    %427 = tpu.matmul %424, %426, %cst_220 {dimension_numbers = #tpu.dot_dimension_numbers<[1], [0], [0], [1], [0, 0, 1, 1], [], []>} : vector<32x32xbf16>, vector<32x32xbf16>, vector<32x32xf32> -> vector<32x32xf32>
    %c1_221 = arith.constant 1 : index
    %c0_222 = arith.constant 0 : index
    %c0_223 = arith.constant 0 : index
    %c0_224 = arith.constant 0 : index
    %428 = vector.load %arg7[%c1_221, %c0_222, %c0_223, %c0_224] : memref<2x3x1x32xf32, #tpu.memory_space<vmem>>, vector<1x1x1x32xf32>
    %429 = vector.shape_cast %428 : vector<1x1x1x32xf32> to vector<1x32xf32>
    %430 = vector.broadcast %429 : vector<1x32xf32> to vector<32x32xf32>
    %431 = arith.addf %427, %430 : vector<32x32xf32>
    %cst_225 = arith.constant 0.000000e+00 : f32
    %432 = vector.broadcast %cst_225 : f32 to vector<32x32xf32>
    %433 = arith.cmpf ogt, %431, %432 : vector<32x32xf32>
    %cst_226 = arith.constant 0.00999999977 : f32
    %434 = vector.broadcast %cst_226 : f32 to vector<32x32xf32>
    %435 = arith.mulf %434, %431 : vector<32x32xf32>
    %436 = arith.select %433, %431, %435 : vector<32x32xi1>, vector<32x32xf32>
    %437 = arith.truncf %418 : vector<32x32xf32> to vector<32x32xbf16>
    %c1_227 = arith.constant 1 : index
    %c0_228 = arith.constant 0 : index
    %c0_229 = arith.constant 0 : index
    %c0_230 = arith.constant 0 : index
    %438 = vector.load %arg8[%c1_227, %c0_228, %c0_229, %c0_230] : memref<2x3x32x32xbf16, #tpu.memory_space<vmem>>, vector<1x1x32x32xbf16>
    %439 = vector.shape_cast %438 : vector<1x1x32x32xbf16> to vector<32x32xbf16>
    %cst_231 = arith.constant dense<0.000000e+00> : vector<32x32xf32>
    %440 = tpu.matmul %437, %439, %cst_231 {dimension_numbers = #tpu.dot_dimension_numbers<[1], [0], [0], [1], [0, 0, 1, 1], [], []>} : vector<32x32xbf16>, vector<32x32xbf16>, vector<32x32xf32> -> vector<32x32xf32>
    %c1_232 = arith.constant 1 : index
    %c0_233 = arith.constant 0 : index
    %c0_234 = arith.constant 0 : index
    %c0_235 = arith.constant 0 : index
    %441 = vector.load %arg9[%c1_232, %c0_233, %c0_234, %c0_235] : memref<2x3x1x32xf32, #tpu.memory_space<vmem>>, vector<1x1x1x32xf32>
    %442 = vector.shape_cast %441 : vector<1x1x1x32xf32> to vector<1x32xf32>
    %443 = vector.broadcast %442 : vector<1x32xf32> to vector<32x32xf32>
    %444 = arith.addf %440, %443 : vector<32x32xf32>
    %cst_236 = arith.constant 0.000000e+00 : f32
    %445 = vector.broadcast %cst_236 : f32 to vector<32x32xf32>
    %446 = arith.cmpf ogt, %444, %445 : vector<32x32xf32>
    %cst_237 = arith.constant 0.00999999977 : f32
    %447 = vector.broadcast %cst_237 : f32 to vector<32x32xf32>
    %448 = arith.mulf %447, %444 : vector<32x32xf32>
    %449 = arith.select %446, %444, %448 : vector<32x32xi1>, vector<32x32xf32>
    %450 = arith.addf %436, %449 : vector<32x32xf32>
    %c3_238 = arith.constant 3 : index
    %451 = memref.load %arg1[%c3_238] : memref<6xf32, #tpu.memory_space<smem>>
    %452 = vector.extract_strided_slice %377 {offsets = [0, 0], sizes = [32, 32], strides = [1, 1]} : vector<96x32xf32> to vector<32x32xf32>
    %453 = vector.broadcast %451 : f32 to vector<32x32xf32>
    %454 = arith.mulf %452, %453 : vector<32x32xf32>
    %455 = arith.addf %450, %454 : vector<32x32xf32>
    %cst_239 = arith.constant dense<0.000000e+00> : vector<32xf32>
    %456 = vector.multi_reduction <add>, %455, %cst_239 [1] : vector<32x32xf32> to vector<32xf32>
    %457 = vector.shape_cast %456 : vector<32xf32> to vector<32x1xf32>
    %cst_240 = arith.constant 3.200000e+01 : f32
    %458 = vector.broadcast %cst_240 : f32 to vector<32x1xf32>
    %459 = arith.divf %457, %458 : vector<32x1xf32>
    %460 = vector.broadcast %459 : vector<32x1xf32> to vector<32x32xf32>
    %461 = arith.subf %455, %460 : vector<32x32xf32>
    %462 = arith.mulf %461, %461 : vector<32x32xf32>
    %cst_241 = arith.constant dense<0.000000e+00> : vector<32xf32>
    %463 = vector.multi_reduction <add>, %462, %cst_241 [1] : vector<32x32xf32> to vector<32xf32>
    %464 = vector.shape_cast %463 : vector<32xf32> to vector<32x1xf32>
    %cst_242 = arith.constant 3.200000e+01 : f32
    %465 = vector.broadcast %cst_242 : f32 to vector<32x1xf32>
    %466 = arith.divf %464, %465 : vector<32x1xf32>
    %467 = vector.broadcast %459 : vector<32x1xf32> to vector<32x32xf32>
    %468 = arith.subf %455, %467 : vector<32x32xf32>
    %cst_243 = arith.constant 9.99999974E-6 : f32
    %469 = vector.broadcast %cst_243 : f32 to vector<32x1xf32>
    %470 = arith.addf %466, %469 : vector<32x1xf32>
    %471 = math.rsqrt %470 : vector<32x1xf32>
    %472 = vector.broadcast %471 : vector<32x1xf32> to vector<32x32xf32>
    %473 = arith.mulf %468, %472 : vector<32x32xf32>
    %c1_244 = arith.constant 1 : index
    %c0_245 = arith.constant 0 : index
    %c0_246 = arith.constant 0 : index
    %c0_247 = arith.constant 0 : index
    %474 = vector.load %arg10[%c1_244, %c0_245, %c0_246, %c0_247] : memref<2x3x1x32xf32, #tpu.memory_space<vmem>>, vector<1x1x1x32xf32>
    %475 = vector.shape_cast %474 : vector<1x1x1x32xf32> to vector<1x32xf32>
    %476 = vector.broadcast %475 : vector<1x32xf32> to vector<32x32xf32>
    %477 = arith.mulf %473, %476 : vector<32x32xf32>
    %c1_248 = arith.constant 1 : index
    %c0_249 = arith.constant 0 : index
    %c0_250 = arith.constant 0 : index
    %c0_251 = arith.constant 0 : index
    %478 = vector.load %arg11[%c1_248, %c0_249, %c0_250, %c0_251] : memref<2x3x1x32xf32, #tpu.memory_space<vmem>>, vector<1x1x1x32xf32>
    %479 = vector.shape_cast %478 : vector<1x1x1x32xf32> to vector<1x32xf32>
    %480 = vector.broadcast %479 : vector<1x32xf32> to vector<32x32xf32>
    %481 = arith.addf %477, %480 : vector<32x32xf32>
    %c0_252 = arith.constant 0 : index
    %c1_253 = arith.constant 1 : index
    %c0_254 = arith.constant 0 : index
    %c0_255 = arith.constant 0 : index
    %482 = vector.load %arg5[%c0_252, %c1_253, %c0_254, %c0_255] : memref<1x5x32x32xf32, #tpu.memory_space<vmem>>, vector<1x1x32x32xf32>
    %483 = vector.shape_cast %482 : vector<1x1x32x32xf32> to vector<32x32xf32>
    %484 = vector.extract_strided_slice %382 {offsets = [0, 1], sizes = [32, 1], strides = [1, 1]} : vector<96x10xf32> to vector<32x1xf32>
    %485 = vector.extract_strided_slice %382 {offsets = [32, 6], sizes = [32, 1], strides = [1, 1]} : vector<96x10xf32> to vector<32x1xf32>
    %486 = tpu.transpose %484, [1, 0] : vector<32x1xf32> -> vector<1x32xf32>
    %487 = vector.broadcast %485 : vector<32x1xf32> to vector<32x32xf32>
    %488 = vector.broadcast %486 : vector<1x32xf32> to vector<32x32xf32>
    %489 = arith.addf %487, %488 : vector<32x32xf32>
    %cst_256 = arith.constant 0.000000e+00 : f32
    %490 = vector.broadcast %cst_256 : f32 to vector<32x32xf32>
    %491 = arith.cmpf ogt, %489, %490 : vector<32x32xf32>
    %cst_257 = arith.constant 2.000000e-01 : f32
    %492 = vector.broadcast %cst_257 : f32 to vector<32x32xf32>
    %493 = arith.mulf %492, %489 : vector<32x32xf32>
    %494 = arith.select %491, %489, %493 : vector<32x32xi1>, vector<32x32xf32>
    %cst_258 = arith.constant 0.000000e+00 : f32
    %495 = vector.broadcast %cst_258 : f32 to vector<32x32xf32>
    %496 = arith.cmpf ogt, %483, %495 : vector<32x32xf32>
    %cst_259 = arith.constant -1.000000e+30 : f32
    %497 = vector.broadcast %cst_259 : f32 to vector<32x32xf32>
    %498 = arith.select %496, %494, %497 : vector<32x32xi1>, vector<32x32xf32>
    %cst_260 = arith.constant dense<0xFF800000> : vector<32xf32>
    %499 = vector.multi_reduction <maximumf>, %498, %cst_260 [1] : vector<32x32xf32> to vector<32xf32>
    %500 = vector.shape_cast %499 : vector<32xf32> to vector<32x1xf32>
    %501 = vector.broadcast %500 : vector<32x1xf32> to vector<32x32xf32>
    %502 = arith.subf %498, %501 : vector<32x32xf32>
    %503 = math.exp %502 : vector<32x32xf32>
    %cst_261 = arith.constant dense<0.000000e+00> : vector<32xf32>
    %504 = vector.multi_reduction <add>, %503, %cst_261 [1] : vector<32x32xf32> to vector<32xf32>
    %505 = vector.shape_cast %504 : vector<32xf32> to vector<32x1xf32>
    %506 = vector.broadcast %505 : vector<32x1xf32> to vector<32x32xf32>
    %507 = arith.divf %503, %506 : vector<32x32xf32>
    %508 = arith.mulf %507, %483 : vector<32x32xf32>
    %509 = vector.extract_strided_slice %384 {offsets = [0, 32], sizes = [32, 32], strides = [1, 1]} : vector<96x160xbf16> to vector<32x32xbf16>
    %510 = arith.truncf %508 : vector<32x32xf32> to vector<32x32xbf16>
    %cst_262 = arith.constant dense<0.000000e+00> : vector<32x32xf32>
    %511 = tpu.matmul %510, %509, %cst_262 {dimension_numbers = #tpu.dot_dimension_numbers<[1], [0], [0], [1], [0, 0, 1, 1], [], []>} : vector<32x32xbf16>, vector<32x32xbf16>, vector<32x32xf32> -> vector<32x32xf32>
    %c1_263 = arith.constant 1 : index
    %c0_264 = arith.constant 0 : index
    %c1_265 = arith.constant 1 : index
    %c0_266 = arith.constant 0 : index
    %c0_267 = arith.constant 0 : index
    %512 = vector.load %arg4[%c1_263, %c0_264, %c1_265, %c0_266, %c0_267] : memref<2x1x5x1x32xf32, #tpu.memory_space<vmem>>, vector<1x1x1x1x32xf32>
    %513 = vector.shape_cast %512 : vector<1x1x1x1x32xf32> to vector<1x32xf32>
    %514 = vector.broadcast %513 : vector<1x32xf32> to vector<32x32xf32>
    %515 = arith.addf %511, %514 : vector<32x32xf32>
    %516 = arith.mulf %515, %515 : vector<32x32xf32>
    %c0_268 = arith.constant 0 : index
    %c3_269 = arith.constant 3 : index
    %c0_270 = arith.constant 0 : index
    %c0_271 = arith.constant 0 : index
    %517 = vector.load %arg5[%c0_268, %c3_269, %c0_270, %c0_271] : memref<1x5x32x32xf32, #tpu.memory_space<vmem>>, vector<1x1x32x32xf32>
    %518 = vector.shape_cast %517 : vector<1x1x32x32xf32> to vector<32x32xf32>
    %519 = vector.extract_strided_slice %382 {offsets = [64, 3], sizes = [32, 1], strides = [1, 1]} : vector<96x10xf32> to vector<32x1xf32>
    %520 = vector.extract_strided_slice %382 {offsets = [32, 8], sizes = [32, 1], strides = [1, 1]} : vector<96x10xf32> to vector<32x1xf32>
    %521 = tpu.transpose %519, [1, 0] : vector<32x1xf32> -> vector<1x32xf32>
    %522 = vector.broadcast %520 : vector<32x1xf32> to vector<32x32xf32>
    %523 = vector.broadcast %521 : vector<1x32xf32> to vector<32x32xf32>
    %524 = arith.addf %522, %523 : vector<32x32xf32>
    %cst_272 = arith.constant 0.000000e+00 : f32
    %525 = vector.broadcast %cst_272 : f32 to vector<32x32xf32>
    %526 = arith.cmpf ogt, %524, %525 : vector<32x32xf32>
    %cst_273 = arith.constant 2.000000e-01 : f32
    %527 = vector.broadcast %cst_273 : f32 to vector<32x32xf32>
    %528 = arith.mulf %527, %524 : vector<32x32xf32>
    %529 = arith.select %526, %524, %528 : vector<32x32xi1>, vector<32x32xf32>
    %cst_274 = arith.constant 0.000000e+00 : f32
    %530 = vector.broadcast %cst_274 : f32 to vector<32x32xf32>
    %531 = arith.cmpf ogt, %518, %530 : vector<32x32xf32>
    %cst_275 = arith.constant -1.000000e+30 : f32
    %532 = vector.broadcast %cst_275 : f32 to vector<32x32xf32>
    %533 = arith.select %531, %529, %532 : vector<32x32xi1>, vector<32x32xf32>
    %cst_276 = arith.constant dense<0xFF800000> : vector<32xf32>
    %534 = vector.multi_reduction <maximumf>, %533, %cst_276 [1] : vector<32x32xf32> to vector<32xf32>
    %535 = vector.shape_cast %534 : vector<32xf32> to vector<32x1xf32>
    %536 = vector.broadcast %535 : vector<32x1xf32> to vector<32x32xf32>
    %537 = arith.subf %533, %536 : vector<32x32xf32>
    %538 = math.exp %537 : vector<32x32xf32>
    %cst_277 = arith.constant dense<0.000000e+00> : vector<32xf32>
    %539 = vector.multi_reduction <add>, %538, %cst_277 [1] : vector<32x32xf32> to vector<32xf32>
    %540 = vector.shape_cast %539 : vector<32xf32> to vector<32x1xf32>
    %541 = vector.broadcast %540 : vector<32x1xf32> to vector<32x32xf32>
    %542 = arith.divf %538, %541 : vector<32x32xf32>
    %543 = arith.mulf %542, %518 : vector<32x32xf32>
    %544 = vector.extract_strided_slice %384 {offsets = [64, 96], sizes = [32, 32], strides = [1, 1]} : vector<96x160xbf16> to vector<32x32xbf16>
    %545 = arith.truncf %543 : vector<32x32xf32> to vector<32x32xbf16>
    %cst_278 = arith.constant dense<0.000000e+00> : vector<32x32xf32>
    %546 = tpu.matmul %545, %544, %cst_278 {dimension_numbers = #tpu.dot_dimension_numbers<[1], [0], [0], [1], [0, 0, 1, 1], [], []>} : vector<32x32xbf16>, vector<32x32xbf16>, vector<32x32xf32> -> vector<32x32xf32>
    %c1_279 = arith.constant 1 : index
    %c0_280 = arith.constant 0 : index
    %c3_281 = arith.constant 3 : index
    %c0_282 = arith.constant 0 : index
    %c0_283 = arith.constant 0 : index
    %547 = vector.load %arg4[%c1_279, %c0_280, %c3_281, %c0_282, %c0_283] : memref<2x1x5x1x32xf32, #tpu.memory_space<vmem>>, vector<1x1x1x1x32xf32>
    %548 = vector.shape_cast %547 : vector<1x1x1x1x32xf32> to vector<1x32xf32>
    %549 = vector.broadcast %548 : vector<1x32xf32> to vector<32x32xf32>
    %550 = arith.addf %546, %549 : vector<32x32xf32>
    %551 = arith.addf %515, %550 : vector<32x32xf32>
    %552 = arith.mulf %550, %550 : vector<32x32xf32>
    %553 = arith.addf %516, %552 : vector<32x32xf32>
    %554 = arith.mulf %551, %551 : vector<32x32xf32>
    %555 = arith.subf %554, %553 : vector<32x32xf32>
    %cst_284 = arith.constant 5.000000e-01 : f32
    %556 = vector.broadcast %cst_284 : f32 to vector<32x32xf32>
    %557 = arith.mulf %556, %555 : vector<32x32xf32>
    %558 = arith.truncf %557 : vector<32x32xf32> to vector<32x32xbf16>
    %c1_285 = arith.constant 1 : index
    %c1_286 = arith.constant 1 : index
    %c0_287 = arith.constant 0 : index
    %c0_288 = arith.constant 0 : index
    %559 = vector.load %arg6[%c1_285, %c1_286, %c0_287, %c0_288] : memref<2x3x32x32xbf16, #tpu.memory_space<vmem>>, vector<1x1x32x32xbf16>
    %560 = vector.shape_cast %559 : vector<1x1x32x32xbf16> to vector<32x32xbf16>
    %cst_289 = arith.constant dense<0.000000e+00> : vector<32x32xf32>
    %561 = tpu.matmul %558, %560, %cst_289 {dimension_numbers = #tpu.dot_dimension_numbers<[1], [0], [0], [1], [0, 0, 1, 1], [], []>} : vector<32x32xbf16>, vector<32x32xbf16>, vector<32x32xf32> -> vector<32x32xf32>
    %c1_290 = arith.constant 1 : index
    %c1_291 = arith.constant 1 : index
    %c0_292 = arith.constant 0 : index
    %c0_293 = arith.constant 0 : index
    %562 = vector.load %arg7[%c1_290, %c1_291, %c0_292, %c0_293] : memref<2x3x1x32xf32, #tpu.memory_space<vmem>>, vector<1x1x1x32xf32>
    %563 = vector.shape_cast %562 : vector<1x1x1x32xf32> to vector<1x32xf32>
    %564 = vector.broadcast %563 : vector<1x32xf32> to vector<32x32xf32>
    %565 = arith.addf %561, %564 : vector<32x32xf32>
    %cst_294 = arith.constant 0.000000e+00 : f32
    %566 = vector.broadcast %cst_294 : f32 to vector<32x32xf32>
    %567 = arith.cmpf ogt, %565, %566 : vector<32x32xf32>
    %cst_295 = arith.constant 0.00999999977 : f32
    %568 = vector.broadcast %cst_295 : f32 to vector<32x32xf32>
    %569 = arith.mulf %568, %565 : vector<32x32xf32>
    %570 = arith.select %567, %565, %569 : vector<32x32xi1>, vector<32x32xf32>
    %571 = arith.truncf %551 : vector<32x32xf32> to vector<32x32xbf16>
    %c1_296 = arith.constant 1 : index
    %c1_297 = arith.constant 1 : index
    %c0_298 = arith.constant 0 : index
    %c0_299 = arith.constant 0 : index
    %572 = vector.load %arg8[%c1_296, %c1_297, %c0_298, %c0_299] : memref<2x3x32x32xbf16, #tpu.memory_space<vmem>>, vector<1x1x32x32xbf16>
    %573 = vector.shape_cast %572 : vector<1x1x32x32xbf16> to vector<32x32xbf16>
    %cst_300 = arith.constant dense<0.000000e+00> : vector<32x32xf32>
    %574 = tpu.matmul %571, %573, %cst_300 {dimension_numbers = #tpu.dot_dimension_numbers<[1], [0], [0], [1], [0, 0, 1, 1], [], []>} : vector<32x32xbf16>, vector<32x32xbf16>, vector<32x32xf32> -> vector<32x32xf32>
    %c1_301 = arith.constant 1 : index
    %c1_302 = arith.constant 1 : index
    %c0_303 = arith.constant 0 : index
    %c0_304 = arith.constant 0 : index
    %575 = vector.load %arg9[%c1_301, %c1_302, %c0_303, %c0_304] : memref<2x3x1x32xf32, #tpu.memory_space<vmem>>, vector<1x1x1x32xf32>
    %576 = vector.shape_cast %575 : vector<1x1x1x32xf32> to vector<1x32xf32>
    %577 = vector.broadcast %576 : vector<1x32xf32> to vector<32x32xf32>
    %578 = arith.addf %574, %577 : vector<32x32xf32>
    %cst_305 = arith.constant 0.000000e+00 : f32
    %579 = vector.broadcast %cst_305 : f32 to vector<32x32xf32>
    %580 = arith.cmpf ogt, %578, %579 : vector<32x32xf32>
    %cst_306 = arith.constant 0.00999999977 : f32
    %581 = vector.broadcast %cst_306 : f32 to vector<32x32xf32>
    %582 = arith.mulf %581, %578 : vector<32x32xf32>
    %583 = arith.select %580, %578, %582 : vector<32x32xi1>, vector<32x32xf32>
    %584 = arith.addf %570, %583 : vector<32x32xf32>
    %c4_307 = arith.constant 4 : index
    %585 = memref.load %arg1[%c4_307] : memref<6xf32, #tpu.memory_space<smem>>
    %586 = vector.extract_strided_slice %377 {offsets = [32, 0], sizes = [32, 32], strides = [1, 1]} : vector<96x32xf32> to vector<32x32xf32>
    %587 = vector.broadcast %585 : f32 to vector<32x32xf32>
    %588 = arith.mulf %586, %587 : vector<32x32xf32>
    %589 = arith.addf %584, %588 : vector<32x32xf32>
    %cst_308 = arith.constant dense<0.000000e+00> : vector<32xf32>
    %590 = vector.multi_reduction <add>, %589, %cst_308 [1] : vector<32x32xf32> to vector<32xf32>
    %591 = vector.shape_cast %590 : vector<32xf32> to vector<32x1xf32>
    %cst_309 = arith.constant 3.200000e+01 : f32
    %592 = vector.broadcast %cst_309 : f32 to vector<32x1xf32>
    %593 = arith.divf %591, %592 : vector<32x1xf32>
    %594 = vector.broadcast %593 : vector<32x1xf32> to vector<32x32xf32>
    %595 = arith.subf %589, %594 : vector<32x32xf32>
    %596 = arith.mulf %595, %595 : vector<32x32xf32>
    %cst_310 = arith.constant dense<0.000000e+00> : vector<32xf32>
    %597 = vector.multi_reduction <add>, %596, %cst_310 [1] : vector<32x32xf32> to vector<32xf32>
    %598 = vector.shape_cast %597 : vector<32xf32> to vector<32x1xf32>
    %cst_311 = arith.constant 3.200000e+01 : f32
    %599 = vector.broadcast %cst_311 : f32 to vector<32x1xf32>
    %600 = arith.divf %598, %599 : vector<32x1xf32>
    %601 = vector.broadcast %593 : vector<32x1xf32> to vector<32x32xf32>
    %602 = arith.subf %589, %601 : vector<32x32xf32>
    %cst_312 = arith.constant 9.99999974E-6 : f32
    %603 = vector.broadcast %cst_312 : f32 to vector<32x1xf32>
    %604 = arith.addf %600, %603 : vector<32x1xf32>
    %605 = math.rsqrt %604 : vector<32x1xf32>
    %606 = vector.broadcast %605 : vector<32x1xf32> to vector<32x32xf32>
    %607 = arith.mulf %602, %606 : vector<32x32xf32>
    %c1_313 = arith.constant 1 : index
    %c1_314 = arith.constant 1 : index
    %c0_315 = arith.constant 0 : index
    %c0_316 = arith.constant 0 : index
    %608 = vector.load %arg10[%c1_313, %c1_314, %c0_315, %c0_316] : memref<2x3x1x32xf32, #tpu.memory_space<vmem>>, vector<1x1x1x32xf32>
    %609 = vector.shape_cast %608 : vector<1x1x1x32xf32> to vector<1x32xf32>
    %610 = vector.broadcast %609 : vector<1x32xf32> to vector<32x32xf32>
    %611 = arith.mulf %607, %610 : vector<32x32xf32>
    %c1_317 = arith.constant 1 : index
    %c1_318 = arith.constant 1 : index
    %c0_319 = arith.constant 0 : index
    %c0_320 = arith.constant 0 : index
    %612 = vector.load %arg11[%c1_317, %c1_318, %c0_319, %c0_320] : memref<2x3x1x32xf32, #tpu.memory_space<vmem>>, vector<1x1x1x32xf32>
    %613 = vector.shape_cast %612 : vector<1x1x1x32xf32> to vector<1x32xf32>
    %614 = vector.broadcast %613 : vector<1x32xf32> to vector<32x32xf32>
    %615 = arith.addf %611, %614 : vector<32x32xf32>
    %c0_321 = arith.constant 0 : index
    %c2_322 = arith.constant 2 : index
    %c0_323 = arith.constant 0 : index
    %c0_324 = arith.constant 0 : index
    %616 = vector.load %arg5[%c0_321, %c2_322, %c0_323, %c0_324] : memref<1x5x32x32xf32, #tpu.memory_space<vmem>>, vector<1x1x32x32xf32>
    %617 = vector.shape_cast %616 : vector<1x1x32x32xf32> to vector<32x32xf32>
    %618 = vector.extract_strided_slice %382 {offsets = [32, 2], sizes = [32, 1], strides = [1, 1]} : vector<96x10xf32> to vector<32x1xf32>
    %619 = vector.extract_strided_slice %382 {offsets = [64, 7], sizes = [32, 1], strides = [1, 1]} : vector<96x10xf32> to vector<32x1xf32>
    %620 = tpu.transpose %618, [1, 0] : vector<32x1xf32> -> vector<1x32xf32>
    %621 = vector.broadcast %619 : vector<32x1xf32> to vector<32x32xf32>
    %622 = vector.broadcast %620 : vector<1x32xf32> to vector<32x32xf32>
    %623 = arith.addf %621, %622 : vector<32x32xf32>
    %cst_325 = arith.constant 0.000000e+00 : f32
    %624 = vector.broadcast %cst_325 : f32 to vector<32x32xf32>
    %625 = arith.cmpf ogt, %623, %624 : vector<32x32xf32>
    %cst_326 = arith.constant 2.000000e-01 : f32
    %626 = vector.broadcast %cst_326 : f32 to vector<32x32xf32>
    %627 = arith.mulf %626, %623 : vector<32x32xf32>
    %628 = arith.select %625, %623, %627 : vector<32x32xi1>, vector<32x32xf32>
    %cst_327 = arith.constant 0.000000e+00 : f32
    %629 = vector.broadcast %cst_327 : f32 to vector<32x32xf32>
    %630 = arith.cmpf ogt, %617, %629 : vector<32x32xf32>
    %cst_328 = arith.constant -1.000000e+30 : f32
    %631 = vector.broadcast %cst_328 : f32 to vector<32x32xf32>
    %632 = arith.select %630, %628, %631 : vector<32x32xi1>, vector<32x32xf32>
    %cst_329 = arith.constant dense<0xFF800000> : vector<32xf32>
    %633 = vector.multi_reduction <maximumf>, %632, %cst_329 [1] : vector<32x32xf32> to vector<32xf32>
    %634 = vector.shape_cast %633 : vector<32xf32> to vector<32x1xf32>
    %635 = vector.broadcast %634 : vector<32x1xf32> to vector<32x32xf32>
    %636 = arith.subf %632, %635 : vector<32x32xf32>
    %637 = math.exp %636 : vector<32x32xf32>
    %cst_330 = arith.constant dense<0.000000e+00> : vector<32xf32>
    %638 = vector.multi_reduction <add>, %637, %cst_330 [1] : vector<32x32xf32> to vector<32xf32>
    %639 = vector.shape_cast %638 : vector<32xf32> to vector<32x1xf32>
    %640 = vector.broadcast %639 : vector<32x1xf32> to vector<32x32xf32>
    %641 = arith.divf %637, %640 : vector<32x32xf32>
    %642 = arith.mulf %641, %617 : vector<32x32xf32>
    %643 = vector.extract_strided_slice %384 {offsets = [32, 64], sizes = [32, 32], strides = [1, 1]} : vector<96x160xbf16> to vector<32x32xbf16>
    %644 = arith.truncf %642 : vector<32x32xf32> to vector<32x32xbf16>
    %cst_331 = arith.constant dense<0.000000e+00> : vector<32x32xf32>
    %645 = tpu.matmul %644, %643, %cst_331 {dimension_numbers = #tpu.dot_dimension_numbers<[1], [0], [0], [1], [0, 0, 1, 1], [], []>} : vector<32x32xbf16>, vector<32x32xbf16>, vector<32x32xf32> -> vector<32x32xf32>
    %c1_332 = arith.constant 1 : index
    %c0_333 = arith.constant 0 : index
    %c2_334 = arith.constant 2 : index
    %c0_335 = arith.constant 0 : index
    %c0_336 = arith.constant 0 : index
    %646 = vector.load %arg4[%c1_332, %c0_333, %c2_334, %c0_335, %c0_336] : memref<2x1x5x1x32xf32, #tpu.memory_space<vmem>>, vector<1x1x1x1x32xf32>
    %647 = vector.shape_cast %646 : vector<1x1x1x1x32xf32> to vector<1x32xf32>
    %648 = vector.broadcast %647 : vector<1x32xf32> to vector<32x32xf32>
    %649 = arith.addf %645, %648 : vector<32x32xf32>
    %650 = arith.mulf %649, %649 : vector<32x32xf32>
    %c0_337 = arith.constant 0 : index
    %c4_338 = arith.constant 4 : index
    %c0_339 = arith.constant 0 : index
    %c0_340 = arith.constant 0 : index
    %651 = vector.load %arg5[%c0_337, %c4_338, %c0_339, %c0_340] : memref<1x5x32x32xf32, #tpu.memory_space<vmem>>, vector<1x1x32x32xf32>
    %652 = vector.shape_cast %651 : vector<1x1x32x32xf32> to vector<32x32xf32>
    %653 = vector.extract_strided_slice %382 {offsets = [64, 4], sizes = [32, 1], strides = [1, 1]} : vector<96x10xf32> to vector<32x1xf32>
    %654 = vector.extract_strided_slice %382 {offsets = [64, 9], sizes = [32, 1], strides = [1, 1]} : vector<96x10xf32> to vector<32x1xf32>
    %655 = tpu.transpose %653, [1, 0] : vector<32x1xf32> -> vector<1x32xf32>
    %656 = vector.broadcast %654 : vector<32x1xf32> to vector<32x32xf32>
    %657 = vector.broadcast %655 : vector<1x32xf32> to vector<32x32xf32>
    %658 = arith.addf %656, %657 : vector<32x32xf32>
    %cst_341 = arith.constant 0.000000e+00 : f32
    %659 = vector.broadcast %cst_341 : f32 to vector<32x32xf32>
    %660 = arith.cmpf ogt, %658, %659 : vector<32x32xf32>
    %cst_342 = arith.constant 2.000000e-01 : f32
    %661 = vector.broadcast %cst_342 : f32 to vector<32x32xf32>
    %662 = arith.mulf %661, %658 : vector<32x32xf32>
    %663 = arith.select %660, %658, %662 : vector<32x32xi1>, vector<32x32xf32>
    %cst_343 = arith.constant 0.000000e+00 : f32
    %664 = vector.broadcast %cst_343 : f32 to vector<32x32xf32>
    %665 = arith.cmpf ogt, %652, %664 : vector<32x32xf32>
    %cst_344 = arith.constant -1.000000e+30 : f32
    %666 = vector.broadcast %cst_344 : f32 to vector<32x32xf32>
    %667 = arith.select %665, %663, %666 : vector<32x32xi1>, vector<32x32xf32>
    %cst_345 = arith.constant dense<0xFF800000> : vector<32xf32>
    %668 = vector.multi_reduction <maximumf>, %667, %cst_345 [1] : vector<32x32xf32> to vector<32xf32>
    %669 = vector.shape_cast %668 : vector<32xf32> to vector<32x1xf32>
    %670 = vector.broadcast %669 : vector<32x1xf32> to vector<32x32xf32>
    %671 = arith.subf %667, %670 : vector<32x32xf32>
    %672 = math.exp %671 : vector<32x32xf32>
    %cst_346 = arith.constant dense<0.000000e+00> : vector<32xf32>
    %673 = vector.multi_reduction <add>, %672, %cst_346 [1] : vector<32x32xf32> to vector<32xf32>
    %674 = vector.shape_cast %673 : vector<32xf32> to vector<32x1xf32>
    %675 = vector.broadcast %674 : vector<32x1xf32> to vector<32x32xf32>
    %676 = arith.divf %672, %675 : vector<32x32xf32>
    %677 = arith.mulf %676, %652 : vector<32x32xf32>
    %678 = vector.extract_strided_slice %384 {offsets = [64, 128], sizes = [32, 32], strides = [1, 1]} : vector<96x160xbf16> to vector<32x32xbf16>
    %679 = arith.truncf %677 : vector<32x32xf32> to vector<32x32xbf16>
    %cst_347 = arith.constant dense<0.000000e+00> : vector<32x32xf32>
    %680 = tpu.matmul %679, %678, %cst_347 {dimension_numbers = #tpu.dot_dimension_numbers<[1], [0], [0], [1], [0, 0, 1, 1], [], []>} : vector<32x32xbf16>, vector<32x32xbf16>, vector<32x32xf32> -> vector<32x32xf32>
    %c1_348 = arith.constant 1 : index
    %c0_349 = arith.constant 0 : index
    %c4_350 = arith.constant 4 : index
    %c0_351 = arith.constant 0 : index
    %c0_352 = arith.constant 0 : index
    %681 = vector.load %arg4[%c1_348, %c0_349, %c4_350, %c0_351, %c0_352] : memref<2x1x5x1x32xf32, #tpu.memory_space<vmem>>, vector<1x1x1x1x32xf32>
    %682 = vector.shape_cast %681 : vector<1x1x1x1x32xf32> to vector<1x32xf32>
    %683 = vector.broadcast %682 : vector<1x32xf32> to vector<32x32xf32>
    %684 = arith.addf %680, %683 : vector<32x32xf32>
    %685 = arith.addf %649, %684 : vector<32x32xf32>
    %686 = arith.mulf %684, %684 : vector<32x32xf32>
    %687 = arith.addf %650, %686 : vector<32x32xf32>
    %688 = arith.mulf %685, %685 : vector<32x32xf32>
    %689 = arith.subf %688, %687 : vector<32x32xf32>
    %cst_353 = arith.constant 5.000000e-01 : f32
    %690 = vector.broadcast %cst_353 : f32 to vector<32x32xf32>
    %691 = arith.mulf %690, %689 : vector<32x32xf32>
    %692 = arith.truncf %691 : vector<32x32xf32> to vector<32x32xbf16>
    %c1_354 = arith.constant 1 : index
    %c2_355 = arith.constant 2 : index
    %c0_356 = arith.constant 0 : index
    %c0_357 = arith.constant 0 : index
    %693 = vector.load %arg6[%c1_354, %c2_355, %c0_356, %c0_357] : memref<2x3x32x32xbf16, #tpu.memory_space<vmem>>, vector<1x1x32x32xbf16>
    %694 = vector.shape_cast %693 : vector<1x1x32x32xbf16> to vector<32x32xbf16>
    %cst_358 = arith.constant dense<0.000000e+00> : vector<32x32xf32>
    %695 = tpu.matmul %692, %694, %cst_358 {dimension_numbers = #tpu.dot_dimension_numbers<[1], [0], [0], [1], [0, 0, 1, 1], [], []>} : vector<32x32xbf16>, vector<32x32xbf16>, vector<32x32xf32> -> vector<32x32xf32>
    %c1_359 = arith.constant 1 : index
    %c2_360 = arith.constant 2 : index
    %c0_361 = arith.constant 0 : index
    %c0_362 = arith.constant 0 : index
    %696 = vector.load %arg7[%c1_359, %c2_360, %c0_361, %c0_362] : memref<2x3x1x32xf32, #tpu.memory_space<vmem>>, vector<1x1x1x32xf32>
    %697 = vector.shape_cast %696 : vector<1x1x1x32xf32> to vector<1x32xf32>
    %698 = vector.broadcast %697 : vector<1x32xf32> to vector<32x32xf32>
    %699 = arith.addf %695, %698 : vector<32x32xf32>
    %cst_363 = arith.constant 0.000000e+00 : f32
    %700 = vector.broadcast %cst_363 : f32 to vector<32x32xf32>
    %701 = arith.cmpf ogt, %699, %700 : vector<32x32xf32>
    %cst_364 = arith.constant 0.00999999977 : f32
    %702 = vector.broadcast %cst_364 : f32 to vector<32x32xf32>
    %703 = arith.mulf %702, %699 : vector<32x32xf32>
    %704 = arith.select %701, %699, %703 : vector<32x32xi1>, vector<32x32xf32>
    %705 = arith.truncf %685 : vector<32x32xf32> to vector<32x32xbf16>
    %c1_365 = arith.constant 1 : index
    %c2_366 = arith.constant 2 : index
    %c0_367 = arith.constant 0 : index
    %c0_368 = arith.constant 0 : index
    %706 = vector.load %arg8[%c1_365, %c2_366, %c0_367, %c0_368] : memref<2x3x32x32xbf16, #tpu.memory_space<vmem>>, vector<1x1x32x32xbf16>
    %707 = vector.shape_cast %706 : vector<1x1x32x32xbf16> to vector<32x32xbf16>
    %cst_369 = arith.constant dense<0.000000e+00> : vector<32x32xf32>
    %708 = tpu.matmul %705, %707, %cst_369 {dimension_numbers = #tpu.dot_dimension_numbers<[1], [0], [0], [1], [0, 0, 1, 1], [], []>} : vector<32x32xbf16>, vector<32x32xbf16>, vector<32x32xf32> -> vector<32x32xf32>
    %c1_370 = arith.constant 1 : index
    %c2_371 = arith.constant 2 : index
    %c0_372 = arith.constant 0 : index
    %c0_373 = arith.constant 0 : index
    %709 = vector.load %arg9[%c1_370, %c2_371, %c0_372, %c0_373] : memref<2x3x1x32xf32, #tpu.memory_space<vmem>>, vector<1x1x1x32xf32>
    %710 = vector.shape_cast %709 : vector<1x1x1x32xf32> to vector<1x32xf32>
    %711 = vector.broadcast %710 : vector<1x32xf32> to vector<32x32xf32>
    %712 = arith.addf %708, %711 : vector<32x32xf32>
    %cst_374 = arith.constant 0.000000e+00 : f32
    %713 = vector.broadcast %cst_374 : f32 to vector<32x32xf32>
    %714 = arith.cmpf ogt, %712, %713 : vector<32x32xf32>
    %cst_375 = arith.constant 0.00999999977 : f32
    %715 = vector.broadcast %cst_375 : f32 to vector<32x32xf32>
    %716 = arith.mulf %715, %712 : vector<32x32xf32>
    %717 = arith.select %714, %712, %716 : vector<32x32xi1>, vector<32x32xf32>
    %718 = arith.addf %704, %717 : vector<32x32xf32>
    %c5 = arith.constant 5 : index
    %719 = memref.load %arg1[%c5] : memref<6xf32, #tpu.memory_space<smem>>
    %720 = vector.extract_strided_slice %377 {offsets = [64, 0], sizes = [32, 32], strides = [1, 1]} : vector<96x32xf32> to vector<32x32xf32>
    %721 = vector.broadcast %719 : f32 to vector<32x32xf32>
    %722 = arith.mulf %720, %721 : vector<32x32xf32>
    %723 = arith.addf %718, %722 : vector<32x32xf32>
    %cst_376 = arith.constant dense<0.000000e+00> : vector<32xf32>
    %724 = vector.multi_reduction <add>, %723, %cst_376 [1] : vector<32x32xf32> to vector<32xf32>
    %725 = vector.shape_cast %724 : vector<32xf32> to vector<32x1xf32>
    %cst_377 = arith.constant 3.200000e+01 : f32
    %726 = vector.broadcast %cst_377 : f32 to vector<32x1xf32>
    %727 = arith.divf %725, %726 : vector<32x1xf32>
    %728 = vector.broadcast %727 : vector<32x1xf32> to vector<32x32xf32>
    %729 = arith.subf %723, %728 : vector<32x32xf32>
    %730 = arith.mulf %729, %729 : vector<32x32xf32>
    %cst_378 = arith.constant dense<0.000000e+00> : vector<32xf32>
    %731 = vector.multi_reduction <add>, %730, %cst_378 [1] : vector<32x32xf32> to vector<32xf32>
    %732 = vector.shape_cast %731 : vector<32xf32> to vector<32x1xf32>
    %cst_379 = arith.constant 3.200000e+01 : f32
    %733 = vector.broadcast %cst_379 : f32 to vector<32x1xf32>
    %734 = arith.divf %732, %733 : vector<32x1xf32>
    %735 = vector.broadcast %727 : vector<32x1xf32> to vector<32x32xf32>
    %736 = arith.subf %723, %735 : vector<32x32xf32>
    %cst_380 = arith.constant 9.99999974E-6 : f32
    %737 = vector.broadcast %cst_380 : f32 to vector<32x1xf32>
    %738 = arith.addf %734, %737 : vector<32x1xf32>
    %739 = math.rsqrt %738 : vector<32x1xf32>
    %740 = vector.broadcast %739 : vector<32x1xf32> to vector<32x32xf32>
    %741 = arith.mulf %736, %740 : vector<32x32xf32>
    %c1_381 = arith.constant 1 : index
    %c2_382 = arith.constant 2 : index
    %c0_383 = arith.constant 0 : index
    %c0_384 = arith.constant 0 : index
    %742 = vector.load %arg10[%c1_381, %c2_382, %c0_383, %c0_384] : memref<2x3x1x32xf32, #tpu.memory_space<vmem>>, vector<1x1x1x32xf32>
    %743 = vector.shape_cast %742 : vector<1x1x1x32xf32> to vector<1x32xf32>
    %744 = vector.broadcast %743 : vector<1x32xf32> to vector<32x32xf32>
    %745 = arith.mulf %741, %744 : vector<32x32xf32>
    %c1_385 = arith.constant 1 : index
    %c2_386 = arith.constant 2 : index
    %c0_387 = arith.constant 0 : index
    %c0_388 = arith.constant 0 : index
    %746 = vector.load %arg11[%c1_385, %c2_386, %c0_387, %c0_388] : memref<2x3x1x32xf32, #tpu.memory_space<vmem>>, vector<1x1x1x32xf32>
    %747 = vector.shape_cast %746 : vector<1x1x1x32xf32> to vector<1x32xf32>
    %748 = vector.broadcast %747 : vector<1x32xf32> to vector<32x32xf32>
    %749 = arith.addf %745, %748 : vector<32x32xf32>
    %750 = tpu.concatenate %481, %615, %749 in 0 : vector<32x32xf32>, vector<32x32xf32>, vector<32x32xf32> -> vector<96x32xf32>
    %c0_389 = arith.constant 0 : index
    %c0_390 = arith.constant 0 : index
    %751 = vector.load %arg12[%c0_389, %c0_390] : memref<96x32xf32, #tpu.memory_space<vmem>>, vector<96x32xf32>
    %752 = arith.addf %751, %750 : vector<96x32xf32>
    %c0_391 = arith.constant 0 : index
    %c0_392 = arith.constant 0 : index
    %753 = vector.load %arg12[%c0_391, %c0_392] : memref<96x32xf32, #tpu.memory_space<vmem>>, vector<96x32xf32>
    tpu.vector_store %arg12[%c0_391, %c0_392], %752 {strides = array<i32>} : memref<96x32xf32, #tpu.memory_space<vmem>>, vector<96x32xf32>,
    return
  }
  func.func @transform_0(%arg0: i32, %arg1: memref<6xf32, #tpu.memory_space<smem>>) -> (i32, i32, i32) {
    %c0_i32 = arith.constant 0 : i32
    %c0_i32_0 = arith.constant 0 : i32
    %c0_i32_1 = arith.constant 0 : i32
    return %arg0, %c0_i32, %c0_i32_0 : i32, i32, i32
  }
  func.func @transform_1(%arg0: i32, %arg1: memref<6xf32, #tpu.memory_space<smem>>) -> (i32, i32, i32, i32) {
    %c0_i32 = arith.constant 0 : i32
    %c0_i32_0 = arith.constant 0 : i32
    %c0_i32_1 = arith.constant 0 : i32
    %c0_i32_2 = arith.constant 0 : i32
    return %c0_i32, %arg0, %c0_i32_0, %c0_i32_1 : i32, i32, i32, i32
  }
  func.func @transform_2(%arg0: i32, %arg1: memref<6xf32, #tpu.memory_space<smem>>) -> (i32, i32, i32, i32, i32) {
    %c0_i32 = arith.constant 0 : i32
    %c0_i32_0 = arith.constant 0 : i32
    %c0_i32_1 = arith.constant 0 : i32
    %c0_i32_2 = arith.constant 0 : i32
    %c0_i32_3 = arith.constant 0 : i32
    return %c0_i32, %arg0, %c0_i32_0, %c0_i32_1, %c0_i32_2 : i32, i32, i32, i32, i32
  }
  func.func @transform_3(%arg0: i32, %arg1: memref<6xf32, #tpu.memory_space<smem>>) -> (i32, i32, i32, i32) {
    %c0_i32 = arith.constant 0 : i32
    %c0_i32_0 = arith.constant 0 : i32
    %c0_i32_1 = arith.constant 0 : i32
    %c0_i32_2 = arith.constant 0 : i32
    return %arg0, %c0_i32, %c0_i32_0, %c0_i32_1 : i32, i32, i32, i32
  }
  func.func @transform_4(%arg0: i32, %arg1: memref<6xf32, #tpu.memory_space<smem>>) -> (i32, i32, i32, i32) {
    %c0_i32 = arith.constant 0 : i32
    %c0_i32_0 = arith.constant 0 : i32
    %c0_i32_1 = arith.constant 0 : i32
    %c0_i32_2 = arith.constant 0 : i32
    %c0_i32_3 = arith.constant 0 : i32
    return %c0_i32, %c0_i32_0, %c0_i32_1, %c0_i32_2 : i32, i32, i32, i32
  }
  func.func @transform_5(%arg0: i32, %arg1: memref<6xf32, #tpu.memory_space<smem>>) -> (i32, i32, i32, i32) {
    %c0_i32 = arith.constant 0 : i32
    %c0_i32_0 = arith.constant 0 : i32
    %c0_i32_1 = arith.constant 0 : i32
    %c0_i32_2 = arith.constant 0 : i32
    %c0_i32_3 = arith.constant 0 : i32
    return %c0_i32, %c0_i32_0, %c0_i32_1, %c0_i32_2 : i32, i32, i32, i32
  }
  func.func @transform_6(%arg0: i32, %arg1: memref<6xf32, #tpu.memory_space<smem>>) -> (i32, i32, i32, i32) {
    %c0_i32 = arith.constant 0 : i32
    %c0_i32_0 = arith.constant 0 : i32
    %c0_i32_1 = arith.constant 0 : i32
    %c0_i32_2 = arith.constant 0 : i32
    %c0_i32_3 = arith.constant 0 : i32
    return %c0_i32, %c0_i32_0, %c0_i32_1, %c0_i32_2 : i32, i32, i32, i32
  }
  func.func @transform_7(%arg0: i32, %arg1: memref<6xf32, #tpu.memory_space<smem>>) -> (i32, i32, i32, i32) {
    %c0_i32 = arith.constant 0 : i32
    %c0_i32_0 = arith.constant 0 : i32
    %c0_i32_1 = arith.constant 0 : i32
    %c0_i32_2 = arith.constant 0 : i32
    %c0_i32_3 = arith.constant 0 : i32
    return %c0_i32, %c0_i32_0, %c0_i32_1, %c0_i32_2 : i32, i32, i32, i32
  }
  func.func @transform_8(%arg0: i32, %arg1: memref<6xf32, #tpu.memory_space<smem>>) -> (i32, i32, i32, i32) {
    %c0_i32 = arith.constant 0 : i32
    %c0_i32_0 = arith.constant 0 : i32
    %c0_i32_1 = arith.constant 0 : i32
    %c0_i32_2 = arith.constant 0 : i32
    %c0_i32_3 = arith.constant 0 : i32
    return %c0_i32, %c0_i32_0, %c0_i32_1, %c0_i32_2 : i32, i32, i32, i32
  }
  func.func @transform_9(%arg0: i32, %arg1: memref<6xf32, #tpu.memory_space<smem>>) -> (i32, i32, i32, i32) {
    %c0_i32 = arith.constant 0 : i32
    %c0_i32_0 = arith.constant 0 : i32
    %c0_i32_1 = arith.constant 0 : i32
    %c0_i32_2 = arith.constant 0 : i32
    %c0_i32_3 = arith.constant 0 : i32
    return %c0_i32, %c0_i32_0, %c0_i32_1, %c0_i32_2 : i32, i32, i32, i32
  }
  func.func @transform_10(%arg0: i32, %arg1: memref<6xf32, #tpu.memory_space<smem>>) -> (i32, i32) {
    %c0_i32 = arith.constant 0 : i32
    %c0_i32_0 = arith.constant 0 : i32
    %c0_i32_1 = arith.constant 0 : i32
    return %c0_i32, %c0_i32_0 : i32, i32
  }
}

</mosaic_0001>

<bundles_post_ra>
// kernel: htgnn_forward.1
= control target key start
LH: loop header
LB: loop body
LE: loop exit
PB: predicated region body
PF: predicated region fallthrough
CT: control target
= control target key end

     0   :  { %s7708_s0 = inlined_call_operand.hbm [shape: f32[6], index: 0, kind: input, shape index: {}]   ;;  %s7709_s1 = inlined_call_operand.vmem [shape: f32[3,96,32], index: 1, kind: input, shape index: {}]   ;;  %s7710_s2 = inlined_call_operand.vmem [shape: bf16[2,3,32,170], index: 2, kind: input, shape index: {}]   ;;  %s7711_s3 = inlined_call_operand.hbm [shape: f32[2,3,5,1,32], index: 3, kind: input, shape index: {}]   ;;  %s7712_s4 = inlined_call_operand.hbm [shape: f32[3,5,32,32], index: 4, kind: input, shape index: {}]   ;;  %s7713_s5 = inlined_call_operand.vmem [shape: bf16[2,3,32,32], index: 5, kind: input, shape index: {}]   ;;  %s7714_s6 = inlined_call_operand.vmem [shape: f32[2,3,1,32], index: 6, kind: input, shape index: {}]   ;;  %s7715_s7 = inlined_call_operand.vmem [shape: bf16[2,3,32,32], index: 7, kind: input, shape index: {}]   ;;  %s7716_s8 = inlined_call_operand.vmem [shape: f32[2,3,1,32], index: 8, kind: input, shape index: {}]   ;;  %s7717_s9 = inlined_call_operand.vmem [shape: f32[2,3,1,32], index: 9, kind: input, shape index: {}]   ;;  %s7718_s10 = inlined_call_operand.hbm [shape: f32[2,3,1,32], index: 10, kind: input, shape index: {}]   ;;  %s7719_s11 = inlined_call_operand.vmem [shape: f32[96,32], index: 11, kind: output, shape index: {}]  }
   0x1   :  { %7763 = sst [smem:[#allocation33_spill]] %s7710_s2  ;;  %s5784_s19 = scalar_lea.hbm %s7708_s0, 16 }
   0x2   :  { %7764 = sst [smem:[#allocation34_spill]] %s7711_s3  ;;  %p5785_p0 = scmp.ne.s32.totalorder %s7708_s0, %s5784_s19 }
   0x3   :  { %7765 = sst [smem:[#allocation35_spill]] %s7718_s10  ;;  %p5788_p1 = scmp.lt.u32.totalorder %s5784_s19, %s7708_s0 }
   0x5   :  { %p5790_p2 = pnand %p5788_p1, %p5785_p0 }
   0x7   :  { %5793 = shalt.err (!%p5790_p2)  }
   0x8   :  { %s5896_s24 = smov [#allocation3]  }
   0x9   :  { %17 = dma.hbm_to_smem %s7708_s0, 16, %s5896_s24, [#allocation2] }
   0xa   :  { %5866 = dma.done.wait [#allocation2], 16 }
   0xb   :  { %5867 = vsyncadd [#allocation2], 4294967280 }
   0xc   :  { %19 = sfence }
   0xd   :  { %20 = vsyncpa [#allocation6], 0 }
   0xe   :  { %22 = vsyncpa [#allocation6 + $0x1], 0 }
   0xf   :  { %23 = vsyncpa [#allocation8], 0 }
  0x10   :  { %25 = vsyncpa [#allocation8 + $0x1], 0  ;;  %s5995_s27 = smov 0   ;;  %s5997_s28 = smov 0  }
  0x11   :  { %s5999_s29 = smov 0   ;;  %s6001_s30 = smov 0  }
  0x12 LB: > { %s6014_s0 = sadd.s32 4294967295, %s5894_s30   ;;  %s6017_s12 = sadd.s32 1, %s5894_s30   ;;  %s5894_s30 = sphi %s6001_s30, %s7841_s30   ;;  %s5890_s29 = sphi %s5999_s29, %s7840_s29   ;;  %s5886_s28 = sphi %s5997_s28, %s7839_s28   ;;  %s5882_s27 = sphi %s5995_s27, %s7838_s27  }
  0x13   : > { %s61_s13 = ssub.s32 %s5894_s30, %s6017_s12  ;;  %s64_s14 = sadd.s32 1, %s5890_s29 }
  0x14   : > { %p62_p3 = scmp.eq.s32.totalorder %s61_s13, 0  ;;  %p71_p4 = scmp.ne.s32.totalorder %s5890_s29, %s5886_s28 }
  0x15   : > { %p72_p5 = scmp.eq.s32.totalorder %s5894_s30, 0  ;;  %p103_p6 = scmp.ne.s32.totalorder %s5886_s28, %s5882_s27 }
  0x16   : > { %s6027_s15 = scalar_select %p62_p3, %s5890_s29, %s64_s14  }
  0x17   : > { %p6029_p7 = por %p72_p5, %p71_p4  ;;  %p7720_p8 = scmp.eq.s32.totalorder %s6014_s0, 0 }
  0x18   : > { %7766 = sst [smem:[#allocation17_spill]] %s6027_s15  ;;  %p4904_p9 = scmp.ge.s32.totalorder %s5894_s30, 1 }
  0x19   : > { %s7767_s16 = scalar_select %p6029_p7, 1, 0 }
  0x1a   : > { %p287_p10 = scmp.lt.s32.totalorder %s5894_s30, 4  ;;  %p6038_p11 = por %p7720_p8, %p103_p6 }
  0x1b   : > { %s5897_s19 = smov [#allocation9]   ;;  %s7771_s10 = sld [smem:[#allocation35_spill]] }
  0x1c   : > { %s7768_s17 = scalar_select %p6038_p11, 1, 0 }
  0x1d   : > { %p6043_p13 = pnand %p4904_p9, %p287_p10  ;;  %s314_s20 = sshll.u32 %s5897_s19, 4  ;;  %s315_s20 = int_to_ptr.vmem [resolvable:$true] %s314_s20 }
  0x1f   : > { %s7769_s18 = scalar_select %p6043_p13, 1, 0 }
  0x20   : > { %p5419_p0 = pneg %p6043_p13 }
  0x21   : > { %s5794_s24 = scalar_lea.hbm %s7771_s10, 96 }
  0x22   : > { %p6051_p1 = pnand %p5419_p0, %p7720_p8  ;;  %p5795_p2 = scmp.ne.s32.totalorder %s7771_s10, %s5794_s24 }
  0x23   : > { %p5801_p6 = scmp.lt.u32.totalorder %s5794_s24, %s7771_s10 }
  0x24   : > { %p5796_p3 = pneg %p6051_p1 }
  0x26   : > { %p5797_p4 = pnand %p5796_p3, %p5795_p2 }
  0x28   : > { %p5798_p5 = pneg %p5797_p4 }
  0x2a   : > { %p5803_p9 = pnand %p5801_p6, %p5798_p5 }
  0x2c   : > { %5806 = shalt.err (!%p5803_p9)
}
  0x2d   : > { %s5807_s14 = scalar_lea.vmem %s315_s20, 96  ;;  %p5815_p8 = scmp.lt.s32.totalorder %s315_s20, %s315_s20 }
  0x2e   : > { %p5808_p10 = scmp.ne.s32.totalorder %s315_s20, %s5807_s14  ;;  %p5816_p11 = scmp.lt.s32.totalorder %s5807_s14, %s5807_s14 }
  0x30   : > { %p5810_p0 = pnand %p5808_p10, %p5796_p3  ;;  %p5817_p13 = por %p5816_p11, %p5815_p8 }
  0x32   : > { %p5811_p12 = pneg %p5810_p0 }
  0x34   : > { %p5818_p7 = pnand %p5817_p13, %p5811_p12 }
  0x36   : > { %5821 = shalt.err (!%p5818_p7)
}
  0x37   : > { %s5898_s19 = smov 16   ;;  %s5899_s22 = smov 1  }
  0x38   : > { %5422 = dma.hbm_to_vmem [thread:$0]  (!%p6051_p1), %s7771_s10, 96, %s315_s20, [#allocation8], %s5898_s19, %s5898_s19, %s5899_s22  }
  0x39   : > { %p4906_p2 = scmp.ge.s32.totalorder %s5894_s30, 3 }
  0x3a   : > { %p7772_p4 = scmp.ne.s32.totalorder (!%p4906_p2), %s7767_s16, 0 }
  0x3b   : > { %324 = sbr.rel (%p4906_p2) target bundleno = 120 (0x78), region = 40 }
  0x42   : > { %335 = sbr.rel (!%p7772_p4) target bundleno = 80 (0x50), region = 48  ;;  %s337_s24 = sand.u32 (%p7772_p4), 1, %s5890_s29  }
  0x43   : > { %s5132_s26 = sshll.u32 (%p7772_p4), %s5894_s30, 5  ;;  %s4907_s27 = sshll.u32 (%p7772_p4), %s337_s24, 6 }
  0x44   : > { %s7773_s2 = sld [smem:[#allocation33_spill]] (%p7772_p4)  ;;  %s339_s21 = scalar_lea.vmem (%p7772_p4), [#allocation4], %s4907_s27 }
  0x4a   : > { %s342_s15 = scalar_lea.vmem %s7773_s2, %s5132_s26 }
  0x4b   : > { %v384_v0 = vld [vmem:[%s342_s15] sm:$0xff]  ;;  %v386_v1 = vld [vmem:[%s342_s15 + $0x8] sm:$0xff]  ;;  %v388_v2 = vld [vmem:[%s342_s15 + $0x10] sm:$0xff] }
  0x4c   : > { %385 = vst [vmem:[%s339_s21] sm:$0xff] %v384_v0  ;;  %387 = vst [vmem:[%s339_s21 + $0x8] sm:$0xff] %v386_v1  ;;  %v390_v3 = vld [vmem:[%s342_s15 + $0x18] sm:$0xff]  ;;  %v392_v4 = vld [vmem:[%s342_s15 + $0x60] sm:$0xff] }
  0x4d   : > { %389 = vst [vmem:[%s339_s21 + $0x10] sm:$0xff] %v388_v2  ;;  %v394_v5 = vld [vmem:[%s342_s15 + $0x68] sm:$0xff]  ;;  %391 = vst [vmem:[%s339_s21 + $0x18] sm:$0xff] %v390_v3  ;;  %v396_v6 = vld [vmem:[%s342_s15 + $0x70] sm:$0xff] }
  0x4e   : > { %393 = vst [vmem:[%s339_s21 + $0x20] sm:$0xff] %v392_v4  ;;  %395 = vst [vmem:[%s339_s21 + $0x28] sm:$0xff] %v394_v5  ;;  %v398_v7 = vld [vmem:[%s342_s15 + $0x78] sm:$0xff] }
  0x4f   : > { %397 = vst [vmem:[%s339_s21 + $0x30] sm:$0xff] %v396_v6  ;;  %399 = vst [vmem:[%s339_s21 + $0x38] sm:$0xff] %v398_v7 }
  0x50 PF: > { %s6080_s20 = sand.u32 1, %s5890_s29   ;;  %s5398_s19 = smul.u32 80, %s5894_s30 }
  0x51   : > { %s5397_s22 = smul.u32 10, %s6080_s20  ;;  %s5900_s23 = smov 240  }
  0x52   : > { %p7774_p7 = scmp.ne.s32.totalorder %s7767_s16, 0  ;;  %s7775_s3 = sld [smem:[#allocation34_spill]] }
  0x53   : > { %s410_s13 = scalar_lea.vmem [#allocation5], %s5397_s22  ;;  %s5901_s21 = smov 80  }
  0x54   : > { %5407 = sst [smem:[#allocation11]] (%p7774_p7), %s5900_s23  ;;  %s429_s14 = sshll.u32 %s410_s13, 4  ;;  %s430_s14 = int_to_ptr.vmem [resolvable:$true] %s429_s14 }
  0x55   : > { %s5406_s15 = scalar_select %p7774_p7, [#allocation0], [#allocation12] }
  0x56   : > { %5408 = sst [smem:[#allocation11 + $0x1]] (%p7774_p7), %s5901_s21  ;;  %s5902_s2 = smov 5  }
  0x57   : > { %s421_s27 = sld [smem:[%s5406_s15]]   ;;  %s5903_s10 = smov 16  }
  0x58   : > { %s416_s26 = scalar_lea.hbm %s7775_s3, %s5398_s19  ;;  %5409 = sst [smem:[#allocation11 + $0x2]] (%p7774_p7), %s5902_s2 }
  0x59   : > { %5410 = sst [smem:[#allocation11 + $0x3]] (%p7774_p7), %s5903_s10  ;;  %s5904_s23 = smov 1  }
  0x5a   : > { %5411 = sst [smem:[#allocation11 + $0x4]] (%p7774_p7), %s5903_s10  ;;  %s407_s22 = scalar_lea.sflag [#allocation6], %s6080_s20 }
  0x5b   : > { %5412 = sst [smem:[#allocation11 + $0x5]] (%p7774_p7), %s5904_s23  ;;  %s5905_s25 = smov [#allocation10]  }
  0x5c   : > { %s452_s2 = sand.u32 1, %s5894_s30   ;;  %s5399_s24 = smul.u32 160, %s6080_s20 }
  0x5d   : > { %s4911_s19 = sshll.u32 %s421_s27, 26  ;;  %s5400_s13 = smul.u32 2560, %s5894_s30 }
  0x5e   : > { %s4912_s15 = sadd.s32 134217728, %s4911_s19  ;;  %s456_s27 = scalar_lea.vmem [#allocation7], %s5399_s24 }
  0x5f   : > { %5413 = dma.general (%p7774_p7), %s416_s26, 160, %s430_s14, %s407_s22, %s5905_s25, [#allocation11], %s4912_s15, 0  }
  0x60   : > { %s6110_s10 = scalar_lea.hbm %s7712_s4, %s5400_s13  ;;  %s463_s23 = sshll.u32 %s456_s27, 4  ;;  %s6112_s23 = int_to_ptr.vmem [resolvable:$true] %s463_s23 }
  0x61   : > { %s6114_s26 = scalar_lea.sflag [#allocation8], %s452_s2  ;;  %s5822_s14 = scalar_lea.hbm %s6110_s10, 2560 }
  0x62   : > { %p5823_p8 = scmp.ne.s32.totalorder %s6110_s10, %s5822_s14  ;;  %s5826_s3 = scalar_lea.hbm %s7712_s4, 7680 }
  0x63   : > { %p5827_p13 = scmp.lt.u32.totalorder %s6110_s10, %s7712_s4  ;;  %p5828_p1 = scmp.lt.u32.totalorder %s5826_s3, %s5822_s14 }
  0x64   : > { %p5824_p11 = pnand %p5823_p8, %p7774_p7  ;;  %p5830_p5 = scmp.lt.u32.totalorder %s5822_s14, %s6110_s10 }
  0x65   : > { %p5829_p3 = por %p5828_p1, %p5827_p13 }
  0x66   : > { %p5825_p12 = pneg %p5824_p11 }
  0x67   : > { %p5831_p6 = por %p5830_p5, %p5829_p3 }
  0x69   : > { %p5832_p9 = pnand %p5831_p6, %p5825_p12 }
  0x6b   : > { %5835 = shalt.err (!%p5832_p9)
}
  0x6c   : > { %s5836_s22 = scalar_lea.vmem %s6112_s23, 2560  ;;  %s5906_s25 = smov [#allocation7]  }
  0x6d   : > { %p5837_p10 = scmp.ne.s32.totalorder %s6112_s23, %s5836_s22  ;;  %s5840_s2 = sshll.u32 %s5906_s25, 4  ;;  %s5841_s2 = int_to_ptr.vmem [resolvable:$false] %s5840_s2 }
  0x6e   : > { %s5842_s24 = scalar_lea.vmem %s5841_s2, 5120  ;;  %p5843_p4 = scmp.lt.s32.totalorder %s6112_s23, %s5841_s2 }
  0x6f   : > { %p5838_p0 = pnand %p5837_p10, %p7774_p7  ;;  %p5844_p8 = scmp.lt.s32.totalorder %s5842_s24, %s5836_s22 }
  0x71   : > { %p5839_p2 = pneg %p5838_p0  ;;  %p5845_p11 = por %p5844_p8, %p5843_p4 }
  0x73   : > { %p5846_p13 = pnand %p5845_p11, %p5839_p2 }
  0x75   : > { %5849 = shalt.err (!%p5846_p13)
}
  0x76   : > { %s5907_s13 = smov 128   ;;  %s5908_s21 = smov 8  }
  0x77   : > { %5414 = dma.hbm_to_vmem [thread:$0]  (%p7774_p7), %s6110_s10, 2560, %s6112_s23, %s6114_s26, %s5907_s13, %s5907_s13, %s5908_s21  }
  0x78 PF: > { %p7776_p12 = scmp.ne.s32.totalorder %s7769_s18, 0 }
  0x7a   : > { %475 = sbr.rel (%p7776_p12) target bundleno = 4883 (0x1313), region = 94 }
  0x81   : > { %s478_s27 = sand.u32 1, %s5886_s28   ;;  %p7777_p1 = scmp.ne.s32.totalorder %s7768_s17, 0 }
  0x82   : > { %s4915_s14 = sshll.u32 %s478_s27, 6  ;;  %s5401_s30 = smul.u32 10, %s478_s27 }
  0x83   : > { %s6141_s20 = scalar_lea.vmem [#allocation4], %s4915_s14  ;;  %s485_s3 = scalar_lea.sflag [#allocation6], %s478_s27 }
  0x84   : > { %s6143_s19 = scalar_lea.vmem [#allocation5], %s5401_s30 }
  0x85   : > { %5869 = dma.done.wait (%p7777_p1), %s485_s3, 160  }
  0x86   : > { %5871 = vsyncadd (%p7777_p1), %s485_s3, 4294967136  ;;  %s493_s16 = sand.u32 1, %s6014_s0   ;;  %s5402_s18 = smul.u32 160, %s478_s27 }
  0x87   : > { %s494_s10 = scalar_lea.sflag [#allocation8], %s493_s16 }
  0x88   : > { %s6150_s23 = scalar_lea.vmem [#allocation7], %s5402_s18 }
  0x89   : > { %5873 = dma.done.wait (%p7777_p1), %s494_s10, 2560  }
  0x8a   : > { %5875 = vsyncadd (%p7777_p1), %s494_s10, 4294964736  ;;  %p7778_p7 = scmp.eq.s32.totalorder %s6014_s0, 0 }
  0x8c   : > { %5877 = dma.done.wait (%p7778_p7), [#allocation8], 96   ;;  %p7779_p3 = pmov %p7778_p7 }
  0x8d   : > { %p547_p5 = scmp.lt.s32.totalorder %s6014_s0, 2  ;;  %p7780_p6 = scmp.ne.s32.totalorder %s6014_s0, 0 }
  0x8e   : > { %5879 = vsyncadd (%p7779_p3), [#allocation8], 4294967200  ;;  %vm557_vm0 = vcmask (!%p7780_p6), 261120   ;;  %v5909_v8 = vmov (!%p7780_p6), 0.0  }
  0x8f   : > { %s548_s26 = scalar_select %p547_p5, %s6014_s0, 2 }
  0x90   : > { %556 = sbr.rel (%p7780_p6) target bundleno = 151 (0x97), region = 114  ;;  %558 = vst.msk [vmem:[%s7719_s11] sm:$0xff] (!%p7780_p6), %vm557_vm0, %v5909_v8  ;;  %559 = vst.msk [vmem:[%s7719_s11 + $0x8] sm:$0xff] (!%p7780_p6), %vm557_vm0, %v5909_v8 }
  0x91   : > { %s5403_s15 = smul.u32 96, %s548_s26  ;;  %560 = vst.msk [vmem:[%s7719_s11 + $0x10] sm:$0xff] (!%p7780_p6), %vm557_vm0, %v5909_v8  ;;  %561 = vst.msk [vmem:[%s7719_s11 + $0x18] sm:$0xff] (!%p7780_p6), %vm557_vm0, %v5909_v8 }
  0x92   : > { %562 = vst.msk [vmem:[%s7719_s11 + $0x20] sm:$0xff] (!%p7780_p6), %vm557_vm0, %v5909_v8  ;;  %563 = vst.msk [vmem:[%s7719_s11 + $0x28] sm:$0xff] (!%p7780_p6), %vm557_vm0, %v5909_v8 }
  0x93   : > { %s6165_s2 = scalar_lea.vmem %s7709_s1, %s5403_s15  ;;  %564 = vst.msk [vmem:[%s7719_s11 + $0x30] sm:$0xff] (!%p7780_p6), %vm557_vm0, %v5909_v8  ;;  %565 = vst.msk [vmem:[%s7719_s11 + $0x38] sm:$0xff] (!%p7780_p6), %vm557_vm0, %v5909_v8 }
  0x94   : > { %566 = vst.msk [vmem:[%s7719_s11 + $0x40] sm:$0xff] (!%p7780_p6), %vm557_vm0, %v5909_v8  ;;  %567 = vst.msk [vmem:[%s7719_s11 + $0x48] sm:$0xff] (!%p7780_p6), %vm557_vm0, %v5909_v8 }
  0x95   : > { %568 = vst.msk [vmem:[%s7719_s11 + $0x50] sm:$0xff] (!%p7780_p6), %vm557_vm0, %v5909_v8  ;;  %569 = vst.msk [vmem:[%s7719_s11 + $0x58] sm:$0xff] (!%p7780_p6), %vm557_vm0, %v5909_v8 }
  0x97 PF: > { %v5508_v9 = vld [vmem:[%s6141_s20 + $0x4] ss:$8 sps:$4 sm:$0xff]   ;;  %v5510_v10 = vld [vmem:[%s6141_s20] ss:$8 sps:$4 sm:$0xff]   ;;  %v7729_v11 = vmov 0   ;;  %vm612_vm1 = vcmask 261120   ;;  %v804_v57 = vlaneseq }
  0x98   : > { %663 = vmatprep.mubr.bf16.mxu0 %v7729_v11  ;;  %631 = vmatprep.subr.bf16.mxu0 %v5508_v9  ;;  %v5511_v12 = vld [vmem:[%s6141_s20 + $0x14] ss:$8 sps:$4 sm:$0xff]   ;;  %v5513_v13 = vld [vmem:[%s6141_s20 + $0x10] ss:$8 sps:$4 sm:$0xff]   ;;  %v570_v14 = vld [vmem:[%s6165_s2] sm:$0xff]  ;;  %v7731_v26 = vmov 37  }
  0x99   : > { %632 = vmatpush1.bf16.msra.mxu0 %v5510_v10  ;;  %v571_v15 = vld [vmem:[%s6165_s2 + $0x8] sm:$0xff]  ;;  %v572_v17 = vld [vmem:[%s6165_s2 + $0x10] sm:$0xff]  ;;  %v573_v18 = vld [vmem:[%s6165_s2 + $0x18] sm:$0xff]  ;;  %5484 = vset.pattern.permute.xlu0 %v7731_v26  ;;  %s5912_s0 = smov 96   ;;  %v805_v59 = vshrl.u32 %v804_v57, 7  ;;  %s5913_s16 = smov 95  }
  0x9a   : > { %633 = vmatprep.subr.bf16.mxu0 %v5511_v12  ;;  %v582_v16 = vpack.c.bf16 %v571_v15, %v570_v14  ;;  %v583_v19 = vpack.c.bf16 %v573_v18, %v572_v17  ;;  %v574_v20 = vld [vmem:[%s6165_s2 + $0x20] sm:$0xff]  ;;  %v575_v21 = vld [vmem:[%s6165_s2 + $0x28] sm:$0xff]  ;;  %v576_v23 = vld [vmem:[%s6165_s2 + $0x30] sm:$0xff]  ;;  %5485 = vset.pattern.permute.xlu1 %v7731_v26  ;;  %s5915_s22 = smov 93   ;;  %s5918_s3 = smov 32  }
  0x9b   : > { %v584_v22 = vpack.c.bf16 %v575_v21, %v574_v20  ;;  %v577_v24 = vld [vmem:[%s6165_s2 + $0x38] sm:$0xff]  ;;  %v578_v47 = vld [vmem:[%s6165_s2 + $0x40] sm:$0xff]  ;;  %v579_v48 = vld [vmem:[%s6165_s2 + $0x48] sm:$0xff]  ;;  %v6283_v61 = vsub.s32 0, %v805_v59  ;;  %s5919_s18 = smov 94   ;;  %s5920_s10 = smov 92  }
  0x9c   : > { %v585_v25 = vpack.c.bf16 %v577_v24, %v576_v23  ;;  %v586_v49 = vpack.c.bf16 %v579_v48, %v578_v47  ;;  %v580_v50 = vld [vmem:[%s6165_s2 + $0x50] sm:$0xff]  ;;  %v581_v51 = vld [vmem:[%s6165_s2 + $0x58] sm:$0xff]  ;;  %v6297_v15 = vld [vmem:[%s6150_s23 + $0x10] sm:$0xff]  ;;  %s5922_s14 = smov 64   ;;  %s1144_s30 = sld [smem:[#allocation3]] }
  0x9d   : > { %634 = vmatpush1.bf16.msra.mxu0 %v5513_v13  ;;  %v587_v52 = vpack.c.bf16 %v581_v51, %v580_v50  ;;  %v6287_v1 = vld [vmem:[%s6150_s23] sm:$0xff]  ;;  %v6290_v3 = vld [vmem:[%s6150_s23 + $0x8] sm:$0xff]  ;;  %7781 = vst [vmem:[#allocation18_spill] sm:$0xff] %v6297_v15  ;;  %vm826_vm7 = vcmp.gt.f32.partialorder %v6297_v15, 0.0  ;;  %v6304_v20 = vld [vmem:[%s6150_s23 + $0x18] sm:$0xff]  ;;  %s4980_s26 = sld [smem:[#allocation3 + $0x1]] }
  0x9e   : > { %vm824_vm2 = vcmp.gt.f32.partialorder %v6287_v1, 0.0  ;;  %vm825_vm5 = vcmp.gt.f32.partialorder %v6290_v3, 0.0  ;;  %vm827_vm9 = vcmp.gt.f32.partialorder %v6304_v20, 0.0  ;;  %s5020_s27 = sld [smem:[#allocation3 + $0x2]] }
  0xa0   : > { %4923 = vmatmul.mubr.msk.bf16.vlgmr.msra.gmra.mrb[0].mxu0 %vm612_vm1, %v582_v16 }
  0xa1   : > { %673 = vmatprep.mubr.bf16.mxu0 %v7729_v11 }
  0xa8   : > { %4924 = vmatmul.mubr.msk.bf16.gmra.mrb[4].mxu0 %vm612_vm1, %v583_v19 }
  0xa9   : > { %683 = vmatprep.mubr.bf16.mxu0 %v7729_v11 }
  0xb0   : > { %4925 = vmatmul.mubr.msk.bf16.gmra.mrb[8].mxu0 %vm612_vm1, %v584_v22 }
  0xb1   : > { %693 = vmatprep.mubr.bf16.mxu0 %v7729_v11 }
  0xb8   : > { %4926 = vmatmul.mubr.msk.bf16.gmra.mrb[12].mxu0 %vm612_vm1, %v585_v25 }
  0xb9   : > { %703 = vmatprep.mubr.bf16.mxu0 %v7729_v11 }
  0xc0   : > { %4927 = vmatmul.mubr.msk.bf16.gmra.mrb[16].mxu0 %vm612_vm1, %v586_v49 }
  0xc1   : > { %713 = vmatprep.mubr.bf16.mxu0 %v7729_v11 }
  0xc8   : > { %4928 = vmatmul.mubr.msk.bf16.gmra.mrb[20].mxu0 %vm612_vm1, %v587_v52  ;;  %v5514_v52 = vld [vmem:[%s7715_s7 + $0x10] sm:$0xff]  }
  0xc9   : > { %5269 = vmatprep.subr.bf16.mxu0 %v5514_v52 }
  0xca   : > { %5270 = vmatpush3.bf16.msra.mxu0 %v5514_v52 }
 0x173   : > { %v6228_v27 = vpop.f32.mrb[0].mxu0 }
 0x174   : > { %v6230_v28 = vpop.f32.mrb[1].mxu0 }
 0x175   : > { %v6232_v29 = vpop.f32.mrb[2].mxu0 }
 0x176   : > { %v6236_v31 = vpop.f32.mrb[3].mxu0 }
 0x17b   : > { %v6238_v32 = vpop.f32.mrb[4].mxu0 }
 0x17c   : > { %v6240_v33 = vpop.f32.mrb[5].mxu0 }
 0x17d   : > { %v6242_v34 = vpop.f32.mrb[6].mxu0 }
 0x17e   : > { %v6246_v36 = vpop.f32.mrb[7].mxu0 }
 0x183   : > { %v685_v37 = vpop.f32.mrb[8].mxu0 }
 0x184   : > { %v6248_v38 = vpop.f32.mrb[9].mxu0 }
 0x185   : > { %740 = vrot.lane.b32.xlu0 %v6248_v38, %s5912_s0  ;;  %v689_v39 = vpop.f32.mrb[10].mxu0 }
 0x186   : > { %v6252_v40 = vpack.c.bf16 %v689_v39, %v685_v37  ;;  %v6254_v41 = vpop.f32.mrb[11].mxu0 }
 0x188   : > { %5221 = vmatprep.subr.bf16.mxu1 %v6252_v40 }
 0x189   : > { %5222 = vmatpush3.bf16.msra.mxu1 %v6252_v40  ;;  %742 = vrot.lane.b32.xlu0 %v6254_v41, %s5912_s0 }
 0x18b   : > { %v695_v42 = vpop.f32.mrb[12].mxu0 }
 0x18c   : > { %v6260_v43 = vpop.f32.mrb[13].mxu0 }
 0x18d   : > { %786 = vperm.xlu0 %5484, %v6230_v28   ;;  %744 = vrot.lane.b32.xlu1 %v6260_v43, %s5912_s0  ;;  %v699_v44 = vpop.f32.mrb[14].mxu0 }
 0x18e   : > { %v6265_v45 = vpack.c.bf16 %v699_v44, %v695_v42  ;;  %v6267_v46 = vpop.f32.mrb[15].mxu0  ;;  %v7727_v44 = vmov 38  }
 0x190   : > { %5223 = vmatprep.subr.bf16.mxu1 %v6265_v45 }
 0x191   : > { %801 = vperm.xlu0 %5484, %v6246_v36   ;;  %5224 = vmatpush3.bf16.msra.mxu1 %v6265_v45 }
 0x192   : > { %746 = vrot.lane.b32.xlu1 %v6267_v46, %s5912_s0 }
 0x193   : > { %v6320_v39 = vpop.f32.mrb[16].mxu0 }
 0x194   : > { %v6322_v42 = vpop.f32.mrb[17].mxu0 }
 0x195   : > { %5486 = vset.pattern.permute.xlu0 %v7727_v44  ;;  %v6326_v47 = vpop.f32.mrb[18].mxu0 }
 0x196   : > { %791 = vperm.xlu1 %5485, %v6236_v31   ;;  %v6330_v48 = vpop.f32.mrb[19].mxu0 }
 0x19a   : > { %796 = vperm.xlu1 %5485, %v6240_v33  }
 0x1f7   : > { %v741_v53 = vpop.permute.xlu0 %740 }
 0x1f8   : > { %752 = vxpose.xlu1.b32.start [1/4] (short) (narrow) %v741_v53, 8  ;;  %v5515_v53 = vld [vmem:[%s7715_s7 + $0x18] sm:$0xff]  }
 0x1f9   : > { %5271 = vmatprep.subr.bf16.mxu0 %v5515_v53 }
 0x1fa   : > { %5272 = vmatpush3.bf16.msra.mxu0 %v5515_v53 }
 0x1fb   : > { %v743_v54 = vpop.permute.xlu0 %742 }
 0x1fc   : > { %753 = vxpose.xlu1.b32.cont [2/4] (short) (narrow) %v743_v54, 8  ;;  %v6350_v54 = vpack.c.bf16 %v6330_v48, %v6322_v42 }
 0x1fe   : > { %5285 = vmatprep.subr.bf16.mxu0 %v6350_v54 }
 0x1ff   : > { %v745_v55 = vpop.permute.xlu1 %744 }
 0x200   : > { %754 = vxpose.xlu1.b32.cont [3/4] (short) (narrow) %v745_v55, 8 }
 0x204   : > { %v747_v56 = vpop.permute.xlu1 %746 }
 0x205   : > { %755 = vxpose.xlu1.b32.end [4/4] (short) (narrow) %v747_v56, 8 }
 0x20c   : > { %v787_v62 = vpop.permute.xlu0 %786 }
 0x210   : > { %v802_v8 = vpop.permute.xlu0 %801 }
 0x215   : > { %v792_v58 = vpop.permute.xlu1 %791 }
 0x219   : > { %v797_v60 = vpop.permute.xlu1 %796 }
 0x223   : > { %5487 = vset.pattern.permute.xlu1 %v7727_v44 }
 0x279   : > { %v768_v63 = vpop.trf.xlu1 }
 0x27a   : > { %v807_v0 = vrot.slane %v768_v63, %v6283_v61 }
 0x27c   : > { %v808_v2 = vadd.f32 %v807_v0, %v787_v62  ;;  %v809_v4 = vadd.f32 %v807_v0, %v792_v58  ;;  %v810_v5 = vadd.f32 %v807_v0, %v797_v60  ;;  %v811_v13 = vadd.f32 %v807_v0, %v802_v8 }
 0x27e   : > { %vm812_vm3 = vcmp.gt.f32.partialorder %v808_v2, 0.0  ;;  %v816_v6 = vmul.f32 0.2, %v808_v2  ;;  %vm813_vm4 = vcmp.gt.f32.partialorder %v809_v4, 0.0  ;;  %v817_v7 = vmul.f32 0.2, %v809_v4 }
 0x27f   : > { %v818_v12 = vmul.f32 0.2, %v810_v5  ;;  %vm814_vm6 = vcmp.gt.f32.partialorder %v810_v5, 0.0  ;;  %v819_v19 = vmul.f32 0.2, %v811_v13  ;;  %vm815_vm8 = vcmp.gt.f32.partialorder %v811_v13, 0.0 }
 0x280   : > { %v820_v9 = vsel %vm812_vm3, %v808_v2, %v816_v6  ;;  %v821_v10 = vsel %vm813_vm4, %v809_v4, %v817_v7 }
 0x281   : > { %v828_v14 = vsel %vm824_vm2, %v820_v9, -1e+30  ;;  %v829_v17 = vsel %vm825_vm5, %v821_v10, -1e+30  ;;  %v822_v18 = vsel %vm814_vm6, %v810_v5, %v818_v12  ;;  %v823_v23 = vsel %vm815_vm8, %v811_v13, %v819_v19 }
 0x282   : > { %v832_v16 = vsel %vm612_vm1, %v828_v14, -inf  ;;  %v835_v21 = vsel %vm612_vm1, %v829_v17, -inf  ;;  %v830_v22 = vsel %vm826_vm7, %v822_v18, -1e+30  ;;  %v831_v25 = vsel %vm827_vm9, %v823_v23, -1e+30 }
 0x283   : > { %833 = vmax.xlane.f32.xlu0 %v832_v16  ;;  %v838_v24 = vsel %vm612_vm1, %v830_v22, -inf  ;;  %v841_v37 = vsel %vm612_vm1, %v831_v25, -inf }
 0x287   : > { %836 = vmax.xlane.f32.xlu0 %v835_v21 }
 0x28b   : > { %839 = vmax.xlane.f32.xlu0 %v838_v24 }
 0x28f   : > { %842 = vmax.xlane.f32.xlu0 %v841_v37 }
 0x2a5   : > { %1234 = vrot.lane.b32.xlu0 %v6230_v28, %s5913_s16 }
 0x2a9   : > { %1236 = vrot.lane.b32.xlu0 %v6236_v31, %s5913_s16  ;;  %v6332_v31 = vpop.f32.mrb[20].mxu0 }
 0x2aa   : > { %v6334_v49 = vpop.f32.mrb[21].mxu0 }
 0x2ad   : > { %1238 = vrot.lane.b32.xlu0 %v6240_v33, %s5913_s16  ;;  %v6336_v33 = vpop.f32.mrb[22].mxu0 }
 0x2ae   : > { %v6340_v51 = vpop.f32.mrb[23].mxu0 }
 0x2af   : > { %v6355_v55 = vpack.c.bf16 %v6340_v51, %v6334_v49 }
 0x310   : > { %v834_v56 = vpop.xlane.xlu0 %833 }
 0x311   : > { %v844_v57 = vsub.f32 %v828_v14, %v834_v56 }
 0x313   : > { %v848_v58 = vmul.f32 1.442695, %v844_v57 }
 0x314   : > { %v837_v59 = vpop.xlane.xlu0 %836 }
 0x315   : > { %5544 = vpow2.f32 %v848_v58  ;;  %v845_v60 = vsub.f32 %v829_v17, %v837_v59  ;;  %v7725_v17 = vmov 40  }
 0x317   : > { %v850_v62 = vmul.f32 1.442695, %v845_v60 }
 0x318   : > { %v840_v63 = vpop.xlane.xlu0 %839 }
 0x319   : > { %5546 = vpow2.f32 %v850_v62  ;;  %v846_v0 = vsub.f32 %v830_v22, %v840_v63 }
 0x31b   : > { %v852_v2 = vmul.f32 1.442695, %v846_v0 }
 0x31c   : > { %v843_v4 = vpop.xlane.xlu0 %842 }
 0x31d   : > { %5548 = vpow2.f32 %v852_v2  ;;  %v847_v5 = vsub.f32 %v831_v25, %v843_v4 }
 0x31f   : > { %v5545_v6 = vpop.eup %5544  ;;  %v854_v7 = vmul.f32 1.442695, %v847_v5 }
 0x320   : > { %v856_v8 = vsel %vm612_vm1, %v5545_v6, 0.0 }
 0x321   : > { %5550 = vpow2.f32 %v854_v7  ;;  %857 = vadd.xlane.f32.xlu0 %v856_v8 }
 0x323   : > { %v5547_v9 = vpop.eup %5546 }
 0x324   : > { %v859_v10 = vsel %vm612_vm1, %v5547_v9, 0.0 }
 0x325   : > { %860 = vadd.xlane.f32.xlu0 %v859_v10 }
 0x327   : > { %v5549_v12 = vpop.eup %5548 }
 0x328   : > { %v862_v13 = vsel %vm612_vm1, %v5549_v12, 0.0 }
 0x329   : > { %863 = vadd.xlane.f32.xlu1 %v862_v13 }
 0x32b   : > { %v5551_v14 = vpop.eup %5550 }
 0x32c   : > { %v865_v16 = vsel %vm612_vm1, %v5551_v14, 0.0 }
 0x32d   : > { %866 = vadd.xlane.f32.xlu0 %v865_v16 }
 0x33a   : > { %1456 = vrot.lane.b32.xlu1 %v6322_v42, %s5915_s22 }
 0x33e   : > { %1283 = vperm.xlu1 %5487, %v6254_v41  }
 0x342   : > { %1291 = vperm.xlu1 %5487, %v6267_v46  }
 0x343   : > { %1240 = vrot.lane.b32.xlu0 %v6246_v36, %s5913_s16  ;;  %v1235_v36 = vpop.permute.xlu0 %1234 }
 0x346   : > { %5489 = vset.pattern.permute.xlu1 %v7725_v17 }
 0x347   : > { %1505 = vperm.xlu1 %5489, %v6254_v41   ;;  %1458 = vrot.lane.b32.xlu0 %v6330_v48, %s5915_s22  ;;  %v1237_v18 = vpop.permute.xlu0 %1236 }
 0x34b   : > { %1509 = vperm.xlu1 %5489, %v6260_v43   ;;  %1460 = vrot.lane.b32.xlu0 %v6334_v49, %s5915_s22  ;;  %v1239_v19 = vpop.permute.xlu0 %1238 }
 0x34f   : > { %1462 = vrot.lane.b32.xlu0 %v6340_v51, %s5915_s22 }
 0x353   : > { %1279 = vperm.xlu0 %5486, %v6248_v38  }
 0x357   : > { %1287 = vperm.xlu0 %5486, %v6260_v43  }
 0x35b   : > { %5488 = vset.pattern.permute.xlu0 %v7725_v17 }
 0x35c   : > { %1501 = vperm.xlu0 %5488, %v6248_v38  }
 0x360   : > { %1513 = vperm.xlu0 %5488, %v6267_v46  }
 0x374   : > { %1246 = vxpose.xlu1.b32.start [1/4] (short) (narrow) %v1235_v36, 8  ;;  %v5517_v36 = vld [vmem:[%s7713_s5 + $0x8] sm:$0xff]  }
 0x378   : > { %1247 = vxpose.xlu1.b32.cont [2/4] (short) (narrow) %v1237_v18, 8  ;;  %v6396_v18 = vld [vmem:[%s7715_s7] sm:$0xff]  }
 0x37c   : > { %1248 = vxpose.xlu1.b32.cont [3/4] (short) (narrow) %v1239_v19, 8 }
 0x3ae   : > { %v858_v21 = vpop.xlane.xlu0 %857 }
 0x3af   : > { %5552 = vrcp.f32 %v858_v21 }
 0x3b2   : > { %v861_v22 = vpop.xlane.xlu0 %860 }
 0x3b3   : > { %5554 = vrcp.f32 %v861_v22 }
 0x3b6   : > { %v864_v23 = vpop.xlane.xlu1 %863 }
 0x3b7   : > { %5556 = vrcp.f32 %v864_v23 }
 0x3b9   : > { %v5553_v24 = vpop.eup %5552 }
 0x3ba   : > { %v867_v25 = vpop.xlane.xlu0 %866  ;;  %v1457_v37 = vpop.permute.xlu1 %1456  ;;  %v869_v52 = vmul.f32 %v5553_v24, %v5545_v6  ;;  %v6401_v24 = vld [vmem:[%s6150_s23 + $0x28] sm:$0xff] }
 0x3bb   : > { %5558 = vrcp.f32 %v867_v25  ;;  %1468 = vxpose.xlu0.b32.start [1/4] (short) (narrow) %v1457_v37, 8  ;;  %v6404_v25 = vld [vmem:[%s6150_s23 + $0x20] sm:$0xff]  ;;  %vm1315_vm10 = vcmp.gt.f32.partialorder %v6401_v24, 0.0 }
 0x3bc   : > { %v876_v58 = vmul.f32 %v869_v52, %v6287_v1  ;;  %vm1314_vm11 = vcmp.gt.f32.partialorder %v6404_v25, 0.0 }
 0x3bd   : > { %v5555_v53 = vpop.eup %5554 }
 0x3be   : > { %v1241_v56 = vpop.permute.xlu0 %1240  ;;  %v871_v57 = vmul.f32 %v5555_v53, %v5547_v9  ;;  %v1284_v10 = vpop.permute.xlu1 %1283 }
 0x3bf   : > { %1249 = vxpose.xlu1.b32.end [4/4] (short) (narrow) %v1241_v56, 8 }
 0x3c0   : > { %v877_v59 = vmul.f32 %v871_v57, %v6290_v3  ;;  %v7804_v3 = vmov 40  }
 0x3c1   : > { %v5557_v60 = vpop.eup %5556 }
 0x3c2   : > { %v1459_v62 = vpop.permute.xlu0 %1458  ;;  %v880_v63 = vpack.c.bf16 %v877_v59, %v876_v58  ;;  %v873_v0 = vmul.f32 %v5557_v60, %v5549_v12  ;;  %v1292_v13 = vpop.permute.xlu1 %1291  ;;  %v5516_v12 = vld [vmem:[%s7713_s5] sm:$0xff]   ;;  %v6409_v58 = vld [vmem:[%s6150_s23 + $0x38] sm:$0xff] }
 0x3c3   : > { %1469 = vxpose.xlu0.b32.cont [2/4] (short) (narrow) %v1459_v62, 8  ;;  %5229 = vmatprep.subr.bf16.mxu1 %v5516_v12  ;;  %7782 = vst [vmem:[#allocation19_spill] sm:$0xff] %v6409_v58  ;;  %v6412_v59 = vld [vmem:[%s6150_s23 + $0x30] sm:$0xff]  ;;  %vm7724_vm0 = vcmp.gt.f32.partialorder %v6409_v58, 0.0 }
 0x3c4   : > { %5225 = vmatprep.mubr.msk.bf16.mxu1 %vm612_vm1, %v880_v63  ;;  %v878_v6 = vmul.f32 %v873_v0, %v6297_v15  ;;  %vm1316_vm3 = vcmp.gt.f32.partialorder %v6412_v59, 0.0 }
 0x3c5   : > { %v5559_v2 = vpop.eup %5558 }
 0x3c6   : > { %v1461_v4 = vpop.permute.xlu0 %1460  ;;  %v875_v5 = vmul.f32 %v5559_v2, %v5551_v14  ;;  %v1506_v14 = vpop.permute.xlu1 %1505 }
 0x3c7   : > { %1470 = vxpose.xlu0.b32.cont [3/4] (short) (narrow) %v1461_v4, 8 }
 0x3c8   : > { %v879_v7 = vmul.f32 %v875_v5, %v6304_v20 }
 0x3ca   : > { %v1463_v8 = vpop.permute.xlu0 %1462  ;;  %v881_v9 = vpack.c.bf16 %v879_v7, %v878_v6  ;;  %v1510_v19 = vpop.permute.xlu1 %1509 }
 0x3cb   : > { %1471 = vxpose.xlu0.b32.end [4/4] (short) (narrow) %v1463_v8, 8 }
 0x3cc   : > { %5226 = vmatmul.mubr.msk.bf16.vlgmr.msra.gmra.mrb[0].mxu1 %vm612_vm1, %v881_v9 }
 0x3cd   : > { %5230 = vmatpush3.bf16.msra.mxu1 %v5516_v12 }
 0x3ce   : > { %5231 = vmatprep.subr.bf16.mxu1 %v5517_v36 }
 0x3d1   : > { %5232 = vmatpush3.bf16.msra.mxu1 %v5517_v36 }
 0x3d2   : > { %v1280_v16 = vpop.permute.xlu0 %1279  ;;  %5237 = vmatprep.subr.bf16.mxu1 %v6396_v18 }
 0x3d6   : > { %v1288_v21 = vpop.permute.xlu0 %1287 }
 0x3db   : > { %v1502_v37 = vpop.permute.xlu0 %1501 }
 0x3df   : > { %v1514_v5 = vpop.permute.xlu0 %1513 }
 0x433   : > { %v1262_v22 = vpop.trf.xlu1 }
 0x434   : > { %v1297_v23 = vrot.slane %v1262_v22, %v6283_v61 }
 0x436   : > { %v1299_v52 = vadd.f32 %v1297_v23, %v1284_v10  ;;  %v1298_v53 = vadd.f32 %v1297_v23, %v1280_v16  ;;  %v1301_v56 = vadd.f32 %v1297_v23, %v1292_v13  ;;  %v1300_v57 = vadd.f32 %v1297_v23, %v1288_v21 }
 0x438   : > { %vm1303_vm12 = vcmp.gt.f32.partialorder %v1299_v52, 0.0  ;;  %v1307_v60 = vmul.f32 0.2, %v1299_v52  ;;  %vm1302_vm13 = vcmp.gt.f32.partialorder %v1298_v53, 0.0  ;;  %v1306_v62 = vmul.f32 0.2, %v1298_v53 }
 0x439   : > { %vm1305_vm14 = vcmp.gt.f32.partialorder %v1301_v56, 0.0  ;;  %v1309_v63 = vmul.f32 0.2, %v1301_v56  ;;  %vm1304_vm15 = vcmp.gt.f32.partialorder %v1300_v57, 0.0  ;;  %v1308_v0 = vmul.f32 0.2, %v1300_v57 }
 0x43a   : > { %v1311_v2 = vsel %vm1303_vm12, %v1299_v52, %v1307_v60  ;;  %v1310_v4 = vsel %vm1302_vm13, %v1298_v53, %v1306_v62  ;;  %v6442_v52 = vld [vmem:[%s6150_s23 + $0x68] sm:$0xff]  ;;  %v6445_v53 = vld [vmem:[%s6150_s23 + $0x60] sm:$0xff] }
 0x43b   : > { %v6418_v6 = vsel %vm1315_vm10, %v1311_v2, -1e+30  ;;  %v6422_v7 = vsel %vm1314_vm11, %v1310_v4, -1e+30  ;;  %v1313_v8 = vsel %vm1305_vm14, %v1301_v56, %v1309_v63  ;;  %v1312_v9 = vsel %vm1304_vm15, %v1300_v57, %v1308_v0  ;;  %7783 = vst [vmem:[#allocation20_spill] sm:$0xff] %v6442_v52  ;;  %7784 = vst [vmem:[#allocation21_spill] sm:$0xff] %v6445_v53 }
 0x43c   : > { %v1325_v10 = vsel %vm612_vm1, %v6418_v6, -inf  ;;  %v1322_v13 = vsel %vm612_vm1, %v6422_v7, -inf  ;;  %v6430_v12 = vsel %vm7724_vm0, %v1313_v8, -1e+30  ;;  %v6434_v16 = vsel %vm1316_vm3, %v1312_v9, -1e+30 }
 0x43d   : > { %1326 = vmax.xlane.f32.xlu1 %v1325_v10  ;;  %1323 = vmax.xlane.f32.xlu0 %v1322_v13  ;;  %v1331_v22 = vsel %vm612_vm1, %v6430_v12, -inf  ;;  %v1328_v23 = vsel %vm612_vm1, %v6434_v16, -inf  ;;  %vm7737_vm4 = vcmp.gt.f32.partialorder %v6442_v52, 0.0  ;;  %vm7736_vm6 = vcmp.gt.f32.partialorder %v6445_v53, 0.0  ;;  %v6450_v63 = vld [vmem:[%s6150_s23 + $0x78] sm:$0xff]  ;;  %v6453_v0 = vld [vmem:[%s6150_s23 + $0x70] sm:$0xff] }
 0x43e   : > { %7785 = vst [vmem:[#allocation22_spill] sm:$0xff] %v6450_v63  ;;  %7786 = vst [vmem:[#allocation23_spill] sm:$0xff] %v6453_v0  ;;  %vm7735_vm15 = vcmp.gt.f32.partialorder %v6450_v63, 0.0  ;;  %vm7734_vm0 = vcmp.gt.f32.partialorder %v6453_v0, 0.0 }
 0x43f   : > { %v1484_v36 = vpop.trf.xlu0 }
 0x440   : > { %v1519_v21 = vrot.slane %v1484_v36, %v6283_v61 }
 0x441   : > { %1332 = vmax.xlane.f32.xlu1 %v1331_v22  ;;  %1329 = vmax.xlane.f32.xlu0 %v1328_v23 }
 0x442   : > { %v1521_v56 = vadd.f32 %v1519_v21, %v1506_v14  ;;  %v1520_v57 = vadd.f32 %v1519_v21, %v1502_v37  ;;  %v1523_v60 = vadd.f32 %v1519_v21, %v1514_v5  ;;  %v1522_v62 = vadd.f32 %v1519_v21, %v1510_v19 }
 0x444   : > { %vm1525_vm8 = vcmp.gt.f32.partialorder %v1521_v56, 0.0  ;;  %v1529_v2 = vmul.f32 0.2, %v1521_v56  ;;  %vm1524_vm12 = vcmp.gt.f32.partialorder %v1520_v57, 0.0  ;;  %v1528_v4 = vmul.f32 0.2, %v1520_v57 }
 0x445   : > { %vm1527_vm13 = vcmp.gt.f32.partialorder %v1523_v60, 0.0  ;;  %v1531_v8 = vmul.f32 0.2, %v1523_v60  ;;  %vm1526_vm14 = vcmp.gt.f32.partialorder %v1522_v62, 0.0  ;;  %v1530_v9 = vmul.f32 0.2, %v1522_v62 }
 0x446   : > { %v1533_v14 = vsel %vm1525_vm8, %v1521_v56, %v1529_v2  ;;  %v1532_v37 = vsel %vm1524_vm12, %v1520_v57, %v1528_v4 }
 0x447   : > { %v6459_v19 = vsel %vm7737_vm4, %v1533_v14, -1e+30  ;;  %v6463_v5 = vsel %vm7736_vm6, %v1532_v37, -1e+30  ;;  %v1535_v10 = vsel %vm1527_vm13, %v1523_v60, %v1531_v8  ;;  %v1534_v13 = vsel %vm1526_vm14, %v1522_v62, %v1530_v9  ;;  %v4929_v60 = vld [vmem:[%s6143_s19] ss:$0 sm:$0xff] }
 0x448   : > { %v1547_v36 = vsel %vm612_vm1, %v6459_v19, -inf  ;;  %v1544_v21 = vsel %vm612_vm1, %v6463_v5, -inf  ;;  %v6471_v22 = vsel %vm7735_vm15, %v1535_v10, -1e+30  ;;  %v6475_v23 = vsel %vm7734_vm0, %v1534_v13, -1e+30 }
 0x449   : > { %1548 = vmax.xlane.f32.xlu1 %v1547_v36  ;;  %1545 = vmax.xlane.f32.xlu0 %v1544_v21  ;;  %v1553_v56 = vsel %vm612_vm1, %v6471_v22, -inf  ;;  %v1550_v57 = vsel %vm612_vm1, %v6475_v23, -inf }
 0x44d   : > { %1554 = vmax.xlane.f32.xlu1 %v1553_v56  ;;  %1551 = vmax.xlane.f32.xlu0 %v1550_v57 }
 0x49f   : > { %v5227_v62 = vpop.f32.mrb[0].mxu1 }
 0x4a0   : > { %v938_v2 = vadd.f32 %v5227_v62, %v4929_v60  ;;  %v929_v4 = vpop.f32.mrb[1].mxu1 }
 0x4a1   : > { %v930_v8 = vadd.f32 %v4929_v60, %v929_v4  ;;  %v5228_v9 = vpop.f32.mrb[2].mxu1 }
 0x4a2   : > { %v946_v14 = vmul.f32 %v938_v2, %v938_v2  ;;  %v941_v37 = vadd.f32 %v5228_v9, %v4929_v60  ;;  %v932_v10 = vpop.f32.mrb[3].mxu1  ;;  %v5519_v9 = vld [vmem:[%s7715_s7 + $0x8] sm:$0xff]  }
 0x4a3   : > { %v944_v36 = vmul.f32 %v930_v8, %v930_v8  ;;  %v933_v13 = vadd.f32 %v4929_v60, %v932_v10 }
 0x4a4   : > { %v950_v21 = vsub.f32 %v946_v14, %v946_v14  ;;  %v947_v17 = vmul.f32 %v941_v37, %v941_v37  ;;  %v1049_v44 = vpack.c.bf16 %v941_v37, %v938_v2 }
 0x4a5   : > { %v948_v11 = vsub.f32 %v944_v36, %v944_v36  ;;  %v945_v26 = vmul.f32 %v933_v13, %v933_v13  ;;  %v1048_v50 = vpack.c.bf16 %v933_v13, %v930_v8  ;;  %v7787_v13 = vpack.c.bf16 %v6242_v34, %v6238_v32 }
 0x4a6   : > { %v951_v30 = vsub.f32 %v947_v17, %v947_v17  ;;  %v954_v57 = vmul.f32 0.5, %v950_v21  ;;  %v7788_v21 = vpack.c.bf16 %v6326_v47, %v6320_v39 }
 0x4a7   : > { %v949_v56 = vsub.f32 %v945_v26, %v945_v26  ;;  %v952_v35 = vmul.f32 0.5, %v948_v11  ;;  %v7742_v11 = vmov 39  }
 0x4a8   : > { %v955_v28 = vmul.f32 0.5, %v951_v30  ;;  %5491 = vset.pattern.permute.xlu0 %v7742_v11  ;;  %5490 = vset.pattern.permute.xlu1 %v7742_v11 }
 0x4a9   : > { %v953_v62 = vmul.f32 0.5, %v949_v56  ;;  %v7789_v56 = vpack.c.bf16 %v6232_v29, %v6228_v27 }
 0x4aa   : > { %v957_v15 = vpack.c.bf16 %v955_v28, %v954_v57 }
 0x4ab   : > { %v956_v4 = vpack.c.bf16 %v953_v62, %v952_v35 }
 0x4ad   : > { %5233 = vmatprep.mubr.msk.bf16.mxu1 %vm612_vm1, %v956_v4 }
 0x4ae   : > { %5234 = vmatmul.mubr.msk.bf16.vlgmr.msra.gmra.mrb[4].mxu1 %vm612_vm1, %v957_v15 }
 0x4af   : > { %5238 = vmatpush3.bf16.msra.mxu1 %v6396_v18  ;;  %5241 = vmatprep.mubr.msk.bf16.mxu1 %vm612_vm1, %v1048_v50 }
 0x4b0   : > { %5239 = vmatprep.subr.bf16.mxu1 %v5519_v9 }
 0x4b3   : > { %5240 = vmatpush3.bf16.msra.mxu1 %v5519_v9 }
 0x4b6   : > { %5242 = vmatmul.mubr.msk.bf16.vlgmr.msra.gmra.mrb[8].mxu1 %vm612_vm1, %v1049_v44 }
 0x4ca   : > { %v1327_v26 = vpop.xlane.xlu1 %1326  ;;  %v1324_v30 = vpop.xlane.xlu0 %1323 }
 0x4cb   : > { %v1335_v35 = vsub.f32 %v6418_v6, %v1327_v26  ;;  %v1334_v28 = vsub.f32 %v6422_v7, %v1324_v30 }
 0x4cd   : > { %v1340_v15 = vmul.f32 1.442695, %v1335_v35  ;;  %v1338_v17 = vmul.f32 1.442695, %v1334_v28 }
 0x4ce   : > { %v1333_v18 = vpop.xlane.xlu1 %1332  ;;  %v1330_v60 = vpop.xlane.xlu0 %1329 }
 0x4cf   : > { %5560 = vpow2.f32 %v1340_v15  ;;  %v1337_v50 = vsub.f32 %v6430_v12, %v1333_v18  ;;  %v1336_v44 = vsub.f32 %v6434_v16, %v1330_v60 }
 0x4d0   : > { %5562 = vpow2.f32 %v1338_v17 }
 0x4d1   : > { %v1344_v2 = vmul.f32 1.442695, %v1337_v50  ;;  %v1342_v8 = vmul.f32 1.442695, %v1336_v44 }
 0x4d3   : > { %5564 = vpow2.f32 %v1344_v2 }
 0x4d4   : > { %5566 = vpow2.f32 %v1342_v8 }
 0x4d6   : > { %v1546_v57 = vpop.xlane.xlu0 %1545  ;;  %v1549_v62 = vpop.xlane.xlu1 %1548 }
 0x4d7   : > { %v1556_v4 = vsub.f32 %v6463_v5, %v1546_v57  ;;  %v1557_v26 = vsub.f32 %v6459_v19, %v1549_v62 }
 0x4d9   : > { %v6496_v14 = vpop.eup %5560  ;;  %v1560_v32 = vmul.f32 1.442695, %v1556_v4  ;;  %v1562_v30 = vmul.f32 1.442695, %v1557_v26 }
 0x4da   : > { %v6498_v37 = vpop.eup %5562  ;;  %v1349_v6 = vsel %vm612_vm1, %v6496_v14, 0.0  ;;  %v1552_v9 = vpop.xlane.xlu0 %1551 }
 0x4db   : > { %1350 = vadd.xlane.f32.xlu1 %v1349_v6  ;;  %v1346_v7 = vsel %vm612_vm1, %v6498_v37, 0.0  ;;  %v1558_v34 = vsub.f32 %v6475_v23, %v1552_v9  ;;  %5568 = vpow2.f32 %v1560_v32  ;;  %v7790_v23 = vpack.c.bf16 %v6336_v33, %v6332_v31  ;;  %v1555_v28 = vpop.xlane.xlu1 %1554 }
 0x4dc   : > { %1347 = vadd.xlane.f32.xlu0 %v1346_v7  ;;  %5570 = vpow2.f32 %v1562_v30  ;;  %v1559_v15 = vsub.f32 %v6471_v22, %v1555_v28 }
 0x4dd   : > { %v6504_v12 = vpop.eup %5564  ;;  %v1564_v35 = vmul.f32 1.442695, %v1558_v34 }
 0x4de   : > { %v6506_v16 = vpop.eup %5566  ;;  %v1355_v10 = vsel %vm612_vm1, %v6504_v12, 0.0 }
 0x4df   : > { %1356 = vadd.xlane.f32.xlu1 %v1355_v10  ;;  %v1352_v36 = vsel %vm612_vm1, %v6506_v16, 0.0  ;;  %5572 = vpow2.f32 %v1564_v35 }
 0x4e0   : > { %1353 = vadd.xlane.f32.xlu0 %v1352_v36 }
 0x4e5   : > { %v6527_v39 = vpop.eup %5568 }
 0x4e6   : > { %v6529_v47 = vpop.eup %5570  ;;  %v1568_v27 = vsel %vm612_vm1, %v6527_v39, 0.0 }
 0x4e7   : > { %v1571_v19 = vsel %vm612_vm1, %v6529_v47, 0.0 }
 0x4e9   : > { %v6533_v29 = vpop.eup %5572 }
 0x4ea   : > { %v1574_v5 = vsel %vm612_vm1, %v6533_v29, 0.0 }
 0x4f0   : > { %1384 = vrot.lane.b32.xlu1 %v7787_v13, %s5912_s0 }
 0x4f4   : > { %1604 = vrot.lane.b32.xlu1 %v7788_v21, %s5918_s3 }
 0x4f6   : > { %1382 = vrot.lane.b32.xlu0 %v7789_v56, %s5912_s0 }
 0x515   : > { %1569 = vadd.xlane.f32.xlu0 %v1568_v27 }
 0x518   : > { %1572 = vadd.xlane.f32.xlu1 %v1571_v19 }
 0x519   : > { %1575 = vadd.xlane.f32.xlu0 %v1574_v5 }
 0x529   : > { %1972 = vrot.lane.b32.xlu1 %v6248_v38, %s5919_s18  ;;  %v1566_v38 = vmul.f32 1.442695, %v1559_v15 }
 0x52b   : > { %5574 = vpow2.f32 %v1566_v38 }
 0x52d   : > { %1974 = vrot.lane.b32.xlu1 %v6254_v41, %s5919_s18  ;;  %v7740_v41 = vmov 41  }
 0x52f   : > { %1606 = vrot.lane.b32.xlu0 %v7790_v23, %s5918_s3 }
 0x533   : > { %2190 = vrot.lane.b32.xlu0 %v6322_v42, %s5920_s10 }
 0x535   : > { %v6560_v31 = vpop.eup %5574 }
 0x536   : > { %v1577_v33 = vsel %vm612_vm1, %v6560_v31, 0.0 }
 0x537   : > { %2192 = vrot.lane.b32.xlu0 %v6330_v48, %s5920_s10 }
 0x53b   : > { %2194 = vrot.lane.b32.xlu0 %v6334_v49, %s5920_s10 }
 0x53f   : > { %2196 = vrot.lane.b32.xlu0 %v6340_v51, %s5920_s10 }
 0x543   : > { %2021 = vperm.xlu0 %5491, %v6330_v48  }
 0x547   : > { %2025 = vperm.xlu0 %5491, %v6334_v49  }
 0x54b   : > { %5494 = vset.pattern.permute.xlu0 %v7740_v41 }
 0x54c   : > { %2243 = vperm.xlu0 %5494, %v6334_v49  }
 0x551   : > { %1578 = vadd.xlane.f32.xlu1 %v1577_v33 }
 0x562   : > { %1976 = vrot.lane.b32.xlu1 %v6260_v43, %s5919_s18 }
 0x566   : > { %1978 = vrot.lane.b32.xlu1 %v6267_v46, %s5919_s18 }
 0x568   : > { %v1351_v22 = vpop.xlane.xlu1 %1350 }
 0x569   : > { %5576 = vrcp.f32 %v1351_v22  ;;  %v1348_v17 = vpop.xlane.xlu0 %1347 }
 0x56a   : > { %5578 = vrcp.f32 %v1348_v17  ;;  %2017 = vperm.xlu1 %5490, %v6322_v42  }
 0x56c   : > { %v1357_v18 = vpop.xlane.xlu1 %1356 }
 0x56d   : > { %5580 = vrcp.f32 %v1357_v18  ;;  %v1354_v49 = vpop.xlane.xlu0 %1353 }
 0x56e   : > { %5582 = vrcp.f32 %v1354_v49  ;;  %5492 = vset.pattern.permute.xlu1 %v7740_v41 }
 0x56f   : > { %2235 = vperm.xlu1 %5492, %v6322_v42  }
 0x570   : > { %v1385_v60 = vpop.permute.xlu1 %1384 }
 0x571   : > { %v1383_v50 = vpop.permute.xlu0 %1382 }
 0x572   : > { %5245 = vmatprep.subr.bf16.mxu1 %v1383_v50 }
 0x573   : > { %v5577_v43 = vpop.eup %5576  ;;  %5246 = vmatpush3.bf16.msra.mxu1 %v1383_v50  ;;  %2239 = vperm.xlu1 %5492, %v6330_v48  }
 0x574   : > { %v5579_v46 = vpop.eup %5578  ;;  %5247 = vmatprep.subr.bf16.mxu1 %v1385_v60  ;;  %v1361_v44 = vmul.f32 %v5577_v43, %v6496_v14  ;;  %v1605_v7 = vpop.permute.xlu1 %1604 }
 0x575   : > { %v1359_v2 = vmul.f32 %v5579_v46, %v6498_v37 }
 0x576   : > { %v1367_v8 = vmul.f32 %v6401_v24, %v1361_v44  ;;  %v7806_v24 = vld [vmem:[#allocation19_spill] sm:$0xff] }
 0x577   : > { %v5581_v6 = vpop.eup %5580  ;;  %5248 = vmatpush3.bf16.msra.mxu1 %v1385_v60  ;;  %5493 = vset.pattern.permute.xlu1 %v7742_v11  ;;  %v1366_v42 = vmul.f32 %v6404_v25, %v1359_v2 }
 0x578   : > { %v5583_v10 = vpop.eup %5582  ;;  %v1365_v36 = vmul.f32 %v5581_v6, %v6504_v12  ;;  %5253 = vmatprep.subr.bf16.mxu1 %v1605_v7  ;;  %2029 = vperm.xlu1 %5493, %v6340_v51   ;;  %v4932_v12 = vld [vmem:[%s7714_s6] ss:$0 sm:$0xff] }
 0x579   : > { %v1363_v48 = vmul.f32 %v5583_v10, %v6506_v16  ;;  %v1370_v14 = vpack.c.bf16 %v1367_v8, %v1366_v42 }
 0x57a   : > { %v1369_v37 = vmul.f32 %v6409_v58, %v1365_v36 }
 0x57b   : > { %5249 = vmatprep.mubr.msk.bf16.mxu1 %vm612_vm1, %v1370_v14  ;;  %v1368_v13 = vmul.f32 %v6412_v59, %v1363_v48 }
 0x57c   : > { %5495 = vset.pattern.permute.xlu1 %v7740_v41 }
 0x57d   : > { %2247 = vperm.xlu1 %5495, %v6340_v51   ;;  %v1371_v21 = vpack.c.bf16 %v1369_v37, %v1368_v13  ;;  %v4937_v51 = vld [vmem:[%s7716_s8] ss:$0 sm:$0xff] }
 0x57f   : > { %5250 = vmatmul.mubr.msk.bf16.vlgmr.msra.gmra.mrb[12].mxu1 %vm612_vm1, %v1371_v21 }
 0x580   : > { %5254 = vmatpush3.bf16.msra.mxu1 %v1605_v7 }
 0x581   : > { %v5235_v16 = vpop.f32.mrb[4].mxu1 }
 0x582   : > { %v1021_v56 = vpop.f32.mrb[5].mxu1  ;;  %v1030_v57 = vadd.f32 %v5235_v16, %v4932_v12 }
 0x583   : > { %v5236_v62 = vpop.f32.mrb[6].mxu1  ;;  %v1022_v4 = vadd.f32 %v4932_v12, %v1021_v56 }
 0x584   : > { %v1024_v9 = vpop.f32.mrb[7].mxu1  ;;  %v1042_v26 = vmul.f32 0.01, %v1030_v57  ;;  %v1033_v32 = vadd.f32 %v5236_v62, %v4932_v12  ;;  %vm1038_vm8 = vcmp.gt.f32.partialorder %v1030_v57, 0.0 }
 0x585   : > { %v1040_v34 = vmul.f32 0.01, %v1022_v4  ;;  %vm1036_vm12 = vcmp.gt.f32.partialorder %v1022_v4, 0.0  ;;  %v1025_v30 = vadd.f32 %v4932_v12, %v1024_v9 }
 0x586   : > { %v1046_v5 = vsel %vm1038_vm8, %v1030_v57, %v1042_v26  ;;  %vm1039_vm13 = vcmp.gt.f32.partialorder %v1033_v32, 0.0  ;;  %v1043_v23 = vmul.f32 0.01, %v1033_v32 }
 0x587   : > { %v1044_v38 = vsel %vm1036_vm12, %v1022_v4, %v1040_v34  ;;  %v1041_v18 = vmul.f32 0.01, %v1025_v30  ;;  %vm1037_vm15 = vcmp.gt.f32.partialorder %v1025_v30, 0.0 }
 0x588   : > { %v1047_v8 = vsel %vm1039_vm13, %v1033_v32, %v1043_v23 }
 0x589   : > { %v5243_v35 = vpop.f32.mrb[8].mxu1  ;;  %v1045_v42 = vsel %vm1037_vm15, %v1025_v30, %v1041_v18 }
 0x58a   : > { %v1122_v27 = vadd.f32 %v5243_v35, %v4937_v51  ;;  %v1113_v19 = vpop.f32.mrb[9].mxu1 }
 0x58b   : > { %v1114_v28 = vadd.f32 %v4937_v51, %v1113_v19  ;;  %v5244_v15 = vpop.f32.mrb[10].mxu1  ;;  %v7791_v19 = vmov 37  }
 0x58c   : > { %vm1130_vm14 = vcmp.gt.f32.partialorder %v1122_v27, 0.0  ;;  %v1134_v33 = vmul.f32 0.01, %v1122_v27  ;;  %v1125_v22 = vadd.f32 %v5244_v15, %v4937_v51  ;;  %v1116_v17 = vpop.f32.mrb[11].mxu1 }
 0x58d   : > { %vm1128_vm0 = vcmp.gt.f32.partialorder %v1114_v28, 0.0  ;;  %v1132_v49 = vmul.f32 0.01, %v1114_v28  ;;  %v1117_v60 = vadd.f32 %v4937_v51, %v1116_v17 }
 0x58e   : > { %v1138_v50 = vsel %vm1130_vm14, %v1122_v27, %v1134_v33  ;;  %vm1131_vm6 = vcmp.gt.f32.partialorder %v1125_v22, 0.0  ;;  %v1135_v43 = vmul.f32 0.01, %v1125_v22 }
 0x58f   : > { %v1136_v46 = vsel %vm1128_vm0, %v1114_v28, %v1132_v49  ;;  %vm1129_vm4 = vcmp.gt.f32.partialorder %v1117_v60, 0.0  ;;  %v1133_v44 = vmul.f32 0.01, %v1117_v60  ;;  %v6592_v2 = vadd.f32 %v1138_v50, %v1046_v5 }
 0x590   : > { %v1139_v6 = vsel %vm1131_vm6, %v1125_v22, %v1135_v43  ;;  %v6595_v7 = vadd.f32 %v1136_v46, %v1044_v38 }
 0x591   : > { %v1137_v10 = vsel %vm1129_vm4, %v1117_v60, %v1133_v44  ;;  %v6597_v36 = vadd.f32 %v1139_v6, %v1047_v8 }
 0x592   : > { %v6599_v48 = vadd.f32 %v1137_v10, %v1045_v42 }
 0x5a2   : > { %v1570_v14 = vpop.xlane.xlu0 %1569 }
 0x5a3   : > { %5584 = vrcp.f32 %v1570_v14 }
 0x5a5   : > { %v1573_v37 = vpop.xlane.xlu1 %1572 }
 0x5a6   : > { %5586 = vrcp.f32 %v1573_v37  ;;  %v1576_v13 = vpop.xlane.xlu0 %1575 }
 0x5a7   : > { %5588 = vrcp.f32 %v1576_v13 }
 0x5a9   : > { %v1973_v21 = vpop.permute.xlu1 %1972 }
 0x5aa   : > { %v1607_v12 = vpop.permute.xlu0 %1606  ;;  %1984 = vxpose.xlu1.b32.start [1/4] (short) (narrow) %v1973_v21, 8 }
 0x5ab   : > { %5255 = vmatprep.subr.bf16.mxu1 %v1607_v12 }
 0x5ac   : > { %5256 = vmatpush3.bf16.msra.mxu1 %v1607_v12 }
 0x5ad   : > { %v5585_v16 = vpop.eup %5584  ;;  %v1975_v56 = vpop.permute.xlu1 %1974 }
 0x5ae   : > { %v2191_v57 = vpop.permute.xlu0 %2190  ;;  %1985 = vxpose.xlu1.b32.cont [2/4] (short) (narrow) %v1975_v56, 8  ;;  %v1581_v62 = vmul.f32 %v5585_v16, %v6527_v39  ;;  %v6629_v16 = vld [vmem:[%s6150_s23 + $0x88] sm:$0xff] }
 0x5af   : > { %2202 = vxpose.xlu0.b32.start [1/4] (short) (narrow) %v2191_v57, 8  ;;  %v6633_v57 = vld [vmem:[%s6150_s23 + $0x40] sm:$0xff]  ;;  %vm7751_vm8 = vcmp.gt.f32.partialorder %v6629_v16, 0.0 }
 0x5b0   : > { %v5587_v4 = vpop.eup %5586  ;;  %v1588_v32 = vmul.f32 %v6445_v53, %v1581_v62  ;;  %v6636_v62 = vld [vmem:[%s6150_s23 + $0x48] sm:$0xff]  ;;  %vm7739_vm6 = vcmp.gt.f32.partialorder %v6633_v57, 0.0 }
 0x5b1   : > { %v1583_v9 = vmul.f32 %v5587_v4, %v6529_v47  ;;  %v5589_v47 = vpop.eup %5588  ;;  %v6639_v4 = vld [vmem:[%s6150_s23 + $0x80] sm:$0xff]  ;;  %vm7738_vm15 = vcmp.gt.f32.partialorder %v6636_v62, 0.0 }
 0x5b2   : > { %v2193_v26 = vpop.permute.xlu0 %2192  ;;  %v1585_v23 = vmul.f32 %v5589_v47, %v6533_v29  ;;  %v5520_v29 = vld [vmem:[%s7713_s5 + $0x10] sm:$0xff]   ;;  %vm7753_vm12 = vcmp.gt.f32.partialorder %v6639_v4, 0.0 }
 0x5b3   : > { %2203 = vxpose.xlu0.b32.cont [2/4] (short) (narrow) %v2193_v26, 8  ;;  %v1589_v51 = vmul.f32 %v6442_v52, %v1583_v9  ;;  %5261 = vmatprep.subr.bf16.mxu1 %v5520_v29 }
 0x5b4   : > { %v1590_v38 = vmul.f32 %v6453_v0, %v1585_v23 }
 0x5b5   : > { %v1592_v34 = vpack.c.bf16 %v1589_v51, %v1588_v32 }
 0x5b6   : > { %v2195_v30 = vpop.permute.xlu0 %2194 }
 0x5b7   : > { %2204 = vxpose.xlu0.b32.cont [3/4] (short) (narrow) %v2195_v30, 8  ;;  %5257 = vmatprep.mubr.msk.bf16.mxu1 %vm612_vm1, %v1592_v34 }
 0x5ba   : > { %v2197_v35 = vpop.permute.xlu0 %2196 }
 0x5bb   : > { %2205 = vxpose.xlu0.b32.end [4/4] (short) (narrow) %v2197_v35, 8 }
 0x5c2   : > { %v2022_v18 = vpop.permute.xlu0 %2021 }
 0x5c6   : > { %v2026_v60 = vpop.permute.xlu0 %2025 }
 0x5cb   : > { %v2244_v43 = vpop.permute.xlu0 %2243 }
 0x5de   : > { %v1579_v27 = vpop.xlane.xlu1 %1578 }
 0x5df   : > { %5590 = vrcp.f32 %v1579_v27 }
 0x5e2   : > { %v1977_v39 = vpop.permute.xlu1 %1976 }
 0x5e3   : > { %1986 = vxpose.xlu1.b32.cont [3/4] (short) (narrow) %v1977_v39, 8 }
 0x5e4   : > { %5497 = vset.pattern.permute.xlu0 %v7791_v19 }
 0x5e6   : > { %v1979_v5 = vpop.permute.xlu1 %1978 }
 0x5e7   : > { %1987 = vxpose.xlu1.b32.end [4/4] (short) (narrow) %v1979_v5, 8 }
 0x5e9   : > { %v5591_v28 = vpop.eup %5590 }
 0x5ea   : > { %v1587_v15 = vmul.f32 %v5591_v28, %v6560_v31  ;;  %v2018_v17 = vpop.permute.xlu1 %2017  ;;  %v5521_v31 = vld [vmem:[%s7713_s5 + $0x18] sm:$0xff]  }
 0x5ec   : > { %v1591_v33 = vmul.f32 %v6450_v63, %v1587_v15  ;;  %v6647_v15 = vld [vmem:[%s6150_s23 + $0x58] sm:$0xff] }
 0x5ee   : > { %v1593_v22 = vpack.c.bf16 %v1591_v33, %v1590_v38  ;;  %v2236_v49 = vpop.permute.xlu1 %2235  ;;  %v6650_v33 = vld [vmem:[%s6150_s23 + $0x50] sm:$0xff] }
 0x5f0   : > { %5258 = vmatmul.mubr.msk.bf16.vlgmr.msra.gmra.mrb[16].mxu1 %vm612_vm1, %v1593_v22 }
 0x5f1   : > { %5262 = vmatpush3.bf16.msra.mxu1 %v5520_v29 }
 0x5f2   : > { %v2240_v50 = vpop.permute.xlu1 %2239  ;;  %5263 = vmatprep.subr.bf16.mxu1 %v5521_v31 }
 0x5f5   : > { %5264 = vmatpush3.bf16.msra.mxu1 %v5521_v31 }
 0x5f7   : > { %v2030_v46 = vpop.permute.xlu1 %2029 }
 0x5fc   : > { %v2248_v37 = vpop.permute.xlu1 %2247 }
 0x605   : > { %5496 = vset.pattern.permute.xlu1 %v7791_v19 }
 0x62f   : > { %v2218_v44 = vpop.trf.xlu0 }
 0x630   : > { %v2253_v10 = vrot.slane %v2218_v44, %v6283_v61 }
 0x632   : > { %v2255_v13 = vadd.f32 %v2253_v10, %v2240_v50  ;;  %v2254_v21 = vadd.f32 %v2253_v10, %v2236_v49  ;;  %v2257_v47 = vadd.f32 %v2253_v10, %v2248_v37  ;;  %v2256_v5 = vadd.f32 %v2253_v10, %v2244_v43  ;;  %v6675_v10 = vld [vmem:[%s6150_s23 + $0x98] sm:$0xff]  ;;  %v6678_v37 = vld [vmem:[%s6150_s23 + $0x90] sm:$0xff] }
 0x634   : > { %vm2259_vm0 = vcmp.gt.f32.partialorder %v2255_v13, 0.0  ;;  %v2263_v9 = vmul.f32 0.2, %v2255_v13  ;;  %vm2258_vm4 = vcmp.gt.f32.partialorder %v2254_v21, 0.0  ;;  %v2262_v26 = vmul.f32 0.2, %v2254_v21 }
 0x635   : > { %v2264_v44 = vmul.f32 0.2, %v2256_v5 }
 0x636   : > { %v2267_v39 = vsel %vm2259_vm0, %v2255_v13, %v2263_v9  ;;  %v2266_v19 = vsel %vm2258_vm4, %v2254_v21, %v2262_v26 }
 0x637   : > { %v6666_v50 = vsel %vm7751_vm8, %v2267_v39, -1e+30  ;;  %v6670_v29 = vsel %vm7753_vm12, %v2266_v19, -1e+30  ;;  %v4949_v39 = vld [vmem:[%s6143_s19 + $0x1] ss:$0 sm:$0xff] }
 0x638   : > { %v2281_v13 = vsel %vm612_vm1, %v6666_v50, -inf  ;;  %v2278_v21 = vsel %vm612_vm1, %v6670_v29, -inf }
 0x652   : > { %v6619_v8 = vpop.f32.mrb[12].mxu1 }
 0x653   : > { %v6621_v6 = vpop.f32.mrb[13].mxu1  ;;  %v1437_v19 = vadd.f32 %v6619_v8, %v4949_v39 }
 0x654   : > { %v6623_v42 = vpop.f32.mrb[14].mxu1 }
 0x655   : > { %v6626_v14 = vpop.f32.mrb[15].mxu1 }
 0x65b   : > { %v2000_v12 = vpop.trf.xlu1 }
 0x65c   : > { %v2035_v56 = vrot.slane %v2000_v12, %v6283_v61 }
 0x65e   : > { %v2036_v32 = vadd.f32 %v2035_v56, %v2018_v17  ;;  %v2037_v51 = vadd.f32 %v2035_v56, %v2022_v18  ;;  %v2039_v34 = vadd.f32 %v2035_v56, %v2030_v46  ;;  %v2038_v30 = vadd.f32 %v2035_v56, %v2026_v60 }
 0x65f   : > { %v2265_v46 = vmul.f32 0.2, %v2257_v47 }
 0x660   : > { %vm2040_vm13 = vcmp.gt.f32.partialorder %v2036_v32, 0.0  ;;  %v2044_v35 = vmul.f32 0.2, %v2036_v32  ;;  %vm2041_vm14 = vcmp.gt.f32.partialorder %v2037_v51, 0.0  ;;  %v2045_v27 = vmul.f32 0.2, %v2037_v51 }
 0x661   : > { %v2047_v38 = vmul.f32 0.2, %v2039_v34  ;;  %v2046_v22 = vmul.f32 0.2, %v2038_v30  ;;  %vm2043_vm0 = vcmp.gt.f32.partialorder %v2039_v34, 0.0  ;;  %vm2042_vm4 = vcmp.gt.f32.partialorder %v2038_v30, 0.0 }
 0x662   : > { %v2048_v23 = vsel %vm2040_vm13, %v2036_v32, %v2044_v35  ;;  %v2049_v28 = vsel %vm2041_vm14, %v2037_v51, %v2045_v27  ;;  %vm7750_vm13 = vcmp.gt.f32.partialorder %v6647_v15, 0.0  ;;  %vm2054_vm14 = vcmp.gt.f32.partialorder %v6650_v33, 0.0 }
 0x663   : > { %v6654_v17 = vsel %vm7739_vm6, %v2048_v23, -1e+30  ;;  %v6658_v18 = vsel %vm7738_vm15, %v2049_v28, -1e+30  ;;  %v2051_v43 = vsel %vm2043_vm0, %v2039_v34, %v2047_v38  ;;  %v2050_v31 = vsel %vm2042_vm4, %v2038_v30, %v2046_v22 }
 0x664   : > { %v2060_v49 = vsel %vm612_vm1, %v6654_v17, -inf  ;;  %v2063_v60 = vsel %vm612_vm1, %v6658_v18, -inf  ;;  %vm2261_vm15 = vcmp.gt.f32.partialorder %v2257_v47, 0.0  ;;  %vm2260_vm6 = vcmp.gt.f32.partialorder %v2256_v5, 0.0 }
 0x665   : > { %2061 = vmax.xlane.f32.xlu0 %v2060_v49  ;;  %2064 = vmax.xlane.f32.xlu1 %v2063_v60  ;;  %v6686_v12 = vsel %vm7750_vm13, %v2051_v43, -1e+30  ;;  %v6690_v56 = vsel %vm2054_vm14, %v2050_v31, -1e+30  ;;  %v2269_v9 = vsel %vm2261_vm15, %v2257_v47, %v2265_v46  ;;  %vm7749_vm0 = vcmp.gt.f32.partialorder %v6675_v10, 0.0 }
 0x666   : > { %v2268_v26 = vsel %vm2260_vm6, %v2256_v5, %v2264_v44  ;;  %vm7752_vm4 = vcmp.gt.f32.partialorder %v6678_v37, 0.0  ;;  %v2069_v32 = vsel %vm612_vm1, %v6686_v12, -inf  ;;  %v2066_v51 = vsel %vm612_vm1, %v6690_v56, -inf  ;;  %v4957_v5 = vld [vmem:[%s6143_s19 + $0x3] ss:$0 sm:$0xff] }
 0x667   : > { %v6700_v34 = vsel %vm7749_vm0, %v2269_v9, -1e+30  ;;  %v6704_v30 = vsel %vm7752_vm4, %v2268_v26, -1e+30  ;;  %v1429_v47 = vadd.f32 %v4949_v39, %v6621_v6  ;;  %v1440_v23 = vadd.f32 %v6623_v42, %v4949_v39 }
 0x668   : > { %v2287_v35 = vsel %vm612_vm1, %v6700_v34, -inf  ;;  %v2284_v27 = vsel %vm612_vm1, %v6704_v30, -inf  ;;  %v1432_v28 = vadd.f32 %v4949_v39, %v6626_v14  ;;  %v1445_v60 = vmul.f32 %v1437_v19, %v1437_v19 }
 0x669   : > { %2282 = vmax.xlane.f32.xlu1 %v2281_v13  ;;  %2279 = vmax.xlane.f32.xlu0 %v2278_v21  ;;  %v1443_v43 = vmul.f32 %v1429_v47, %v1429_v47  ;;  %v1446_v44 = vmul.f32 %v1440_v23, %v1440_v23 }
 0x66a   : > { %v1444_v8 = vmul.f32 %v1432_v28, %v1432_v28 }
 0x66d   : > { %2070 = vmax.xlane.f32.xlu1 %v2069_v32  ;;  %2067 = vmax.xlane.f32.xlu0 %v2066_v51 }
 0x671   : > { %2288 = vmax.xlane.f32.xlu1 %v2287_v35  ;;  %2285 = vmax.xlane.f32.xlu0 %v2284_v27 }
 0x6c3   : > { %v5259_v38 = vpop.f32.mrb[16].mxu1 }
 0x6c4   : > { %v1659_v22 = vadd.f32 %v5259_v38, %v4957_v5  ;;  %v1650_v49 = vpop.f32.mrb[17].mxu1 }
 0x6c5   : > { %v1651_v31 = vadd.f32 %v4957_v5, %v1650_v49  ;;  %v5260_v46 = vpop.f32.mrb[18].mxu1 }
 0x6c6   : > { %v1667_v13 = vadd.f32 %v1659_v22, %v1437_v19  ;;  %v1671_v21 = vmul.f32 %v1659_v22, %v1659_v22  ;;  %v1662_v9 = vadd.f32 %v5260_v46, %v4957_v5  ;;  %v1653_v26 = vpop.f32.mrb[19].mxu1 }
 0x6c7   : > { %v1665_v32 = vadd.f32 %v1651_v31, %v1429_v47  ;;  %v1669_v6 = vmul.f32 %v1651_v31, %v1651_v31  ;;  %v1654_v51 = vadd.f32 %v4957_v5, %v1653_v26 }
 0x6c8   : > { %v1675_v35 = vadd.f32 %v1671_v21, %v1445_v60  ;;  %v1679_v42 = vmul.f32 %v1667_v13, %v1667_v13  ;;  %v1668_v27 = vadd.f32 %v1662_v9, %v1440_v23  ;;  %v1672_v14 = vmul.f32 %v1662_v9, %v1662_v9 }
 0x6c9   : > { %v1673_v39 = vadd.f32 %v1669_v6, %v1443_v43  ;;  %v1677_v38 = vmul.f32 %v1665_v32, %v1665_v32  ;;  %v1666_v41 = vadd.f32 %v1654_v51, %v1432_v28  ;;  %v1670_v11 = vmul.f32 %v1654_v51, %v1654_v51 }
 0x6ca   : > { %v1683_v0 = vsub.f32 %v1679_v42, %v1675_v35  ;;  %v1676_v49 = vadd.f32 %v1672_v14, %v1446_v44  ;;  %v1680_v63 = vmul.f32 %v1668_v27, %v1668_v27  ;;  %v1784_v53 = vpack.c.bf16 %v1668_v27, %v1667_v13 }
 0x6cb   : > { %v1681_v19 = vsub.f32 %v1677_v38, %v1673_v39  ;;  %v1674_v22 = vadd.f32 %v1670_v11, %v1444_v8  ;;  %v1678_v46 = vmul.f32 %v1666_v41, %v1666_v41  ;;  %v1783_v52 = vpack.c.bf16 %v1666_v41, %v1665_v32 }
 0x6cc   : > { %v1684_v58 = vsub.f32 %v1680_v63, %v1676_v49  ;;  %v1687_v5 = vmul.f32 0.5, %v1683_v0 }
 0x6cd   : > { %v1682_v47 = vsub.f32 %v1678_v46, %v1674_v22  ;;  %5273 = vmatprep.mubr.msk.bf16.mxu0 %vm612_vm1, %v1783_v52  ;;  %v1685_v23 = vmul.f32 0.5, %v1681_v19 }
 0x6ce   : > { %v1688_v60 = vmul.f32 0.5, %v1684_v58  ;;  %5274 = vmatmul.mubr.msk.bf16.vlgmr.msra.gmra.mrb[24].mxu0 %vm612_vm1, %v1784_v53 }
 0x6cf   : > { %v1686_v43 = vmul.f32 0.5, %v1682_v47  ;;  %5286 = vmatpush3.bf16.msra.mxu0 %v6350_v54 }
 0x6d0   : > { %v1690_v28 = vpack.c.bf16 %v1688_v60, %v1687_v5  ;;  %5287 = vmatprep.subr.bf16.mxu0 %v6355_v55 }
 0x6d1   : > { %v1689_v31 = vpack.c.bf16 %v1686_v43, %v1685_v23  ;;  %v1145_v43 = vstv %s1144_s30 }
 0x6d3   : > { %5288 = vmatpush3.bf16.msra.mxu0 %v6355_v55  ;;  %5265 = vmatprep.mubr.msk.bf16.mxu1 %vm612_vm1, %v1689_v31 }
 0x6d4   : > { %5266 = vmatmul.mubr.msk.bf16.vlgmr.msra.gmra.mrb[20].mxu1 %vm612_vm1, %v1690_v28  ;;  %v5752_v28 = vld [vmem:[%s6165_s2] sm:$0xff] }
 0x6d5   : > { %v1146_v31 = vmul.f32 %v5752_v28, %v1145_v43 }
 0x6f2   : > { %v2065_v63 = vpop.xlane.xlu1 %2064  ;;  %v2062_v52 = vpop.xlane.xlu0 %2061 }
 0x6f3   : > { %v2073_v58 = vsub.f32 %v6658_v18, %v2065_v63  ;;  %v2072_v53 = vsub.f32 %v6654_v17, %v2062_v52  ;;  %v5753_v63 = vld [vmem:[%s6165_s2 + $0x8] sm:$0xff] }
 0x6f4   : > { %v1147_v52 = vmul.f32 %v5753_v63, %v1145_v43 }
 0x6f5   : > { %v2078_v0 = vmul.f32 1.442695, %v2073_v58  ;;  %v2076_v11 = vmul.f32 1.442695, %v2072_v53  ;;  %v6770_v58 = vadd.f32 %v1146_v31, %v6595_v7  ;;  %v5754_v53 = vld [vmem:[%s6165_s2 + $0x18] sm:$0xff] }
 0x6f6   : > { %v2283_v41 = vpop.xlane.xlu1 %2282  ;;  %v2280_v54 = vpop.xlane.xlu0 %2279 }
 0x6f7   : > { %5592 = vpow2.f32 %v2078_v0  ;;  %v2291_v44 = vsub.f32 %v6666_v50, %v2283_v41  ;;  %v2290_v55 = vsub.f32 %v6670_v29, %v2280_v54  ;;  %v1149_v0 = vmul.f32 %v5754_v53, %v1145_v43  ;;  %v5755_v41 = vld [vmem:[%s6165_s2 + $0x10] sm:$0xff] }
 0x6f8   : > { %5594 = vpow2.f32 %v2076_v11  ;;  %v6774_v11 = vadd.f32 %v1147_v52, %v6599_v48  ;;  %v1148_v54 = vmul.f32 %v5755_v41, %v1145_v43 }
 0x6f9   : > { %v2296_v8 = vmul.f32 1.442695, %v2291_v44  ;;  %v2294_v17 = vmul.f32 1.442695, %v2290_v55 }
 0x6fa   : > { %v2071_v13 = vpop.xlane.xlu1 %2070  ;;  %v2068_v21 = vpop.xlane.xlu0 %2067  ;;  %v1157_v44 = vsel %vm612_vm1, %v6774_v11, 0.0  ;;  %v6785_v7 = vadd.f32 %v1148_v54, %v6592_v2 }
 0x6fb   : > { %v2075_v9 = vsub.f32 %v6686_v12, %v2071_v13  ;;  %v2074_v26 = vsub.f32 %v6690_v56, %v2068_v21 }
 0x6fc   : > { %v1160_v55 = vsel %vm612_vm1, %v6785_v7, 0.0 }
 0x6fd   : > { %v2082_v18 = vmul.f32 1.442695, %v2075_v9  ;;  %v2080_v32 = vmul.f32 1.442695, %v2074_v26 }
 0x6fe   : > { %v2289_v6 = vpop.xlane.xlu1 %2288  ;;  %v2286_v51 = vpop.xlane.xlu0 %2285 }
 0x6ff   : > { %5596 = vpow2.f32 %v2082_v18  ;;  %v2293_v35 = vsub.f32 %v6700_v34, %v2289_v6  ;;  %v2292_v42 = vsub.f32 %v6704_v30, %v2286_v51  ;;  %v4975_v51 = vld [vmem:[%s7716_s8 + $0x1] ss:$0 sm:$0xff] }
 0x700   : > { %5598 = vpow2.f32 %v2080_v32 }
 0x701   : > { %v6731_v50 = vpop.eup %5592  ;;  %5600 = vpow2.f32 %v2296_v8  ;;  %v2300_v29 = vmul.f32 1.442695, %v2293_v35  ;;  %v2298_v12 = vmul.f32 1.442695, %v2292_v42 }
 0x702   : > { %v6733_v27 = vpop.eup %5594  ;;  %5602 = vpow2.f32 %v2294_v17  ;;  %v2087_v56 = vsel %vm612_vm1, %v6731_v50, 0.0 }
 0x703   : > { %2088 = vadd.xlane.f32.xlu1 %v2087_v56  ;;  %v2084_v14 = vsel %vm612_vm1, %v6733_v27, 0.0  ;;  %5604 = vpow2.f32 %v2300_v29  ;;  %v6798_v29 = vstv %s4980_s26 }
 0x704   : > { %2085 = vadd.xlane.f32.xlu0 %v2084_v14  ;;  %5606 = vpow2.f32 %v2298_v12 }
 0x709   : > { %v6739_v34 = vpop.eup %5596 }
 0x70a   : > { %v6741_v30 = vpop.eup %5598  ;;  %v2093_v39 = vsel %vm612_vm1, %v6739_v34, 0.0 }
 0x70b   : > { %v6745_v38 = vpop.eup %5600  ;;  %2094 = vadd.xlane.f32.xlu1 %v2093_v39  ;;  %v2090_v49 = vsel %vm612_vm1, %v6741_v30, 0.0 }
 0x70c   : > { %v6749_v19 = vpop.eup %5602  ;;  %2091 = vadd.xlane.f32.xlu0 %v2090_v49  ;;  %v2305_v22 = vsel %vm612_vm1, %v6745_v38, 0.0 }
 0x70d   : > { %v6753_v46 = vpop.eup %5604  ;;  %v2302_v47 = vsel %vm612_vm1, %v6749_v19, 0.0 }
 0x70e   : > { %v6757_v5 = vpop.eup %5606  ;;  %v2311_v60 = vsel %vm612_vm1, %v6753_v46, 0.0 }
 0x70f   : > { %2306 = vadd.xlane.f32.xlu1 %v2305_v22  ;;  %v2308_v23 = vsel %vm612_vm1, %v6757_v5, 0.0 }
 0x710   : > { %2303 = vadd.xlane.f32.xlu0 %v2302_v47  ;;  %v5756_v47 = vld [vmem:[%s6165_s2 + $0x20] sm:$0xff] }
 0x713   : > { %2312 = vadd.xlane.f32.xlu1 %v2311_v60  ;;  %v6803_v60 = vmul.f32 %v5756_v47, %v6798_v29 }
 0x714   : > { %2309 = vadd.xlane.f32.xlu0 %v2308_v23  ;;  %v5757_v23 = vld [vmem:[%s6165_s2 + $0x30] sm:$0xff] }
 0x715   : > { %v6807_v43 = vmul.f32 %v5757_v23, %v6798_v29 }
 0x724   : > { %2122 = vrot.lane.b32.xlu1 %v6265_v45, %s5922_s14  ;;  %v1154_v45 = vsel %vm612_vm1, %v6770_v58, 0.0 }
 0x72a   : > { %2120 = vrot.lane.b32.xlu0 %v6252_v40, %s5922_s14  ;;  %v6780_v40 = vadd.f32 %v1149_v0, %v6597_v36 }
 0x72c   : > { %v1163_v48 = vsel %vm612_vm1, %v6780_v40, 0.0 }
 0x748   : > { %1155 = vadd.xlane.f32.xlu1 %v1154_v45 }
 0x749   : > { %1158 = vadd.xlane.f32.xlu0 %v1157_v44  ;;  %v4965_v44 = vld [vmem:[%s7714_s6 + $0x1] ss:$0 sm:$0xff] }
 0x74c   : > { %1164 = vadd.xlane.f32.xlu1 %v1163_v48 }
 0x74d   : > { %1161 = vadd.xlane.f32.xlu0 %v1160_v55 }
 0x790   : > { %v2089_v13 = vpop.xlane.xlu1 %2088 }
 0x791   : > { %5608 = vrcp.f32 %v2089_v13  ;;  %v2086_v36 = vpop.xlane.xlu0 %2085 }
 0x792   : > { %5610 = vrcp.f32 %v2086_v36 }
 0x798   : > { %v2095_v21 = vpop.xlane.xlu1 %2094 }
 0x799   : > { %5612 = vrcp.f32 %v2095_v21  ;;  %v2092_v9 = vpop.xlane.xlu0 %2091 }
 0x79a   : > { %5614 = vrcp.f32 %v2092_v9 }
 0x79b   : > { %v5609_v2 = vpop.eup %5608 }
 0x79c   : > { %v5611_v26 = vpop.eup %5610  ;;  %v2307_v8 = vpop.xlane.xlu1 %2306  ;;  %v2099_v18 = vmul.f32 %v5609_v2, %v6731_v50 }
 0x79d   : > { %5616 = vrcp.f32 %v2307_v8  ;;  %v2304_v32 = vpop.xlane.xlu0 %2303  ;;  %v2097_v17 = vmul.f32 %v5611_v26, %v6733_v27 }
 0x79e   : > { %5618 = vrcp.f32 %v2304_v32  ;;  %v2105_v6 = vmul.f32 %v6636_v62, %v2099_v18 }
 0x79f   : > { %v2104_v35 = vmul.f32 %v6633_v57, %v2097_v17 }
 0x7a0   : > { %v2313_v42 = vpop.xlane.xlu1 %2312 }
 0x7a1   : > { %5620 = vrcp.f32 %v2313_v42  ;;  %v2310_v50 = vpop.xlane.xlu0 %2309  ;;  %v5275_v12 = vpop.f32.mrb[24].mxu0  ;;  %v2108_v56 = vpack.c.bf16 %v2105_v6, %v2104_v35 }
 0x7a2   : > { %5622 = vrcp.f32 %v2310_v50  ;;  %v1859_v27 = vadd.f32 %v5275_v12, %v4975_v51  ;;  %v1850_v14 = vpop.f32.mrb[25].mxu0 }
 0x7a3   : > { %v5613_v39 = vpop.eup %5612  ;;  %v1851_v49 = vadd.f32 %v4975_v51, %v1850_v14  ;;  %5281 = vmatprep.mubr.msk.bf16.mxu1 %vm612_vm1, %v2108_v56  ;;  %v5276_v22 = vpop.f32.mrb[26].mxu0 }
 0x7a4   : > { %v5615_v28 = vpop.eup %5614  ;;  %v2103_v31 = vmul.f32 %v5613_v39, %v6739_v34  ;;  %vm1867_vm6 = vcmp.gt.f32.partialorder %v1859_v27, 0.0  ;;  %v1871_v63 = vmul.f32 0.01, %v1859_v27  ;;  %v1862_v52 = vadd.f32 %v5276_v22, %v4975_v51  ;;  %v1853_v53 = vpop.f32.mrb[27].mxu0  ;;  %v5758_v34 = vld [vmem:[%s6165_s2 + $0x28] sm:$0xff] }
 0x7a5   : > { %v2101_v0 = vmul.f32 %v5615_v28, %v6741_v30  ;;  %vm1865_vm15 = vcmp.gt.f32.partialorder %v1851_v49, 0.0  ;;  %v1869_v41 = vmul.f32 0.01, %v1851_v49  ;;  %v1854_v54 = vadd.f32 %v4975_v51, %v1853_v53  ;;  %v2121_v45 = vpop.permute.xlu0 %2120  ;;  %v2123_v9 = vpop.permute.xlu1 %2122 }
 0x7a6   : > { %vm1868_vm0 = vcmp.gt.f32.partialorder %v1862_v52, 0.0  ;;  %v1872_v48 = vmul.f32 0.01, %v1862_v52  ;;  %5277 = vmatprep.subr.bf16.mxu1 %v2121_v45  ;;  %v2107_v55 = vmul.f32 %v6647_v15, %v2103_v31  ;;  %v1884_v13 = vmul.f32 %v5758_v34, %v6798_v29 }
 0x7a7   : > { %v5617_v36 = vpop.eup %5616  ;;  %v1875_v21 = vsel %vm1867_vm6, %v1859_v27, %v1871_v63  ;;  %vm1866_vm13 = vcmp.gt.f32.partialorder %v1854_v54, 0.0  ;;  %v1870_v30 = vmul.f32 0.01, %v1854_v54  ;;  %5278 = vmatpush3.bf16.msra.mxu1 %v2121_v45  ;;  %v5267_v2 = vpop.f32.mrb[20].mxu1  ;;  %v2106_v26 = vmul.f32 %v6650_v33, %v2101_v0 }
 0x7a8   : > { %v5619_v8 = vpop.eup %5618  ;;  %v1873_v18 = vsel %vm1865_vm15, %v1851_v49, %v1869_v41  ;;  %v1876_v32 = vsel %vm1868_vm0, %v1862_v52, %v1872_v48  ;;  %v1765_v17 = vadd.f32 %v5267_v2, %v4965_v44  ;;  %5279 = vmatprep.subr.bf16.mxu1 %v2123_v9  ;;  %v1756_v6 = vpop.f32.mrb[21].mxu1  ;;  %v2317_v51 = vmul.f32 %v5617_v36, %v6745_v38 }
 0x7a9   : > { %v1874_v35 = vsel %vm1866_vm13, %v1854_v54, %v1870_v30  ;;  %v1757_v42 = vadd.f32 %v4965_v44, %v1756_v6  ;;  %v5268_v50 = vpop.f32.mrb[22].mxu1  ;;  %v2109_v12 = vpack.c.bf16 %v2107_v55, %v2106_v26  ;;  %v2315_v56 = vmul.f32 %v5619_v8, %v6749_v19  ;;  %v5759_v30 = vld [vmem:[%s6165_s2 + $0x38] sm:$0xff] }
 0x7aa   : > { %vm1773_vm6 = vcmp.gt.f32.partialorder %v1765_v17, 0.0  ;;  %v1777_v27 = vmul.f32 0.01, %v1765_v17  ;;  %v1768_v14 = vadd.f32 %v5268_v50, %v4965_v44  ;;  %v1759_v39 = vpop.f32.mrb[23].mxu1  ;;  %v2323_v22 = vmul.f32 %v6629_v16, %v2317_v51 }
 0x7ab   : > { %v5621_v49 = vpop.eup %5620  ;;  %vm1771_vm15 = vcmp.gt.f32.partialorder %v1757_v42, 0.0  ;;  %v1775_v47 = vmul.f32 0.01, %v1757_v42  ;;  %v1760_v23 = vadd.f32 %v4965_v44, %v1759_v39  ;;  %5280 = vmatpush3.bf16.msra.mxu1 %v2123_v9  ;;  %v2322_v28 = vmul.f32 %v6639_v4, %v2315_v56 }
 0x7ac   : > { %v5623_v38 = vpop.eup %5622  ;;  %v2321_v31 = vmul.f32 %v5621_v49, %v6753_v46  ;;  %v1781_v63 = vsel %vm1773_vm6, %v1765_v17, %v1777_v27  ;;  %vm1774_vm13 = vcmp.gt.f32.partialorder %v1768_v14, 0.0  ;;  %v1778_v52 = vmul.f32 0.01, %v1768_v14 }
 0x7ad   : > { %v2319_v19 = vmul.f32 %v5623_v38, %v6757_v5  ;;  %v1779_v53 = vsel %vm1771_vm15, %v1757_v42, %v1775_v47  ;;  %vm1772_vm0 = vcmp.gt.f32.partialorder %v1760_v23, 0.0  ;;  %v1776_v0 = vmul.f32 0.01, %v1760_v23  ;;  %v5524_v38 = vld [vmem:[%s7713_s5 + $0x20] sm:$0xff]  }
 0x7ae   : > { %v1782_v41 = vsel %vm1774_vm13, %v1768_v14, %v1778_v52  ;;  %5282 = vmatmul.mubr.msk.bf16.vlgmr.msra.gmra.mrb[24].mxu1 %vm612_vm1, %v2109_v12  ;;  %v2326_v54 = vpack.c.bf16 %v2323_v22, %v2322_v28  ;;  %v2325_v45 = vmul.f32 %v6675_v10, %v2321_v31  ;;  %v1877_v44 = vadd.f32 %v1873_v18, %v1779_v53  ;;  %v5523_v28 = vld [vmem:[%s7715_s7 + $0x28] sm:$0xff]  }
 0x7af   : > { %v1780_v48 = vsel %vm1772_vm0, %v1760_v23, %v1776_v0  ;;  %v2324_v55 = vmul.f32 %v6678_v37, %v2319_v19  ;;  %v1879_v46 = vadd.f32 %v1875_v21, %v1781_v63  ;;  %v1880_v34 = vadd.f32 %v1876_v32, %v1782_v41  ;;  %5293 = vmatprep.subr.bf16.mxu1 %v5524_v38  ;;  %v5525_v31 = vld [vmem:[%s7713_s5 + $0x28] sm:$0xff]  }
 0x7b0   : > { %5289 = vmatprep.mubr.msk.bf16.mxu0 %vm612_vm1, %v2326_v54  ;;  %v1887_v5 = vadd.f32 %v6803_v60, %v1877_v44  ;;  %v1878_v36 = vadd.f32 %v1874_v35, %v1780_v48  ;;  %v1886_v9 = vmul.f32 %v5759_v30, %v6798_v29  ;;  %5294 = vmatpush3.bf16.msra.mxu1 %v5524_v38  ;;  %v5528_v63 = vld [vmem:[%s6141_s20 + $0x24] ss:$8 sps:$4 sm:$0xff]  }
 0x7b1   : > { %v2327_v2 = vpack.c.bf16 %v2325_v45, %v2324_v55  ;;  %v1889_v17 = vadd.f32 %v6807_v43, %v1879_v46  ;;  %5295 = vmatprep.subr.bf16.mxu1 %v5525_v31 }
 0x7b2   : > { %v1891_v26 = vsel %vm612_vm1, %v1887_v5, 0.0  ;;  %v1888_v8 = vadd.f32 %v1884_v13, %v1878_v36  ;;  %v1890_v18 = vadd.f32 %v1886_v9, %v1880_v34 }
 0x7b3   : > { %5290 = vmatmul.mubr.msk.bf16.vlgmr.msra.gmra.mrb[28].mxu0 %vm612_vm1, %v2327_v2  ;;  %1892 = vadd.xlane.f32.xlu0 %v1891_v26  ;;  %v1897_v32 = vsel %vm612_vm1, %v1889_v17, 0.0 }
 0x7b4   : > { %v1894_v21 = vsel %vm612_vm1, %v1888_v8, 0.0  ;;  %v1900_v60 = vsel %vm612_vm1, %v1890_v18, 0.0  ;;  %5296 = vmatpush3.bf16.msra.mxu1 %v5525_v31 }
 0x7b5   : > { %1895 = vadd.xlane.f32.xlu1 %v1894_v21  ;;  %2742 = vmatprep.subr.bf16.mxu1 %v5528_v63 }
 0x7b7   : > { %1898 = vadd.xlane.f32.xlu0 %v1897_v32 }
 0x7b9   : > { %1901 = vadd.xlane.f32.xlu1 %v1900_v60 }
 0x7d5   : > { %v1156_v29 = vpop.xlane.xlu1 %1155 }
 0x7d6   : > { %v1167_v6 = vmul.f32 0.03125, %v1156_v29  ;;  %v1159_v51 = vpop.xlane.xlu0 %1158 }
 0x7d7   : > { %v1168_v35 = vmul.f32 0.03125, %v1159_v51 }
 0x7d8   : > { %v6841_v13 = vsub.f32 %v6770_v58, %v1167_v6 }
 0x7d9   : > { %v6844_v43 = vsub.f32 %v6774_v11, %v1168_v35  ;;  %v1165_v42 = vpop.xlane.xlu1 %1164 }
 0x7da   : > { %v1170_v50 = vmul.f32 0.03125, %v1165_v42  ;;  %v1162_v12 = vpop.xlane.xlu0 %1161  ;;  %v1175_v56 = vmul.f32 %v6841_v13, %v6841_v13 }
 0x7db   : > { %v1169_v27 = vmul.f32 0.03125, %v1162_v12  ;;  %v1176_v14 = vmul.f32 %v6844_v43, %v6844_v43 }
 0x7dc   : > { %v6851_v39 = vsub.f32 %v6780_v40, %v1170_v50  ;;  %v1179_v22 = vsel %vm612_vm1, %v1175_v56, 0.0  ;;  %v4989_v56 = vld [vmem:[%s6143_s19 + $0x2] ss:$0 sm:$0xff] }
 0x7dd   : > { %v6855_v58 = vsub.f32 %v6785_v7, %v1169_v27  ;;  %1180 = vadd.xlane.f32.xlu0 %v1179_v22  ;;  %v1182_v11 = vsel %vm612_vm1, %v1176_v14, 0.0  ;;  %v5522_v7 = vld [vmem:[%s7715_s7 + $0x20] sm:$0xff]  }
 0x7de   : > { %1183 = vadd.xlane.f32.xlu1 %v1182_v11  ;;  %v1178_v49 = vmul.f32 %v6851_v39, %v6851_v39  ;;  %5301 = vmatprep.subr.bf16.mxu0 %v5522_v7 }
 0x7df   : > { %v1177_v47 = vmul.f32 %v6855_v58, %v6855_v58  ;;  %5302 = vmatpush3.bf16.msra.mxu0 %v5522_v7 }
 0x7e0   : > { %v1188_v23 = vsel %vm612_vm1, %v1178_v49, 0.0  ;;  %5303 = vmatprep.subr.bf16.mxu0 %v5523_v28 }
 0x7e1   : > { %v1185_v40 = vsel %vm612_vm1, %v1177_v47, 0.0 }
 0x7e2   : > { %1189 = vadd.xlane.f32.xlu1 %v1188_v23  ;;  %1186 = vadd.xlane.f32.xlu0 %v1185_v40  ;;  %v4997_v40 = vld [vmem:[%s6143_s19 + $0x4] ss:$0 sm:$0xff] }
 0x7e3   : > { %5304 = vmatpush3.bf16.msra.mxu0 %v5523_v28 }
 0x840   : > { %v1893_v52 = vpop.xlane.xlu0 %1892 }
 0x841   : > { %v1903_v19 = vmul.f32 0.03125, %v1893_v52 }
 0x842   : > { %v1896_v53 = vpop.xlane.xlu1 %1895 }
 0x843   : > { %v6877_v0 = vsub.f32 %v1887_v5, %v1903_v19  ;;  %v1904_v41 = vmul.f32 0.03125, %v1896_v53 }
 0x844   : > { %v1899_v54 = vpop.xlane.xlu0 %1898 }
 0x845   : > { %v6879_v45 = vsub.f32 %v1888_v8, %v1904_v41  ;;  %v1905_v44 = vmul.f32 0.03125, %v1899_v54  ;;  %v1911_v48 = vmul.f32 %v6877_v0, %v6877_v0 }
 0x846   : > { %v1902_v55 = vpop.xlane.xlu1 %1901 }
 0x847   : > { %v6883_v46 = vsub.f32 %v1889_v17, %v1905_v44  ;;  %v1906_v34 = vmul.f32 0.03125, %v1902_v55  ;;  %v1915_v36 = vsel %vm612_vm1, %v1911_v48, 0.0  ;;  %v1912_v30 = vmul.f32 %v6879_v45, %v6879_v45 }
 0x848   : > { %1916 = vadd.xlane.f32.xlu0 %v1915_v36 }
 0x849   : > { %v6888_v5 = vsub.f32 %v1890_v18, %v1906_v34  ;;  %v1918_v9 = vsel %vm612_vm1, %v1912_v30, 0.0  ;;  %v1913_v2 = vmul.f32 %v6883_v46, %v6883_v46 }
 0x84a   : > { %1919 = vadd.xlane.f32.xlu1 %v1918_v9 }
 0x84b   : > { %v1921_v26 = vsel %vm612_vm1, %v1913_v2, 0.0  ;;  %v1914_v8 = vmul.f32 %v6888_v5, %v6888_v5 }
 0x84c   : > { %1922 = vadd.xlane.f32.xlu0 %v1921_v26 }
 0x84d   : > { %v1924_v17 = vsel %vm612_vm1, %v1914_v8, 0.0 }
 0x84e   : > { %1925 = vadd.xlane.f32.xlu1 %v1924_v17 }
 0x86a   : > { %v1181_v32 = vpop.xlane.xlu0 %1180 }
 0x86b   : > { %v1184_v21 = vpop.xlane.xlu1 %1183  ;;  %v1191_v18 = vmul.f32 0.03125, %v1181_v32 }
 0x86c   : > { %v1192_v60 = vmul.f32 0.03125, %v1184_v21 }
 0x86d   : > { %v1195_v51 = vadd.f32 1e-05, %v1191_v18 }
 0x86e   : > { %v1196_v42 = vadd.f32 1e-05, %v1192_v60 }
 0x86f   : > { %v1190_v29 = vpop.xlane.xlu1 %1189  ;;  %v1187_v6 = vpop.xlane.xlu0 %1186  ;;  %5624 = vrsqrt.f32 %v1195_v51 }
 0x870   : > { %v1194_v35 = vmul.f32 0.03125, %v1190_v29  ;;  %v1193_v50 = vmul.f32 0.03125, %v1187_v6  ;;  %5626 = vrsqrt.f32 %v1196_v42 }
 0x872   : > { %v1198_v14 = vadd.f32 1e-05, %v1194_v35  ;;  %v1197_v11 = vadd.f32 1e-05, %v1193_v50 }
 0x874   : > { %5628 = vrsqrt.f32 %v1198_v14 }
 0x875   : > { %5630 = vrsqrt.f32 %v1197_v11 }
 0x879   : > { %v5625_v6 = vpop.eup %5624 }
 0x881   : > { %v5283_v12 = vpop.f32.mrb[24].mxu1 }
 0x882   : > { %v2166_v27 = vpop.f32.mrb[25].mxu1  ;;  %v2175_v49 = vadd.f32 %v5283_v12, %v4989_v56  ;;  %v5627_v12 = vpop.eup %5626 }
 0x883   : > { %v5284_v22 = vpop.f32.mrb[26].mxu1  ;;  %v2167_v47 = vadd.f32 %v4989_v56, %v2166_v27 }
 0x884   : > { %v2169_v23 = vpop.f32.mrb[27].mxu1  ;;  %v2178_v7 = vadd.f32 %v5284_v22, %v4989_v56  ;;  %v2183_v52 = vmul.f32 %v2175_v49, %v2175_v49 }
 0x885   : > { %v2170_v28 = vadd.f32 %v4989_v56, %v2169_v23  ;;  %v2181_v19 = vmul.f32 %v2167_v47, %v2167_v47  ;;  %v1204_v23 = vmul.f32 %v5627_v12, %v6844_v43  ;;  %v5531_v43 = vld [vmem:[%s6141_s20 + $0x34] ss:$8 sps:$4 sm:$0xff]  }
 0x886   : > { %v5291_v38 = vpop.f32.mrb[28].mxu0  ;;  %v2184_v54 = vmul.f32 %v2178_v7, %v2178_v7 }
 0x887   : > { %v2385_v31 = vadd.f32 %v5291_v38, %v4997_v40  ;;  %v2376_v63 = vpop.f32.mrb[29].mxu0  ;;  %v2182_v36 = vmul.f32 %v2170_v28, %v2170_v28 }
 0x888   : > { %v2377_v53 = vadd.f32 %v4997_v40, %v2376_v63  ;;  %v5292_v41 = vpop.f32.mrb[30].mxu0 }
 0x889   : > { %v2393_v44 = vadd.f32 %v2385_v31, %v2175_v49  ;;  %v2397_v48 = vmul.f32 %v2385_v31, %v2385_v31  ;;  %v2388_v55 = vadd.f32 %v5292_v41, %v4997_v40  ;;  %v2379_v34 = vpop.f32.mrb[31].mxu0  ;;  %v4942_v31 = vld [vmem:[%s7717_s9] ss:$0 sm:$0xff] }
 0x88a   : > { %v2391_v30 = vadd.f32 %v2377_v53, %v2167_v47  ;;  %v2395_v9 = vmul.f32 %v2377_v53, %v2377_v53  ;;  %v2380_v2 = vadd.f32 %v4997_v40, %v2379_v34  ;;  %v5629_v47 = vpop.eup %5628  ;;  %v1203_v40 = vmul.f32 %v5625_v6, %v6841_v13  ;;  %v5526_v41 = vld [vmem:[%s6141_s20 + $0x20] ss:$8 sps:$4 sm:$0xff]   ;;  %v4943_v13 = vld [vmem:[#allocation9] ss:$0 sm:$0xff] }
 0x88b   : > { %v2401_v26 = vadd.f32 %v2397_v48, %v2183_v52  ;;  %v2405_v8 = vmul.f32 %v2393_v44, %v2393_v44  ;;  %v2394_v17 = vadd.f32 %v2388_v55, %v2178_v7  ;;  %v2398_v21 = vmul.f32 %v2388_v55, %v2388_v55  ;;  %v5631_v38 = vpop.eup %5630  ;;  %v5529_v48 = vld [vmem:[%s6141_s20 + $0x30] ss:$8 sps:$4 sm:$0xff]  }
 0x88c   : > { %v2399_v32 = vadd.f32 %v2395_v9, %v2181_v19  ;;  %v2403_v18 = vmul.f32 %v2391_v30, %v2391_v30  ;;  %v2392_v60 = vadd.f32 %v2380_v2, %v2170_v28  ;;  %v2396_v29 = vmul.f32 %v2380_v2, %v2380_v2 }
 0x88d   : > { %v2409_v51 = vsub.f32 %v2405_v8, %v2401_v26  ;;  %v2402_v35 = vadd.f32 %v2398_v21, %v2184_v54  ;;  %v2406_v42 = vmul.f32 %v2394_v17, %v2394_v17  ;;  %v2510_v50 = vpack.c.bf16 %v2394_v17, %v2393_v44 }
 0x88e   : > { %v2407_v56 = vsub.f32 %v2403_v18, %v2399_v32  ;;  %v2400_v27 = vadd.f32 %v2396_v29, %v2182_v36  ;;  %v2404_v14 = vmul.f32 %v2392_v60, %v2392_v60  ;;  %v2509_v22 = vpack.c.bf16 %v2392_v60, %v2391_v30 }
 0x88f   : > { %v2410_v11 = vsub.f32 %v2406_v42, %v2402_v35  ;;  %v2413_v7 = vmul.f32 0.5, %v2409_v51  ;;  %v1215_v54 = vmul.f32 %v4942_v31, %v1204_v23  ;;  %v1214_v44 = vmul.f32 %v4942_v31, %v1203_v40  ;;  %v4983_v40 = vld [vmem:[#allocation9 + $0x1] ss:$0 sm:$0xff] }
 0x890   : > { %v2408_v49 = vsub.f32 %v2404_v14, %v2400_v27  ;;  %5305 = vmatprep.mubr.msk.bf16.mxu0 %vm612_vm1, %v2509_v22  ;;  %v2411_v63 = vmul.f32 0.5, %v2407_v56  ;;  %v7792_v55 = vmov 0   ;;  %v1205_v30 = vmul.f32 %v5631_v38, %v6855_v58  ;;  %v4982_v14 = vld [vmem:[%s7717_s9 + $0x1] ss:$0 sm:$0xff] }
 0x891   : > { %v2414_v28 = vmul.f32 0.5, %v2410_v11  ;;  %5306 = vmatmul.mubr.msk.bf16.vlgmr.msra.gmra.mrb[32].mxu0 %vm612_vm1, %v2510_v50  ;;  %v6912_v34 = vadd.f32 %v4943_v13, %v1214_v44  ;;  %v6914_v36 = vadd.f32 %v4943_v13, %v1215_v54  ;;  %v1206_v9 = vmul.f32 %v5629_v47, %v6851_v39 }
 0x892   : > { %v2412_v52 = vmul.f32 0.5, %v2408_v49  ;;  %v1216_v26 = vmul.f32 %v4942_v31, %v1205_v30 }
 0x893   : > { %v2416_v19 = vpack.c.bf16 %v2414_v28, %v2413_v7  ;;  %v2693_v2 = vpack.c.bf16 %v6914_v36, %v6912_v34  ;;  %v1217_v8 = vmul.f32 %v4942_v31, %v1206_v9 }
 0x894   : > { %v2415_v53 = vpack.c.bf16 %v2412_v52, %v2411_v63  ;;  %v6922_v17 = vadd.f32 %v4943_v13, %v1216_v26  ;;  %v5005_v26 = vld [vmem:[%s7714_s6 + $0x2] ss:$0 sm:$0xff] }
 0x895   : > { %v6924_v21 = vadd.f32 %v4943_v13, %v1217_v8  ;;  %v2608_v8 = vstv %s5020_s27 }
 0x896   : > { %5297 = vmatprep.mubr.msk.bf16.mxu1 %vm612_vm1, %v2415_v53 }
 0x897   : > { %5298 = vmatmul.mubr.msk.bf16.vlgmr.msra.gmra.mrb[28].mxu1 %vm612_vm1, %v2416_v19  ;;  %v2694_v32 = vpack.c.bf16 %v6924_v21, %v6922_v17 }
 0x898   : > { %2743 = vmatpush1.bf16.msra.mxu1 %v5526_v41  ;;  %2774 = vmatprep.mubr.bf16.mxu1 %v7792_v55 }
 0x899   : > { %2744 = vmatprep.subr.bf16.mxu1 %v5531_v43 }
 0x89c   : > { %2745 = vmatpush1.bf16.msra.mxu1 %v5529_v48 }
 0x89f   : > { %5032 = vmatmul.mubr.msk.bf16.vlgmr.msra.gmra.mrb[32].mxu1 %vm612_vm1, %v2693_v2 }
 0x8a0   : > { %2784 = vmatprep.mubr.bf16.mxu1 %v7792_v55 }
 0x8a7   : > { %5033 = vmatmul.mubr.msk.bf16.gmra.mrb[36].mxu1 %vm612_vm1, %v2694_v32 }
 0x8a8   : > { %2794 = vmatprep.mubr.bf16.mxu1 %v7792_v55 }
 0x8d5   : > { %v1917_v39 = vpop.xlane.xlu0 %1916 }
 0x8d6   : > { %v1927_v58 = vmul.f32 0.03125, %v1917_v39 }
 0x8d7   : > { %v1920_v18 = vpop.xlane.xlu1 %1919 }
 0x8d8   : > { %v1931_v60 = vadd.f32 1e-05, %v1927_v58  ;;  %v1928_v29 = vmul.f32 0.03125, %v1920_v18 }
 0x8d9   : > { %v1923_v6 = vpop.xlane.xlu0 %1922 }
 0x8da   : > { %5632 = vrsqrt.f32 %v1931_v60  ;;  %v1932_v51 = vadd.f32 1e-05, %v1928_v29  ;;  %v1929_v35 = vmul.f32 0.03125, %v1923_v6  ;;  %v5760_v29 = vld [vmem:[%s6165_s2 + $0x40] sm:$0xff] }
 0x8db   : > { %v1926_v42 = vpop.xlane.xlu1 %1925  ;;  %v2609_v6 = vmul.f32 %v5760_v29, %v2608_v8 }
 0x8dc   : > { %5634 = vrsqrt.f32 %v1932_v51  ;;  %v1933_v50 = vadd.f32 1e-05, %v1929_v35  ;;  %v1930_v12 = vmul.f32 0.03125, %v1926_v42  ;;  %v5761_v51 = vld [vmem:[%s6165_s2 + $0x50] sm:$0xff] }
 0x8dd   : > { %v2611_v35 = vmul.f32 %v5761_v51, %v2608_v8 }
 0x8de   : > { %5636 = vrsqrt.f32 %v1933_v50  ;;  %v1934_v56 = vadd.f32 1e-05, %v1930_v12 }
 0x8e0   : > { %5638 = vrsqrt.f32 %v1934_v56 }
 0x8e4   : > { %v5633_v27 = vpop.eup %5632 }
 0x8e5   : > { %v1939_v22 = vmul.f32 %v5633_v27, %v6877_v0 }
 0x8e6   : > { %v5635_v11 = vpop.eup %5634 }
 0x8e7   : > { %v1940_v49 = vmul.f32 %v5635_v11, %v6879_v45  ;;  %v1951_v47 = vmul.f32 %v4982_v14, %v1939_v22 }
 0x8e8   : > { %v5637_v23 = vpop.eup %5636 }
 0x8e9   : > { %v1952_v7 = vmul.f32 %v4982_v14, %v1940_v49  ;;  %v6935_v38 = vadd.f32 %v4983_v40, %v1951_v47  ;;  %v1941_v63 = vmul.f32 %v5637_v23, %v6883_v46  ;;  %v5015_v46 = vld [vmem:[%s7716_s8 + $0x2] ss:$0 sm:$0xff] }
 0x8ea   : > { %v5639_v28 = vpop.eup %5638 }
 0x8eb   : > { %7793 = vst [vmem:[#allocation24_spill] sm:$0xff] %v6935_v38  ;;  %v6937_v31 = vadd.f32 %v4983_v40, %v1952_v7  ;;  %v1942_v52 = vmul.f32 %v5639_v28, %v6888_v5  ;;  %v1953_v45 = vmul.f32 %v4982_v14, %v1941_v63 }
 0x8ed   : > { %7794 = vst [vmem:[#allocation25_spill] sm:$0xff] %v6937_v31  ;;  %v2695_v19 = vpack.c.bf16 %v6937_v31, %v6935_v38  ;;  %v1954_v0 = vmul.f32 %v4982_v14, %v1942_v52  ;;  %v6947_v41 = vadd.f32 %v4983_v40, %v1953_v45 }
 0x8ef   : > { %5034 = vmatmul.mubr.msk.bf16.gmra.mrb[40].mxu1 %vm612_vm1, %v2695_v19  ;;  %v6945_v53 = vadd.f32 %v4983_v40, %v1954_v0  ;;  %7796 = vst [vmem:[#allocation27_spill] sm:$0xff] %v6947_v41 }
 0x8f0   : > { %2804 = vmatprep.mubr.bf16.mxu1 %v7792_v55 }
 0x8f1   : > { %7795 = vst [vmem:[#allocation26_spill] sm:$0xff] %v6945_v53  ;;  %v2696_v54 = vpack.c.bf16 %v6945_v53, %v6947_v41 }
 0x8f7   : > { %5035 = vmatmul.mubr.msk.bf16.gmra.mrb[44].mxu1 %vm612_vm1, %v2696_v54  ;;  %v5762_v54 = vld [vmem:[%s6165_s2 + $0x48] sm:$0xff] }
 0x8f8   : > { %2814 = vmatprep.mubr.bf16.mxu1 %v7792_v55 }
 0x964   : > { %v5307_v5 = vpop.f32.mrb[32].mxu0 }
 0x965   : > { %v2585_v44 = vadd.f32 %v5307_v5, %v5015_v46  ;;  %v2576_v43 = vpop.f32.mrb[33].mxu0 }
 0x966   : > { %v2577_v13 = vadd.f32 %v5015_v46, %v2576_v43  ;;  %v5308_v48 = vpop.f32.mrb[34].mxu0 }
 0x967   : > { %v2579_v30 = vpop.f32.mrb[35].mxu0  ;;  %v2597_v9 = vmul.f32 0.01, %v2585_v44  ;;  %v2588_v2 = vadd.f32 %v5308_v48, %v5015_v46  ;;  %vm2593_vm6 = vcmp.gt.f32.partialorder %v2585_v44, 0.0 }
 0x968   : > { %v2595_v32 = vmul.f32 0.01, %v2577_v13  ;;  %vm2591_vm15 = vcmp.gt.f32.partialorder %v2577_v13, 0.0  ;;  %v2580_v39 = vadd.f32 %v5015_v46, %v2579_v30  ;;  %v2610_v46 = vmul.f32 %v5762_v54, %v2608_v8 }
 0x969   : > { %v2601_v42 = vsel %vm2593_vm6, %v2585_v44, %v2597_v9  ;;  %vm2594_vm13 = vcmp.gt.f32.partialorder %v2588_v2, 0.0  ;;  %v2598_v50 = vmul.f32 0.01, %v2588_v2 }
 0x96a   : > { %v5299_v58 = vpop.f32.mrb[28].mxu1  ;;  %v2599_v27 = vsel %vm2591_vm15, %v2577_v13, %v2595_v32  ;;  %v2596_v49 = vmul.f32 0.01, %v2580_v39  ;;  %vm2592_vm4 = vcmp.gt.f32.partialorder %v2580_v39, 0.0 }
 0x96b   : > { %v2491_v18 = vadd.f32 %v5299_v58, %v5005_v26  ;;  %v2482_v60 = vpop.f32.mrb[29].mxu1  ;;  %v2602_v19 = vsel %vm2594_vm13, %v2588_v2, %v2598_v50 }
 0x96c   : > { %v2483_v12 = vadd.f32 %v5005_v26, %v2482_v60  ;;  %v5300_v56 = vpop.f32.mrb[30].mxu1  ;;  %v2600_v5 = vsel %vm2592_vm4, %v2580_v39, %v2596_v49 }
 0x96d   : > { %vm2499_vm0 = vcmp.gt.f32.partialorder %v2491_v18, 0.0  ;;  %v2503_v14 = vmul.f32 0.01, %v2491_v18  ;;  %v2494_v22 = vadd.f32 %v5300_v56, %v5005_v26  ;;  %v2485_v11 = vpop.f32.mrb[31].mxu1 }
 0x96e   : > { %vm2497_vm8 = vcmp.gt.f32.partialorder %v2483_v12, 0.0  ;;  %v2501_v47 = vmul.f32 0.01, %v2483_v12  ;;  %v2486_v23 = vadd.f32 %v5005_v26, %v2485_v11  ;;  %v5763_v26 = vld [vmem:[%s6165_s2 + $0x58] sm:$0xff] }
 0x96f   : > { %v2507_v40 = vsel %vm2499_vm0, %v2491_v18, %v2503_v14  ;;  %vm2500_vm12 = vcmp.gt.f32.partialorder %v2494_v22, 0.0  ;;  %v2504_v7 = vmul.f32 0.01, %v2494_v22  ;;  %v2612_v32 = vmul.f32 %v5763_v26, %v2608_v8 }
 0x970   : > { %v2505_v28 = vsel %vm2497_vm8, %v2483_v12, %v2501_v47  ;;  %vm2498_vm6 = vcmp.gt.f32.partialorder %v2486_v23, 0.0  ;;  %v2502_v63 = vmul.f32 0.01, %v2486_v23  ;;  %v2605_v52 = vadd.f32 %v2601_v42, %v2507_v40 }
 0x971   : > { %v2508_v0 = vsel %vm2500_vm12, %v2494_v22, %v2504_v7  ;;  %v2603_v45 = vadd.f32 %v2599_v27, %v2505_v28 }
 0x972   : > { %v2506_v44 = vsel %vm2498_vm6, %v2486_v23, %v2502_v63  ;;  %v6963_v43 = vpop.f32.mrb[32].mxu1  ;;  %v2606_v13 = vadd.f32 %v2602_v19, %v2508_v0  ;;  %v2615_v29 = vadd.f32 %v2611_v35, %v2605_v52 }
 0x973   : > { %v6965_v48 = vpop.f32.mrb[33].mxu1  ;;  %v2613_v30 = vadd.f32 %v2609_v6, %v2603_v45  ;;  %v2604_v9 = vadd.f32 %v2600_v5, %v2506_v44 }
 0x974   : > { %v6968_v58 = vpop.f32.mrb[34].mxu1  ;;  %v2616_v42 = vadd.f32 %v2612_v32, %v2606_v13  ;;  %v2623_v6 = vsel %vm612_vm1, %v2615_v29, 0.0 }
 0x975   : > { %v6972_v18 = vpop.f32.mrb[35].mxu1  ;;  %v2617_v60 = vsel %vm612_vm1, %v2613_v30, 0.0  ;;  %v2614_v39 = vadd.f32 %v2610_v46, %v2604_v9 }
 0x976   : > { %2618 = vadd.xlane.f32.xlu0 %v2617_v60  ;;  %v2626_v12 = vsel %vm612_vm1, %v2616_v42, 0.0 }
 0x977   : > { %v2620_v51 = vsel %vm612_vm1, %v2614_v39, 0.0 }
 0x978   : > { %2621 = vadd.xlane.f32.xlu1 %v2620_v51 }
 0x97a   : > { %v6977_v50 = vpop.f32.mrb[36].mxu1  ;;  %2624 = vadd.xlane.f32.xlu0 %v2623_v6 }
 0x97b   : > { %v6979_v8 = vpop.f32.mrb[37].mxu1 }
 0x97c   : > { %v6982_v56 = vpop.f32.mrb[38].mxu1  ;;  %2627 = vadd.xlane.f32.xlu1 %v2626_v12 }
 0x97d   : > { %v6986_v27 = vpop.f32.mrb[39].mxu1 }
 0x9c2   : > { %v2796_v14 = vpop.f32.mrb[40].mxu1 }
 0x9c3   : > { %v6988_v22 = vpop.f32.mrb[41].mxu1 }
 0x9c4   : > { %v2800_v11 = vpop.f32.mrb[42].mxu1 }
 0x9c5   : > { %v6990_v49 = vpack.c.bf16 %v2800_v11, %v2796_v14  ;;  %v6992_v47 = vpop.f32.mrb[43].mxu1 }
 0x9c7   : > { %5309 = vmatprep.subr.bf16.mxu0 %v6990_v49 }
 0x9c8   : > { %5310 = vmatpush3.bf16.msra.mxu0 %v6990_v49 }
 0x9ca   : > { %v2806_v23 = vpop.f32.mrb[44].mxu1 }
 0x9cb   : > { %v6996_v40 = vpop.f32.mrb[45].mxu1 }
 0x9cc   : > { %v2810_v7 = vpop.f32.mrb[46].mxu1 }
 0x9cd   : > { %v6998_v28 = vpack.c.bf16 %v2810_v7, %v2806_v23  ;;  %v7000_v63 = vpop.f32.mrb[47].mxu1 }
 0x9cf   : > { %7797 = vst [vmem:[#allocation28_spill] sm:$0xff] %v6998_v28  ;;  %5311 = vmatprep.subr.bf16.mxu0 %v6998_v28 }
 0x9d0   : > { %5312 = vmatpush3.bf16.msra.mxu0 %v6998_v28  ;;  %v5767_v28 = vld [vmem:[%s6150_s23 + $0x18] sm:$0xff] }
 0xa03   : > { %v2619_v52 = vpop.xlane.xlu0 %2618 }
 0xa04   : > { %v2629_v19 = vmul.f32 0.03125, %v2619_v52 }
 0xa05   : > { %v2622_v0 = vpop.xlane.xlu1 %2621 }
 0xa06   : > { %v2633_v45 = vsub.f32 %v2613_v30, %v2629_v19  ;;  %v2630_v54 = vmul.f32 0.03125, %v2622_v0 }
 0xa07   : > { %v2625_v46 = vpop.xlane.xlu0 %2624 }
 0xa08   : > { %v2634_v5 = vsub.f32 %v2614_v39, %v2630_v54  ;;  %v2631_v44 = vmul.f32 0.03125, %v2625_v46  ;;  %v2637_v13 = vmul.f32 %v2633_v45, %v2633_v45 }
 0xa09   : > { %v2628_v9 = vpop.xlane.xlu1 %2627 }
 0xa0a   : > { %v2635_v26 = vsub.f32 %v2615_v29, %v2631_v44  ;;  %v2632_v32 = vmul.f32 0.03125, %v2628_v9  ;;  %v2641_v60 = vsel %vm612_vm1, %v2637_v13, 0.0  ;;  %v2638_v51 = vmul.f32 %v2634_v5, %v2634_v5 }
 0xa0b   : > { %2642 = vadd.xlane.f32.xlu0 %v2641_v60  ;;  %v7798_v29 = vmov 38  }
 0xa0c   : > { %v2636_v6 = vsub.f32 %v2616_v42, %v2632_v32  ;;  %v2644_v12 = vsel %vm612_vm1, %v2638_v51, 0.0  ;;  %v2639_v14 = vmul.f32 %v2635_v26, %v2635_v26 }
 0xa0d   : > { %2645 = vadd.xlane.f32.xlu1 %v2644_v12 }
 0xa0e   : > { %v2647_v11 = vsel %vm612_vm1, %v2639_v14, 0.0  ;;  %v2640_v30 = vmul.f32 %v2636_v6, %v2636_v6  ;;  %v5022_v14 = vld [vmem:[%s7717_s9 + $0x2] ss:$0 sm:$0xff] }
 0xa0f   : > { %2648 = vadd.xlane.f32.xlu0 %v2647_v11 }
 0xa10   : > { %v2650_v39 = vsel %vm612_vm1, %v2640_v30, 0.0 }
 0xa11   : > { %2651 = vadd.xlane.f32.xlu1 %v2650_v39 }
 0xa22   : > { %2849 = vrot.lane.b32.xlu1 %v6992_v47, %s5912_s0 }
 0xa25   : > { %2847 = vrot.lane.b32.xlu0 %v6988_v22, %s5912_s0 }
 0xa26   : > { %2851 = vrot.lane.b32.xlu1 %v6996_v40, %s5912_s0 }
 0xa29   : > { %2853 = vrot.lane.b32.xlu0 %v7000_v63, %s5912_s0 }
 0xa2a   : > { %2893 = vperm.xlu1 %5496, %v6965_v48  }
 0xa2d   : > { %2898 = vperm.xlu0 %5497, %v6972_v18  }
 0xa2e   : > { %2903 = vperm.xlu1 %5496, %v6979_v8  }
 0xa32   : > { %2908 = vperm.xlu1 %5496, %v6986_v27  }
 0xa36   : > { %5498 = vset.pattern.permute.xlu1 %v7798_v29 }
 0xa98   : > { %v2643_v42 = vpop.xlane.xlu0 %2642 }
 0xa99   : > { %v2653_v23 = vmul.f32 0.03125, %v2643_v42 }
 0xa9a   : > { %v2646_v7 = vpop.xlane.xlu1 %2645 }
 0xa9b   : > { %v2657_v52 = vadd.f32 1e-05, %v2653_v23  ;;  %v2654_v19 = vmul.f32 0.03125, %v2646_v7 }
 0xa9c   : > { %v2649_v0 = vpop.xlane.xlu0 %2648 }
 0xa9d   : > { %5640 = vrsqrt.f32 %v2657_v52  ;;  %v2658_v54 = vadd.f32 1e-05, %v2654_v19  ;;  %v2655_v46 = vmul.f32 0.03125, %v2649_v0  ;;  %v5023_v52 = vld [vmem:[#allocation9 + $0x2] ss:$0 sm:$0xff] }
 0xa9e   : > { %v2652_v44 = vpop.xlane.xlu1 %2651 }
 0xa9f   : > { %5642 = vrsqrt.f32 %v2658_v54  ;;  %v2659_v13 = vadd.f32 1e-05, %v2655_v46  ;;  %v2656_v9 = vmul.f32 0.03125, %v2652_v44 }
 0xaa0   : > { %v2848_v32 = vpop.permute.xlu0 %2847 }
 0xaa1   : > { %5644 = vrsqrt.f32 %v2659_v13  ;;  %v2660_v60 = vadd.f32 1e-05, %v2656_v9  ;;  %2859 = vxpose.xlu0.b32.start [1/4] (short) (narrow) %v2848_v32, 8 }
 0xaa2   : > { %v2850_v51 = vpop.permute.xlu1 %2849 }
 0xaa3   : > { %5646 = vrsqrt.f32 %v2660_v60 }
 0xaa4   : > { %v2854_v19 = vpop.permute.xlu0 %2853 }
 0xaa5   : > { %2860 = vxpose.xlu0.b32.cont [2/4] (short) (narrow) %v2850_v51, 8 }
 0xaa6   : > { %v2852_v11 = vpop.permute.xlu1 %2851 }
 0xaa7   : > { %v5641_v12 = vpop.eup %5640 }
 0xaa8   : > { %v2665_v30 = vmul.f32 %v5641_v12, %v2633_v45 }
 0xaa9   : > { %v5643_v39 = vpop.eup %5642  ;;  %2861 = vxpose.xlu0.b32.cont [3/4] (short) (narrow) %v2852_v11, 8 }
 0xaaa   : > { %v2666_v42 = vmul.f32 %v5643_v39, %v2634_v5  ;;  %v2677_v23 = vmul.f32 %v5022_v14, %v2665_v30 }
 0xaab   : > { %v5645_v7 = vpop.eup %5644 }
 0xaac   : > { %v2678_v0 = vmul.f32 %v5022_v14, %v2666_v42  ;;  %v7024_v46 = vadd.f32 %v5023_v52, %v2677_v23  ;;  %v2667_v13 = vmul.f32 %v5645_v7, %v2635_v26  ;;  %v5532_v26 = vld [vmem:[%s7715_s7 + $0x40] sm:$0xff]  }
 0xaad   : > { %v5647_v54 = vpop.eup %5646  ;;  %2862 = vxpose.xlu0.b32.end [4/4] (short) (narrow) %v2854_v19, 8  ;;  %5357 = vmatprep.subr.bf16.mxu1 %v5532_v26 }
 0xaae   : > { %7799 = vst [vmem:[#allocation29_spill] sm:$0xff] %v7024_v46  ;;  %v7026_v44 = vadd.f32 %v5023_v52, %v2678_v0  ;;  %v2668_v9 = vmul.f32 %v5647_v54, %v2636_v6  ;;  %v2679_v5 = vmul.f32 %v5022_v14, %v2667_v13  ;;  %5358 = vmatpush3.bf16.msra.mxu1 %v5532_v26  ;;  %v2894_v6 = vpop.permute.xlu1 %2893 }
 0xab0   : > { %7800 = vst [vmem:[#allocation30_spill] sm:$0xff] %v7026_v44  ;;  %v2697_v32 = vpack.c.bf16 %v7026_v44, %v7024_v46  ;;  %v2680_v45 = vmul.f32 %v5022_v14, %v2668_v9  ;;  %v7034_v51 = vadd.f32 %v5023_v52, %v2679_v5  ;;  %v2899_v14 = vpop.permute.xlu0 %2898 }
 0xab2   : > { %5036 = vmatmul.mubr.msk.bf16.gmra.mrb[48].mxu1 %vm612_vm1, %v2697_v32  ;;  %v7032_v60 = vadd.f32 %v5023_v52, %v2680_v45  ;;  %7802 = vst [vmem:[#allocation32_spill] sm:$0xff] %v7034_v51  ;;  %v2904_v11 = vpop.permute.xlu1 %2903 }
 0xab3   : > { %2824 = vmatprep.mubr.bf16.mxu1 %v7792_v55  ;;  %v5533_v55 = vld [vmem:[%s7715_s7 + $0x48] sm:$0xff]  }
 0xab4   : > { %7801 = vst [vmem:[#allocation31_spill] sm:$0xff] %v7032_v60  ;;  %v2698_v12 = vpack.c.bf16 %v7032_v60, %v7034_v51  ;;  %5359 = vmatprep.subr.bf16.mxu1 %v5533_v55 }
 0xab5   : > { %5360 = vmatpush3.bf16.msra.mxu1 %v5533_v55 }
 0xab6   : > { %v2909_v42 = vpop.permute.xlu1 %2908 }
 0xaba   : > { %5037 = vmatmul.mubr.msk.bf16.gmra.mrb[52].mxu1 %vm612_vm1, %v2698_v12 }
 0xad6   : > { %5499 = vset.pattern.permute.xlu0 %v7798_v29 }
 0xb21   : > { %v2875_v30 = vpop.trf.xlu0 }
 0xb22   : > { %v2914_v39 = vrot.slane %v2875_v30, %v6283_v61 }
 0xb24   : > { %v2918_v29 = vadd.f32 %v2914_v39, %v2909_v42  ;;  %v2915_v23 = vadd.f32 %v2914_v39, %v2894_v6  ;;  %v2916_v7 = vadd.f32 %v2914_v39, %v2899_v14  ;;  %v2917_v52 = vadd.f32 %v2914_v39, %v2904_v11 }
 0xb26   : > { %vm2922_vm8 = vcmp.gt.f32.partialorder %v2918_v29, 0.0  ;;  %v2926_v19 = vmul.f32 0.2, %v2918_v29  ;;  %vm2919_vm12 = vcmp.gt.f32.partialorder %v2915_v23, 0.0  ;;  %v2923_v0 = vmul.f32 0.2, %v2915_v23 }
 0xb27   : > { %vm2920_vm4 = vcmp.gt.f32.partialorder %v2916_v7, 0.0  ;;  %v2924_v54 = vmul.f32 0.2, %v2916_v7  ;;  %v2925_v32 = vmul.f32 0.2, %v2917_v52  ;;  %vm2921_vm15 = vcmp.gt.f32.partialorder %v2917_v52, 0.0 }
 0xb28   : > { %v2930_v13 = vsel %vm2922_vm8, %v2918_v29, %v2926_v19  ;;  %v2927_v9 = vsel %vm2919_vm12, %v2915_v23, %v2923_v0 }
 0xb29   : > { %v2934_v45 = vsel %vm827_vm9, %v2930_v13, -1e+30  ;;  %v2931_v5 = vsel %vm824_vm2, %v2927_v9, -1e+30  ;;  %v2928_v12 = vsel %vm2920_vm4, %v2916_v7, %v2924_v54  ;;  %v2929_v14 = vsel %vm2921_vm15, %v2917_v52, %v2925_v32 }
 0xb2a   : > { %v2944_v26 = vsel %vm612_vm1, %v2934_v45, -inf  ;;  %v2935_v55 = vsel %vm612_vm1, %v2931_v5, -inf  ;;  %v2932_v6 = vsel %vm825_vm5, %v2928_v12, -1e+30  ;;  %v2933_v30 = vsel %vm826_vm7, %v2929_v14, -1e+30 }
 0xb2b   : > { %2945 = vmax.xlane.f32.xlu0 %v2944_v26  ;;  %2936 = vmax.xlane.f32.xlu1 %v2935_v55  ;;  %v2938_v11 = vsel %vm612_vm1, %v2932_v6, -inf  ;;  %v2941_v1 = vsel %vm612_vm1, %v2933_v30, -inf }
 0xb2f   : > { %2939 = vmax.xlane.f32.xlu1 %v2938_v11 }
 0xb33   : > { %2942 = vmax.xlane.f32.xlu1 %v2941_v1 }
 0xb44   : > { %3338 = vrot.lane.b32.xlu1 %v6965_v48, %s5913_s16 }
 0xb48   : > { %3340 = vrot.lane.b32.xlu1 %v6972_v18, %s5913_s16 }
 0xb4c   : > { %3342 = vrot.lane.b32.xlu1 %v6979_v8, %s5913_s16 }
 0xb50   : > { %3344 = vrot.lane.b32.xlu1 %v6986_v27, %s5913_s16 }
 0xb54   : > { %3383 = vperm.xlu1 %5498, %v6988_v22  }
 0xb58   : > { %3387 = vperm.xlu1 %5498, %v6992_v47  }
 0xb5c   : > { %3395 = vperm.xlu1 %5498, %v7000_v63  }
 0xb60   : > { %5500 = vset.pattern.permute.xlu1 %v7804_v3 }
 0xb61   : > { %3596 = vperm.xlu1 %5500, %v6988_v22  }
 0xb65   : > { %3604 = vperm.xlu1 %5500, %v6996_v40  }
 0xb85   : > { %v7073_v48 = vpop.f32.mrb[48].mxu1 }
 0xb86   : > { %v7075_v18 = vpop.f32.mrb[49].mxu1 }
 0xb87   : > { %v7077_v8 = vpop.f32.mrb[50].mxu1  ;;  %3551 = vrot.lane.b32.xlu0 %v7075_v18, %s5915_s22 }
 0xb88   : > { %v7083_v39 = vpop.f32.mrb[51].mxu1 }
 0xb89   : > { %3553 = vrot.lane.b32.xlu1 %v7083_v39, %s5915_s22  ;;  %v7089_v42 = vpack.c.bf16 %v7083_v39, %v7075_v18 }
 0xb8b   : > { %5373 = vmatprep.subr.bf16.mxu1 %v7089_v42  ;;  %3391 = vperm.xlu0 %5499, %v6996_v40  }
 0xb8d   : > { %v7093_v29 = vpop.f32.mrb[52].mxu1 }
 0xb8e   : > { %v7095_v23 = vpop.f32.mrb[53].mxu1 }
 0xb8f   : > { %v7097_v7 = vpop.f32.mrb[54].mxu1  ;;  %5501 = vset.pattern.permute.xlu0 %v7804_v3  ;;  %3555 = vrot.lane.b32.xlu1 %v7095_v23, %s5915_s22 }
 0xb90   : > { %v7104_v19 = vpop.f32.mrb[55].mxu1  ;;  %3600 = vperm.xlu0 %5501, %v6992_v47  }
 0xb91   : > { %v7109_v0 = vpack.c.bf16 %v7104_v19, %v7095_v23 }
 0xb93   : > { %3557 = vrot.lane.b32.xlu1 %v7104_v19, %s5915_s22 }
 0xbb8   : > { %v2937_v54 = vpop.xlane.xlu1 %2936  ;;  %v2946_v12 = vpop.xlane.xlu0 %2945 }
 0xbb9   : > { %v2947_v13 = vsub.f32 %v2931_v5, %v2937_v54  ;;  %v2950_v14 = vsub.f32 %v2934_v45, %v2946_v12 }
 0xbbb   : > { %v2951_v9 = vmul.f32 1.442695, %v2947_v13  ;;  %v2957_v3 = vmul.f32 1.442695, %v2950_v14 }
 0xbbc   : > { %v2940_v32 = vpop.xlane.xlu1 %2939 }
 0xbbd   : > { %v2948_v26 = vsub.f32 %v2932_v6, %v2940_v32  ;;  %5648 = vpow2.f32 %v2951_v9  ;;  %v7805_v32 = vmov 39  }
 0xbbf   : > { %v2953_v55 = vmul.f32 1.442695, %v2948_v26 }
 0xbc0   : > { %v2943_v11 = vpop.xlane.xlu1 %2942 }
 0xbc1   : > { %5650 = vpow2.f32 %v2953_v55  ;;  %v2949_v20 = vsub.f32 %v2933_v30, %v2943_v11 }
 0xbc3   : > { %v2955_v1 = vmul.f32 1.442695, %v2949_v20 }
 0xbc4   : > { %v3339_v52 = vpop.permute.xlu1 %3338 }
 0xbc5   : > { %5652 = vpow2.f32 %v2955_v1  ;;  %3350 = vxpose.xlu0.b32.start [1/4] (short) (narrow) %v3339_v52, 8 }
 0xbc6   : > { %5654 = vpow2.f32 %v2957_v3 }
 0xbc7   : > { %v7113_v35 = vpop.eup %5648 }
 0xbc8   : > { %v3341_v27 = vpop.permute.xlu1 %3340  ;;  %v2959_v5 = vsel %vm612_vm1, %v7113_v35, 0.0 }
 0xbc9   : > { %3351 = vxpose.xlu0.b32.cont [2/4] (short) (narrow) %v3341_v27, 8  ;;  %2960 = vadd.xlane.f32.xlu1 %v2959_v5 }
 0xbcb   : > { %v7117_v6 = vpop.eup %5650 }
 0xbcc   : > { %v3343_v45 = vpop.permute.xlu1 %3342  ;;  %v2962_v30 = vsel %vm612_vm1, %v7117_v6, 0.0 }
 0xbcd   : > { %3352 = vxpose.xlu0.b32.cont [3/4] (short) (narrow) %v3343_v45, 8  ;;  %2963 = vadd.xlane.f32.xlu1 %v2962_v30 }
 0xbcf   : > { %v7121_v54 = vpop.eup %5652 }
 0xbd0   : > { %v3345_v52 = vpop.permute.xlu1 %3344  ;;  %v2965_v13 = vsel %vm612_vm1, %v7121_v54, 0.0  ;;  %v7125_v9 = vpop.eup %5654 }
 0xbd1   : > { %3353 = vxpose.xlu0.b32.end [4/4] (short) (narrow) %v3345_v52, 8  ;;  %2966 = vadd.xlane.f32.xlu1 %v2965_v13  ;;  %v2968_v27 = vsel %vm612_vm1, %v7125_v9, 0.0 }
 0xbd4   : > { %v3384_v12 = vpop.permute.xlu1 %3383 }
 0xbd5   : > { %2969 = vadd.xlane.f32.xlu1 %v2968_v27 }
 0xbd8   : > { %v3388_v26 = vpop.permute.xlu1 %3387 }
 0xbdc   : > { %v3396_v14 = vpop.permute.xlu1 %3395 }
 0xbe0   : > { %v7133_v20 = vpop.permute.xlu1 %3596 }
 0xbe4   : > { %v7137_v3 = vpop.permute.xlu1 %3604 }
 0xbe6   : > { %3608 = vperm.xlu1 %5500, %v7000_v63  }
 0xbf9   : > { %v7131_v55 = vpop.permute.xlu0 %3551 }
 0xbfa   : > { %5502 = vset.pattern.permute.xlu0 %v7805_v32 }
 0xbfb   : > { %v3554_v2 = vpop.permute.xlu1 %3553 }
 0xc01   : > { %v3556_v38 = vpop.permute.xlu1 %3555 }
 0xc0a   : > { %v3392_v11 = vpop.permute.xlu0 %3391 }
 0xc0f   : > { %v7135_v1 = vpop.permute.xlu0 %3600 }
 0xc45   : > { %v3366_v5 = vpop.trf.xlu0 }
 0xc46   : > { %v3401_v45 = vrot.slane %v3366_v5, %v6283_v61 }
 0xc48   : > { %v3402_v30 = vadd.f32 %v3401_v45, %v3384_v12  ;;  %v3403_v52 = vadd.f32 %v3401_v45, %v3388_v26  ;;  %v3404_v13 = vadd.f32 %v3401_v45, %v3392_v11  ;;  %v3405_v27 = vadd.f32 %v3401_v45, %v3396_v14 }
 0xc4a   : > { %vm3406_vm2 = vcmp.gt.f32.partialorder %v3402_v30, 0.0  ;;  %v3410_v44 = vmul.f32 0.2, %v3402_v30  ;;  %vm3407_vm5 = vcmp.gt.f32.partialorder %v3403_v52, 0.0  ;;  %v3411_v60 = vmul.f32 0.2, %v3403_v52 }
 0xc4b   : > { %vm3408_vm7 = vcmp.gt.f32.partialorder %v3404_v13, 0.0  ;;  %v3412_v51 = vmul.f32 0.2, %v3404_v13  ;;  %v3413_v53 = vmul.f32 0.2, %v3405_v27  ;;  %vm3409_vm9 = vcmp.gt.f32.partialorder %v3405_v27, 0.0 }
 0xc4c   : > { %v3414_v46 = vsel %vm3406_vm2, %v3402_v30, %v3410_v44  ;;  %v3415_v31 = vsel %vm3407_vm5, %v3403_v52, %v3411_v60  ;;  %v3558_v60 = vpop.permute.xlu1 %3557 }
 0xc4d   : > { %v7142_v41 = vsel %vm1314_vm11, %v3414_v46, -1e+30  ;;  %v7146_v12 = vsel %vm1315_vm10, %v3415_v31, -1e+30  ;;  %v3416_v26 = vsel %vm3408_vm7, %v3404_v13, %v3412_v51  ;;  %v3417_v25 = vsel %vm3409_vm9, %v3405_v27, %v3413_v53 }
 0xc4e   : > { %v3422_v14 = vsel %vm612_vm1, %v7142_v41, -inf  ;;  %v3425_v11 = vsel %vm612_vm1, %v7146_v12, -inf  ;;  %v3420_v44 = vsel %vm1316_vm3, %v3416_v26, -1e+30  ;;  %vm7807_vm10 = vcmp.gt.f32.partialorder %v7806_v24, 0.0  ;;  %v5764_v26 = vld [vmem:[%s6150_s23] sm:$0xff] }
 0xc4f   : > { %3423 = vmax.xlane.f32.xlu0 %v3422_v14  ;;  %3426 = vmax.xlane.f32.xlu1 %v3425_v11  ;;  %v3428_v46 = vsel %vm612_vm1, %v3420_v44, -inf  ;;  %v3421_v31 = vsel %vm7807_vm10, %v3417_v25, -1e+30  ;;  %v5765_v11 = vld [vmem:[%s6150_s23 + $0x8] sm:$0xff] }
 0xc50   : > { %v3431_v51 = vsel %vm612_vm1, %v3421_v31, -inf }
 0xc53   : > { %3429 = vmax.xlane.f32.xlu0 %v3428_v46 }
 0xc56   : > { %v2961_v5 = vpop.xlane.xlu1 %2960 }
 0xc57   : > { %3432 = vmax.xlane.f32.xlu0 %v3431_v51  ;;  %5656 = vrcp.f32 %v2961_v5 }
 0xc5a   : > { %v2964_v45 = vpop.xlane.xlu1 %2963 }
 0xc5b   : > { %5658 = vrcp.f32 %v2964_v45 }
 0xc5e   : > { %v2967_v30 = vpop.xlane.xlu1 %2966 }
 0xc5f   : > { %5660 = vrcp.f32 %v2967_v30  ;;  %v5766_v30 = vld [vmem:[%s6150_s23 + $0x10] sm:$0xff] }
 0xc61   : > { %v5657_v59 = vpop.eup %5656 }
 0xc62   : > { %v2970_v53 = vpop.xlane.xlu1 %2969  ;;  %v2972_v52 = vmul.f32 %v5657_v59, %v7113_v35 }
 0xc63   : > { %5662 = vrcp.f32 %v2970_v53 }
 0xc64   : > { %v2979_v14 = vmul.f32 %v5764_v26, %v2972_v52 }
 0xc65   : > { %v5659_v13 = vpop.eup %5658 }
 0xc66   : > { %v2974_v27 = vmul.f32 %v5659_v13, %v7117_v6  ;;  %v5534_v6 = vld [vmem:[%s7713_s5 + $0x30] sm:$0xff]  }
 0xc67   : > { %5317 = vmatprep.subr.bf16.mxu0 %v5534_v6 }
 0xc68   : > { %v2980_v25 = vmul.f32 %v5765_v11, %v2974_v27 }
 0xc69   : > { %v5661_v46 = vpop.eup %5660 }
 0xc6a   : > { %v2983_v24 = vpack.c.bf16 %v2980_v25, %v2979_v14  ;;  %v2976_v51 = vmul.f32 %v5661_v46, %v7121_v54  ;;  %v3609_v54 = vpop.permute.xlu1 %3608 }
 0xc6c   : > { %5313 = vmatprep.mubr.msk.bf16.mxu0 %vm612_vm1, %v2983_v24  ;;  %v2981_v53 = vmul.f32 %v5766_v30, %v2976_v51 }
 0xc6d   : > { %v5663_v5 = vpop.eup %5662 }
 0xc6e   : > { %v2978_v45 = vmul.f32 %v5663_v5, %v7125_v9 }
 0xc70   : > { %v2982_v35 = vmul.f32 %v5767_v28, %v2978_v45  ;;  %v5535_v28 = vld [vmem:[%s7713_s5 + $0x38] sm:$0xff]  }
 0xc72   : > { %v2984_v59 = vpack.c.bf16 %v2982_v35, %v2981_v53 }
 0xc74   : > { %5314 = vmatmul.mubr.msk.bf16.vlgmr.msra.gmra.mrb[36].mxu0 %vm612_vm1, %v2984_v59 }
 0xc75   : > { %5318 = vmatpush3.bf16.msra.mxu0 %v5534_v6  ;;  %v7808_v6 = vld [vmem:[#allocation20_spill] sm:$0xff] }
 0xc76   : > { %5319 = vmatprep.subr.bf16.mxu0 %v5535_v28  ;;  %vm7809_vm6 = vcmp.gt.f32.partialorder %v7808_v6, 0.0 }
 0xc79   : > { %5320 = vmatpush3.bf16.msra.mxu0 %v5535_v28 }
 0xc82   : > { %3563 = vxpose.xlu1.b32.start [1/4] (short) (narrow) %v7131_v55, 8 }
 0xc86   : > { %3564 = vxpose.xlu1.b32.cont [2/4] (short) (narrow) %v3554_v2, 8  ;;  %v7179_v2 = vld [vmem:[%s7715_s7 + $0x30] sm:$0xff]  }
 0xc87   : > { %5325 = vmatprep.subr.bf16.mxu0 %v7179_v2 }
 0xc8a   : > { %3565 = vxpose.xlu1.b32.cont [3/4] (short) (narrow) %v3556_v38, 8 }
 0xc8e   : > { %3566 = vxpose.xlu1.b32.end [4/4] (short) (narrow) %v3558_v60, 8 }
 0xcac   : > { %5503 = vset.pattern.permute.xlu1 %v7805_v32 }
 0xcdc   : > { %v3424_v38 = vpop.xlane.xlu0 %3423  ;;  %v3427_v55 = vpop.xlane.xlu1 %3426 }
 0xcdd   : > { %v3434_v60 = vsub.f32 %v7142_v41, %v3424_v38  ;;  %v3435_v52 = vsub.f32 %v7146_v12, %v3427_v55  ;;  %v7812_v55 = vld [vmem:[#allocation22_spill] sm:$0xff] }
 0xcde   : > { %vm7813_vm12 = vcmp.gt.f32.partialorder %v7812_v55, 0.0 }
 0xcdf   : > { %v3438_v26 = vmul.f32 1.442695, %v3434_v60  ;;  %v3440_v14 = vmul.f32 1.442695, %v3435_v52  ;;  %v7814_v52 = vld [vmem:[#allocation23_spill] sm:$0xff] }
 0xce0   : > { %v3430_v9 = vpop.xlane.xlu0 %3429  ;;  %vm7815_vm4 = vcmp.gt.f32.partialorder %v7814_v52, 0.0 }
 0xce1   : > { %v3436_v27 = vsub.f32 %v3420_v44, %v3430_v9  ;;  %5664 = vpow2.f32 %v3438_v26 }
 0xce2   : > { %5666 = vpow2.f32 %v3440_v14 }
 0xce3   : > { %v3442_v25 = vmul.f32 1.442695, %v3436_v27 }
 0xce4   : > { %v3433_v13 = vpop.xlane.xlu0 %3432 }
 0xce5   : > { %v3437_v11 = vsub.f32 %v3421_v31, %v3433_v13  ;;  %5668 = vpow2.f32 %v3442_v25 }
 0xce7   : > { %v3444_v51 = vmul.f32 1.442695, %v3437_v11 }
 0xce9   : > { %5670 = vpow2.f32 %v3444_v51 }
 0xceb   : > { %v7208_v27 = vpop.eup %5664 }
 0xcec   : > { %v7210_v26 = vpop.eup %5666  ;;  %v3446_v51 = vsel %vm612_vm1, %v7208_v27, 0.0 }
 0xcef   : > { %v7216_v25 = vpop.eup %5668 }
 0xd02   : > { %v3579_v46 = vpop.trf.xlu1 }
 0xd03   : > { %v3614_v24 = vrot.slane %v3579_v46, %v6283_v61  ;;  %v7218_v46 = vpop.eup %5670 }
 0xd05   : > { %v3616_v5 = vadd.f32 %v3614_v24, %v7135_v1  ;;  %v3615_v45 = vadd.f32 %v3614_v24, %v7133_v20  ;;  %v3618_v30 = vadd.f32 %v3614_v24, %v3609_v54  ;;  %v3617_v41 = vadd.f32 %v3614_v24, %v7137_v3  ;;  %v7810_v20 = vld [vmem:[#allocation21_spill] sm:$0xff] }
 0xd06   : > { %vm7811_vm8 = vcmp.gt.f32.partialorder %v7810_v20, 0.0  ;;  %v3449_v24 = vsel %vm612_vm1, %v7210_v26, 0.0 }
 0xd07   : > { %vm3620_vm11 = vcmp.gt.f32.partialorder %v3616_v5, 0.0  ;;  %v3624_v12 = vmul.f32 0.2, %v3616_v5  ;;  %vm3619_vm3 = vcmp.gt.f32.partialorder %v3615_v45, 0.0  ;;  %v3623_v44 = vmul.f32 0.2, %v3615_v45 }
 0xd08   : > { %vm3622_vm13 = vcmp.gt.f32.partialorder %v3618_v30, 0.0  ;;  %v3626_v31 = vmul.f32 0.2, %v3618_v30  ;;  %vm3621_vm0 = vcmp.gt.f32.partialorder %v3617_v41, 0.0  ;;  %v3625_v53 = vmul.f32 0.2, %v3617_v41 }
 0xd09   : > { %v3628_v35 = vsel %vm3620_vm11, %v3616_v5, %v3624_v12  ;;  %v3627_v59 = vsel %vm3619_vm3, %v3615_v45, %v3623_v44  ;;  %v3455_v5 = vsel %vm612_vm1, %v7218_v46, 0.0  ;;  %v3452_v45 = vsel %vm612_vm1, %v7216_v25, 0.0 }
 0xd0a   : > { %v7190_v1 = vsel %vm7809_vm6, %v3628_v35, -1e+30  ;;  %v7194_v28 = vsel %vm7811_vm8, %v3627_v59, -1e+30  ;;  %v3630_v3 = vsel %vm3622_vm13, %v3618_v30, %v3626_v31  ;;  %v3629_v38 = vsel %vm3621_vm0, %v3617_v41, %v3625_v53 }
 0xd0b   : > { %v3638_v54 = vsel %vm612_vm1, %v7190_v1, -inf  ;;  %v3635_v9 = vsel %vm612_vm1, %v7194_v28, -inf  ;;  %v7202_v60 = vsel %vm7813_vm12, %v3630_v3, -1e+30  ;;  %v7206_v13 = vsel %vm7815_vm4, %v3629_v38, -1e+30 }
 0xd0c   : > { %3639 = vmax.xlane.f32.xlu0 %v3638_v54  ;;  %3636 = vmax.xlane.f32.xlu1 %v3635_v9  ;;  %v3644_v14 = vsel %vm612_vm1, %v7202_v60, -inf  ;;  %v3641_v11 = vsel %vm612_vm1, %v7206_v13, -inf  ;;  %v7816_v30 = vpack.c.bf16 %v6968_v58, %v6963_v43  ;;  %v7817_v41 = vpack.c.bf16 %v7077_v8, %v7073_v48  ;;  %v5039_v43 = vld [vmem:[%s6143_s19 + $0x5] ss:$0 sm:$0xff] }
 0xd0d   : > { %v7818_v12 = vpack.c.bf16 %v6982_v56, %v6977_v50  ;;  %v7819_v44 = vpack.c.bf16 %v7097_v7, %v7093_v29  ;;  %vm7821_vm4 = vcmp.gt.f32.partialorder %v6633_v57, 0.0 }
 0xd10   : > { %3645 = vmax.xlane.f32.xlu0 %v3644_v14  ;;  %3642 = vmax.xlane.f32.xlu1 %v3641_v11 }
 0xd14   : > { %3450 = vadd.xlane.f32.xlu0 %v3449_v24  ;;  %3447 = vadd.xlane.f32.xlu1 %v3446_v51  ;;  %v5537_v24 = vld [vmem:[%s7715_s7 + $0x38] sm:$0xff]  }
 0xd18   : > { %3456 = vadd.xlane.f32.xlu0 %v3455_v5  ;;  %3453 = vadd.xlane.f32.xlu1 %v3452_v45 }
 0xd29   : > { %3482 = vrot.lane.b32.xlu1 %v7816_v30, %s5912_s0 }
 0xd2d   : > { %3695 = vrot.lane.b32.xlu1 %v7817_v41, %s5918_s3 }
 0xd2e   : > { %3484 = vrot.lane.b32.xlu0 %v7818_v12, %s5912_s0 }
 0xd31   : > { %3697 = vrot.lane.b32.xlu1 %v7819_v44, %s5918_s3 }
 0xd32   : > { %4058 = vrot.lane.b32.xlu0 %v6988_v22, %s5919_s18 }
 0xd35   : > { %4267 = vrot.lane.b32.xlu1 %v7075_v18, %s5920_s10 }
 0xd36   : > { %4060 = vrot.lane.b32.xlu0 %v6992_v47, %s5919_s18 }
 0xd39   : > { %4269 = vrot.lane.b32.xlu1 %v7083_v39, %s5920_s10 }
 0xd3a   : > { %4062 = vrot.lane.b32.xlu0 %v6996_v40, %s5919_s18 }
 0xd3d   : > { %4271 = vrot.lane.b32.xlu1 %v7095_v23, %s5920_s10 }
 0xd47   : > { %v5315_v58 = vpop.f32.mrb[36].mxu0 }
 0xd48   : > { %v3042_v50 = vadd.f32 %v5315_v58, %v5039_v43  ;;  %v3033_v56 = vpop.f32.mrb[37].mxu0 }
 0xd49   : > { %v3034_v22 = vadd.f32 %v5039_v43, %v3033_v56  ;;  %v5316_v48 = vpop.f32.mrb[38].mxu0 }
 0xd4a   : > { %v3050_v8 = vmul.f32 %v3042_v50, %v3042_v50  ;;  %v3045_v29 = vadd.f32 %v5316_v48, %v5039_v43  ;;  %v3036_v7 = vpop.f32.mrb[39].mxu0 }
 0xd4b   : > { %v3048_v31 = vmul.f32 %v3034_v22, %v3034_v22  ;;  %v3037_v47 = vadd.f32 %v5039_v43, %v3036_v7 }
 0xd4c   : > { %v3054_v53 = vsub.f32 %v3050_v8, %v3050_v8  ;;  %v3051_v35 = vmul.f32 %v3045_v29, %v3045_v29  ;;  %v3155_v59 = vpack.c.bf16 %v3045_v29, %v3042_v50 }
 0xd4d   : > { %v3052_v6 = vsub.f32 %v3048_v31, %v3048_v31  ;;  %v3049_v20 = vmul.f32 %v3037_v47, %v3037_v47  ;;  %v3154_v40 = vpack.c.bf16 %v3037_v47, %v3034_v22 }
 0xd4e   : > { %v3055_v3 = vsub.f32 %v3051_v35, %v3051_v35  ;;  %v3058_v54 = vmul.f32 0.5, %v3054_v53 }
 0xd4f   : > { %v3053_v38 = vsub.f32 %v3049_v20, %v3049_v20  ;;  %v3056_v55 = vmul.f32 0.5, %v3052_v6 }
 0xd50   : > { %v3059_v9 = vmul.f32 0.5, %v3055_v3 }
 0xd51   : > { %v3057_v52 = vmul.f32 0.5, %v3053_v38 }
 0xd52   : > { %v3061_v14 = vpack.c.bf16 %v3059_v9, %v3058_v54 }
 0xd53   : > { %v3060_v11 = vpack.c.bf16 %v3057_v52, %v3056_v55  ;;  %v5768_v52 = vld [vmem:[%s6150_s23 + $0x28] sm:$0xff] }
 0xd55   : > { %5321 = vmatprep.mubr.msk.bf16.mxu0 %vm612_vm1, %v3060_v11 }
 0xd56   : > { %5322 = vmatmul.mubr.msk.bf16.vlgmr.msra.gmra.mrb[40].mxu0 %vm612_vm1, %v3061_v14 }
 0xd57   : > { %5326 = vmatpush3.bf16.msra.mxu0 %v7179_v2  ;;  %5329 = vmatprep.mubr.msk.bf16.mxu0 %vm612_vm1, %v3154_v40 }
 0xd58   : > { %5327 = vmatprep.subr.bf16.mxu0 %v5537_v24 }
 0xd5b   : > { %5328 = vmatpush3.bf16.msra.mxu0 %v5537_v24  ;;  %v5769_v24 = vld [vmem:[%s6150_s23 + $0x20] sm:$0xff] }
 0xd5e   : > { %5330 = vmatmul.mubr.msk.bf16.vlgmr.msra.gmra.mrb[44].mxu0 %vm612_vm1, %v3155_v59 }
 0xd99   : > { %v3640_v51 = vpop.xlane.xlu0 %3639  ;;  %v3637_v5 = vpop.xlane.xlu1 %3636 }
 0xd9a   : > { %v3648_v45 = vsub.f32 %v7190_v1, %v3640_v51  ;;  %v3647_v30 = vsub.f32 %v7194_v28, %v3637_v5  ;;  %v5770_v5 = vld [vmem:[%s6150_s23 + $0x38] sm:$0xff] }
 0xd9c   : > { %v3653_v41 = vmul.f32 1.442695, %v3648_v45  ;;  %v3651_v12 = vmul.f32 1.442695, %v3647_v30  ;;  %v5771_v30 = vld [vmem:[%s6150_s23 + $0x30] sm:$0xff] }
 0xd9d   : > { %v3646_v44 = vpop.xlane.xlu0 %3645  ;;  %v3643_v43 = vpop.xlane.xlu1 %3642 }
 0xd9e   : > { %5672 = vpow2.f32 %v3653_v41  ;;  %v3650_v58 = vsub.f32 %v7202_v60, %v3646_v44  ;;  %v3649_v2 = vsub.f32 %v7206_v13, %v3643_v43 }
 0xd9f   : > { %5674 = vpow2.f32 %v3651_v12 }
 0xda0   : > { %v3657_v50 = vmul.f32 1.442695, %v3650_v58  ;;  %v3655_v56 = vmul.f32 1.442695, %v3649_v2 }
 0xda1   : > { %v3451_v22 = vpop.xlane.xlu0 %3450  ;;  %v3448_v48 = vpop.xlane.xlu1 %3447 }
 0xda2   : > { %5676 = vpow2.f32 %v3657_v50 }
 0xda3   : > { %5678 = vpow2.f32 %v3655_v56 }
 0xda4   : > { %5680 = vrcp.f32 %v3451_v22 }
 0xda5   : > { %5682 = vrcp.f32 %v3448_v48  ;;  %v3457_v1 = vpop.xlane.xlu0 %3456  ;;  %v3454_v28 = vpop.xlane.xlu1 %3453 }
 0xda6   : > { %5684 = vrcp.f32 %v3457_v1 }
 0xda7   : > { %5686 = vrcp.f32 %v3454_v28  ;;  %v5057_v28 = vld [vmem:[%s7716_s8 + $0x3] ss:$0 sm:$0xff] }
 0xda8   : > { %v7269_v8 = vpop.eup %5672 }
 0xda9   : > { %v7271_v29 = vpop.eup %5674  ;;  %v3483_v60 = vpop.permute.xlu1 %3482  ;;  %v3662_v13 = vsel %vm612_vm1, %v7269_v8, 0.0 }
 0xdaa   : > { %3663 = vadd.xlane.f32.xlu0 %v3662_v13  ;;  %v3659_v7 = vsel %vm612_vm1, %v7271_v29, 0.0  ;;  %5333 = vmatprep.subr.bf16.mxu0 %v3483_v60  ;;  %v3485_v31 = vpop.permute.xlu0 %3484 }
 0xdab   : > { %3660 = vadd.xlane.f32.xlu1 %v3659_v7  ;;  %5334 = vmatpush3.bf16.msra.mxu0 %v3483_v60 }
 0xdac   : > { %v7277_v47 = vpop.eup %5676  ;;  %5335 = vmatprep.subr.bf16.mxu0 %v3485_v31 }
 0xdad   : > { %v7279_v53 = vpop.eup %5678  ;;  %v3668_v35 = vsel %vm612_vm1, %v7277_v47, 0.0  ;;  %v3696_v40 = vpop.permute.xlu1 %3695 }
 0xdae   : > { %v5681_v59 = vpop.eup %5680  ;;  %3669 = vadd.xlane.f32.xlu0 %v3668_v35  ;;  %v3665_v6 = vsel %vm612_vm1, %v7279_v53, 0.0 }
 0xdaf   : > { %v5683_v20 = vpop.eup %5682  ;;  %3666 = vadd.xlane.f32.xlu1 %v3665_v6  ;;  %5336 = vmatpush3.bf16.msra.mxu0 %v3485_v31  ;;  %v3461_v3 = vmul.f32 %v5681_v59, %v7210_v26 }
 0xdb0   : > { %v5685_v38 = vpop.eup %5684  ;;  %5341 = vmatprep.subr.bf16.mxu0 %v3696_v40  ;;  %v3459_v54 = vmul.f32 %v5683_v20, %v7208_v27 }
 0xdb1   : > { %v5687_v9 = vpop.eup %5686  ;;  %v3465_v55 = vmul.f32 %v5685_v38, %v7218_v46  ;;  %v3467_v14 = vmul.f32 %v5768_v52, %v3461_v3  ;;  %v3698_v27 = vpop.permute.xlu1 %3697 }
 0xdb2   : > { %v3463_v11 = vmul.f32 %v5687_v9, %v7216_v25  ;;  %v3466_v51 = vmul.f32 %v5769_v24, %v3459_v54  ;;  %v7820_v25 = vmov 41  }
 0xdb3   : > { %v3469_v45 = vmul.f32 %v5770_v5, %v3465_v55 }
 0xdb4   : > { %v3468_v41 = vmul.f32 %v5771_v30, %v3463_v11  ;;  %v3470_v12 = vpack.c.bf16 %v3467_v14, %v3466_v51 }
 0xdb5   : > { %v4268_v44 = vpop.permute.xlu1 %4267 }
 0xdb6   : > { %5337 = vmatprep.mubr.msk.bf16.mxu0 %vm612_vm1, %v3470_v12  ;;  %v3471_v26 = vpack.c.bf16 %v3469_v45, %v3468_v41 }
 0xdb8   : > { %5338 = vmatmul.mubr.msk.bf16.vlgmr.msra.gmra.mrb[48].mxu0 %vm612_vm1, %v3471_v26 }
 0xdb9   : > { %5342 = vmatpush3.bf16.msra.mxu0 %v3696_v40 }
 0xdba   : > { %5343 = vmatprep.subr.bf16.mxu0 %v3698_v27 }
 0xdbd   : > { %5344 = vmatpush3.bf16.msra.mxu0 %v3698_v27 }
 0xdc0   : > { %4273 = vrot.lane.b32.xlu1 %v7104_v19, %s5920_s10 }
 0xdc4   : > { %4107 = vperm.xlu1 %5503, %v7083_v39   ;;  %4064 = vrot.lane.b32.xlu0 %v7000_v63, %s5919_s18  ;;  %v4059_v63 = vpop.permute.xlu0 %4058  ;;  %s5062_s18 = sld [smem:[#allocation3 + $0x3]] }
 0xdc8   : > { %5504 = vset.pattern.permute.xlu1 %v7820_v25  ;;  %4103 = vperm.xlu0 %5502, %v7075_v18   ;;  %v4061_v46 = vpop.permute.xlu0 %4060 }
 0xdc9   : > { %4312 = vperm.xlu1 %5504, %v7075_v18  }
 0xdca   : > { %v3253_v60 = vstv %s5062_s18  ;;  %s5126_s18 = sld [smem:[#allocation3 + $0x5]] }
 0xdcb   : > { %v3256_v6 = vmul.f32 %v3253_v60, %v6922_v17  ;;  %v3254_v20 = vmul.f32 %v3253_v60, %v6912_v34 }
 0xdcc   : > { %5505 = vset.pattern.permute.xlu0 %v7820_v25  ;;  %v4063_v18 = vpop.permute.xlu0 %4062 }
 0xdcd   : > { %5506 = vset.pattern.permute.xlu1 %v7805_v32  ;;  %4316 = vperm.xlu0 %5505, %v7083_v39   ;;  %v4270_v32 = vpop.permute.xlu1 %4269 }
 0xdce   : > { %4111 = vperm.xlu1 %5506, %v7095_v23  }
 0xdd1   : > { %4320 = vperm.xlu0 %5505, %v7095_v23   ;;  %v4272_v39 = vpop.permute.xlu1 %4271  ;;  %v5047_v23 = vld [vmem:[%s7714_s6 + $0x3] ss:$0 sm:$0xff] }
 0xdd2   : > { %4115 = vperm.xlu1 %5506, %v7104_v19  }
 0xdd6   : > { %5507 = vset.pattern.permute.xlu1 %v7820_v25 }
 0xdd7   : > { %4324 = vperm.xlu1 %5507, %v7104_v19  }
 0xdef   : > { %4070 = vxpose.xlu0.b32.start [1/4] (short) (narrow) %v4059_v63, 8 }
 0xdf3   : > { %4071 = vxpose.xlu0.b32.cont [2/4] (short) (narrow) %v4061_v46, 8 }
 0xdf7   : > { %4072 = vxpose.xlu0.b32.cont [3/4] (short) (narrow) %v4063_v18, 8  ;;  %v3257_v18 = vmul.f32 %v3253_v60, %v6924_v21 }
 0xe00   : > { %4279 = vxpose.xlu1.b32.start [1/4] (short) (narrow) %v4268_v44, 8 }
 0xe04   : > { %4280 = vxpose.xlu1.b32.cont [2/4] (short) (narrow) %v4270_v32, 8 }
 0xe08   : > { %4281 = vxpose.xlu1.b32.cont [3/4] (short) (narrow) %v4272_v39, 8 }
 0xe29   : > { %v5323_v43 = vpop.f32.mrb[40].mxu0 }
 0xe2a   : > { %v3127_v58 = vpop.f32.mrb[41].mxu0  ;;  %v3136_v19 = vadd.f32 %v5323_v43, %v5047_v23  ;;  %v3255_v43 = vmul.f32 %v3253_v60, %v6914_v36 }
 0xe2b   : > { %v3128_v2 = vadd.f32 %v5047_v23, %v3127_v58  ;;  %v5324_v50 = vpop.f32.mrb[42].mxu0 }
 0xe2c   : > { %v3130_v56 = vpop.f32.mrb[43].mxu0  ;;  %v3139_v22 = vadd.f32 %v5324_v50, %v5047_v23  ;;  %v3148_v48 = vmul.f32 0.01, %v3136_v19  ;;  %vm3144_vm15 = vcmp.gt.f32.partialorder %v3136_v19, 0.0 }
 0xe2d   : > { %v3146_v1 = vmul.f32 0.01, %v3128_v2  ;;  %vm3142_vm2 = vcmp.gt.f32.partialorder %v3128_v2, 0.0  ;;  %v3131_v13 = vadd.f32 %v5047_v23, %v3130_v56 }
 0xe2e   : > { %v3149_v31 = vmul.f32 0.01, %v3139_v22  ;;  %v3152_v40 = vsel %vm3144_vm15, %v3136_v19, %v3148_v48  ;;  %vm3145_vm5 = vcmp.gt.f32.partialorder %v3139_v22, 0.0  ;;  %vm7822_vm15 = vcmp.gt.f32.partialorder %v6636_v62, 0.0 }
 0xe2f   : > { %v3150_v3 = vsel %vm3142_vm2, %v3128_v2, %v3146_v1  ;;  %vm3143_vm7 = vcmp.gt.f32.partialorder %v3131_v13, 0.0  ;;  %v3147_v14 = vmul.f32 0.01, %v3131_v13  ;;  %v5772_v1 = vld [vmem:[%s6150_s23 + $0x68] sm:$0xff]  ;;  %vm7823_vm2 = vcmp.gt.f32.partialorder %v6639_v4, 0.0 }
 0xe30   : > { %v3153_v51 = vsel %vm3145_vm5, %v3139_v22, %v3149_v31 }
 0xe31   : > { %v5331_v7 = vpop.f32.mrb[44].mxu0  ;;  %v3151_v25 = vsel %vm3143_vm7, %v3131_v13, %v3147_v14  ;;  %v5773_v13 = vld [vmem:[%s6150_s23 + $0x60] sm:$0xff] }
 0xe32   : > { %v3230_v35 = vadd.f32 %v5331_v7, %v5057_v28  ;;  %v3221_v59 = vpop.f32.mrb[45].mxu0 }
 0xe33   : > { %v3222_v38 = vadd.f32 %v5057_v28, %v3221_v59  ;;  %v5332_v54 = vpop.f32.mrb[46].mxu0 }
 0xe34   : > { %vm3238_vm9 = vcmp.gt.f32.partialorder %v3230_v35, 0.0  ;;  %v3242_v9 = vmul.f32 0.01, %v3230_v35  ;;  %v3233_v55 = vadd.f32 %v5332_v54, %v5057_v28  ;;  %v3224_v52 = vpop.f32.mrb[47].mxu0 }
 0xe35   : > { %vm3236_vm10 = vcmp.gt.f32.partialorder %v3222_v38, 0.0  ;;  %v3240_v11 = vmul.f32 0.01, %v3222_v38  ;;  %v3225_v24 = vadd.f32 %v5057_v28, %v3224_v52 }
 0xe36   : > { %v3246_v5 = vsel %vm3238_vm9, %v3230_v35, %v3242_v9  ;;  %vm3239_vm11 = vcmp.gt.f32.partialorder %v3233_v55, 0.0  ;;  %v3243_v17 = vmul.f32 0.01, %v3233_v55  ;;  %vm7825_vm9 = vcmp.gt.f32.partialorder %v6629_v16, 0.0 }
 0xe37   : > { %v3664_v45 = vpop.xlane.xlu0 %3663  ;;  %v3244_v34 = vsel %vm3236_vm10, %v3222_v38, %v3240_v11  ;;  %vm3237_vm3 = vcmp.gt.f32.partialorder %v3225_v24, 0.0  ;;  %v3241_v30 = vmul.f32 0.01, %v3225_v24  ;;  %v3250_v26 = vadd.f32 %v3246_v5, %v3152_v40  ;;  %v5539_v5 = vld [vmem:[%s7713_s5 + $0x48] sm:$0xff]  }
 0xe38   : > { %5688 = vrcp.f32 %v3664_v45  ;;  %v3661_v41 = vpop.xlane.xlu1 %3660  ;;  %v3247_v12 = vsel %vm3239_vm11, %v3233_v55, %v3243_v17  ;;  %v3248_v27 = vadd.f32 %v3244_v34, %v3150_v3  ;;  %v5775_v3 = vld [vmem:[%s6150_s23 + $0x70] sm:$0xff]  ;;  %vm7826_vm11 = vcmp.gt.f32.partialorder %v6647_v15, 0.0 }
 0xe39   : > { %5690 = vrcp.f32 %v3661_v41  ;;  %v3245_v63 = vsel %vm3237_vm3, %v3225_v24, %v3241_v30  ;;  %v3251_v46 = vadd.f32 %v3247_v12, %v3153_v51  ;;  %v7321_v32 = vadd.f32 %v3256_v6, %v3250_v26  ;;  %v5538_v51 = vld [vmem:[%s7713_s5 + $0x40] sm:$0xff]  }
 0xe3a   : > { %v7323_v39 = vadd.f32 %v3254_v20, %v3248_v27  ;;  %v3249_v23 = vadd.f32 %v3245_v63, %v3151_v25  ;;  %v5774_v20 = vld [vmem:[%s6150_s23 + $0x78] sm:$0xff]  ;;  %5349 = vmatprep.subr.bf16.mxu0 %v5538_v51  ;;  %vm7827_vm3 = vcmp.gt.f32.partialorder %v6675_v10, 0.0 }
 0xe3b   : > { %v3670_v44 = vpop.xlane.xlu0 %3669  ;;  %v7326_v19 = vadd.f32 %v3257_v18, %v3251_v46 }
 0xe3c   : > { %5692 = vrcp.f32 %v3670_v44  ;;  %v3667_v58 = vpop.xlane.xlu1 %3666  ;;  %v7328_v2 = vadd.f32 %v3255_v43, %v3249_v23 }
 0xe3d   : > { %5694 = vrcp.f32 %v3667_v58 }
 0xe3f   : > { %v4065_v50 = vpop.permute.xlu0 %4064 }
 0xe40   : > { %v4274_v56 = vpop.permute.xlu1 %4273  ;;  %4073 = vxpose.xlu0.b32.end [4/4] (short) (narrow) %v4065_v50, 8 }
 0xe41   : > { %4282 = vxpose.xlu1.b32.end [4/4] (short) (narrow) %v4274_v56, 8 }
 0xe42   : > { %v5689_v21 = vpop.eup %5688 }
 0xe43   : > { %v5691_v22 = vpop.eup %5690  ;;  %v3674_v48 = vmul.f32 %v5689_v21, %v7269_v8 }
 0xe44   : > { %v3672_v36 = vmul.f32 %v5691_v22, %v7271_v29 }
 0xe45   : > { %v3680_v28 = vmul.f32 %v5772_v1, %v3674_v48 }
 0xe46   : > { %v5693_v60 = vpop.eup %5692  ;;  %v3679_v7 = vmul.f32 %v5773_v13, %v3672_v36 }
 0xe47   : > { %v5695_v31 = vpop.eup %5694  ;;  %v3678_v35 = vmul.f32 %v5693_v60, %v7277_v47  ;;  %v4108_v47 = vpop.permute.xlu1 %4107 }
 0xe48   : > { %v3676_v59 = vmul.f32 %v5695_v31, %v7279_v53  ;;  %v3683_v6 = vpack.c.bf16 %v3680_v28, %v3679_v7  ;;  %v4104_v52 = vpop.permute.xlu0 %4103 }
 0xe49   : > { %v3682_v40 = vmul.f32 %v5774_v20, %v3678_v35 }
 0xe4a   : > { %v3681_v38 = vmul.f32 %v5775_v3, %v3676_v59  ;;  %5345 = vmatprep.mubr.msk.bf16.mxu0 %vm612_vm1, %v3683_v6 }
 0xe4b   : > { %v4313_v53 = vpop.permute.xlu1 %4312 }
 0xe4c   : > { %v3684_v8 = vpack.c.bf16 %v3682_v40, %v3681_v38  ;;  %v4317_v11 = vpop.permute.xlu0 %4316 }
 0xe4e   : > { %5346 = vmatmul.mubr.msk.bf16.vlgmr.msra.gmra.mrb[52].mxu0 %vm612_vm1, %v3684_v8 }
 0xe4f   : > { %v4112_v14 = vpop.permute.xlu1 %4111  ;;  %5350 = vmatpush3.bf16.msra.mxu0 %v5538_v51 }
 0xe50   : > { %v4321_v17 = vpop.permute.xlu0 %4320  ;;  %5351 = vmatprep.subr.bf16.mxu0 %v5539_v5 }
 0xe53   : > { %v4116_v24 = vpop.permute.xlu1 %4115  ;;  %5352 = vmatpush3.bf16.msra.mxu0 %v5539_v5 }
 0xe57   : > { %v4325_v45 = vpop.permute.xlu1 %4324 }
 0xe8b   : > { %v7340_v29 = vpop.f32.mrb[48].mxu0 }
 0xe8c   : > { %v7342_v54 = vpop.f32.mrb[49].mxu0 }
 0xe8d   : > { %v7344_v9 = vpop.f32.mrb[50].mxu0 }
 0xe8e   : > { %v7346_v55 = vpop.f32.mrb[51].mxu0 }
 0xeb4   : > { %v4086_v34 = vpop.trf.xlu0 }
 0xeb5   : > { %v4121_v30 = vrot.slane %v4086_v34, %v6283_v61  ;;  %v4295_v41 = vpop.trf.xlu1 }
 0xeb6   : > { %v4330_v12 = vrot.slane %v4295_v41, %v6283_v61 }
 0xeb7   : > { %v4122_v26 = vadd.f32 %v4121_v30, %v4104_v52  ;;  %v4123_v27 = vadd.f32 %v4121_v30, %v4108_v47  ;;  %v4124_v25 = vadd.f32 %v4121_v30, %v4112_v14  ;;  %v4125_v44 = vadd.f32 %v4121_v30, %v4116_v24  ;;  %v5067_v14 = vld [vmem:[%s6143_s19 + $0x6] ss:$0 sm:$0xff]  ;;  %v5071_v24 = vld [vmem:[%s6143_s19 + $0x8] ss:$0 sm:$0xff] }
 0xeb8   : > { %v4331_v63 = vadd.f32 %v4330_v12, %v4313_v53  ;;  %v4333_v46 = vadd.f32 %v4330_v12, %v4321_v17  ;;  %v4332_v18 = vadd.f32 %v4330_v12, %v4317_v11  ;;  %v4334_v31 = vadd.f32 %v4330_v12, %v4325_v45 }
 0xeb9   : > { %vm4126_vm13 = vcmp.gt.f32.partialorder %v4122_v26, 0.0  ;;  %v4130_v23 = vmul.f32 0.2, %v4122_v26  ;;  %vm4127_vm0 = vcmp.gt.f32.partialorder %v4123_v27, 0.0  ;;  %v4131_v43 = vmul.f32 0.2, %v4123_v27 }
 0xeba   : > { %vm4128_vm6 = vcmp.gt.f32.partialorder %v4124_v25, 0.0  ;;  %v4132_v58 = vmul.f32 0.2, %v4124_v25  ;;  %vm4335_vm8 = vcmp.gt.f32.partialorder %v4331_v63, 0.0  ;;  %v4339_v50 = vmul.f32 0.2, %v4331_v63 }
 0xebb   : > { %v4134_v56 = vsel %vm4126_vm13, %v4122_v26, %v4130_v23  ;;  %v4135_v21 = vsel %vm4127_vm0, %v4123_v27, %v4131_v43  ;;  %vm4337_vm12 = vcmp.gt.f32.partialorder %v4333_v46, 0.0  ;;  %v4341_v22 = vmul.f32 0.2, %v4333_v46 }
 0xebc   : > { %v7358_v61 = vsel %vm7821_vm4, %v4134_v56, -1e+30  ;;  %v7362_v48 = vsel %vm7822_vm15, %v4135_v21, -1e+30  ;;  %v4136_v36 = vsel %vm4128_vm6, %v4124_v25, %v4132_v58  ;;  %v4343_v1 = vsel %vm4335_vm8, %v4331_v63, %v4339_v50 }
 0xebd   : > { %v4142_v28 = vsel %vm612_vm1, %v7358_v61, -inf  ;;  %v4145_v60 = vsel %vm612_vm1, %v7362_v48, -inf  ;;  %v7370_v13 = vsel %vm2054_vm14, %v4136_v36, -1e+30  ;;  %v7374_v57 = vsel %vm7823_vm2, %v4343_v1, -1e+30 }
 0xebe   : > { %4143 = vmax.xlane.f32.xlu0 %v4142_v28  ;;  %4146 = vmax.xlane.f32.xlu1 %v4145_v60  ;;  %vm4336_vm5 = vcmp.gt.f32.partialorder %v4332_v18, 0.0  ;;  %v4345_v62 = vsel %vm4337_vm12, %v4333_v46, %v4341_v22  ;;  %v4340_v7 = vmul.f32 0.2, %v4332_v18  ;;  %vm4129_vm7 = vcmp.gt.f32.partialorder %v4125_v44, 0.0 }
 0xebf   : > { %v4133_v35 = vmul.f32 0.2, %v4125_v44  ;;  %v4148_v59 = vsel %vm612_vm1, %v7370_v13, -inf  ;;  %v4351_v6 = vsel %vm612_vm1, %v7374_v57, -inf  ;;  %vm7824_vm14 = vcmp.gt.f32.partialorder %v6678_v37, 0.0 }
 0xec0   : > { %v4344_v20 = vsel %vm4336_vm5, %v4332_v18, %v4340_v7  ;;  %v7382_v4 = vsel %vm7824_vm14, %v4345_v62, -1e+30  ;;  %v4342_v3 = vmul.f32 0.2, %v4334_v31  ;;  %vm4338_vm10 = vcmp.gt.f32.partialorder %v4334_v31, 0.0 }
 0xec1   : > { %v7386_v33 = vsel %vm7825_vm9, %v4344_v20, -1e+30  ;;  %v4137_v40 = vsel %vm4129_vm7, %v4125_v44, %v4133_v35  ;;  %v4357_v38 = vsel %vm612_vm1, %v7382_v4, -inf  ;;  %v3537_v11 = vadd.f32 %v7340_v29, %v5067_v14 }
 0xec2   : > { %4149 = vmax.xlane.f32.xlu1 %v4148_v59  ;;  %4352 = vmax.xlane.f32.xlu0 %v4351_v6  ;;  %v4354_v8 = vsel %vm612_vm1, %v7386_v33, -inf  ;;  %v7394_v37 = vsel %vm7826_vm11, %v4137_v40, -1e+30  ;;  %v4346_v16 = vsel %vm4338_vm10, %v4334_v31, %v4342_v3  ;;  %v3529_v15 = vadd.f32 %v5067_v14, %v7342_v54 }
 0xec3   : > { %v4151_v47 = vsel %vm612_vm1, %v7394_v37, -inf  ;;  %v7400_v53 = vsel %vm7827_vm3, %v4346_v16, -1e+30  ;;  %v3540_v51 = vadd.f32 %v7344_v9, %v5067_v14  ;;  %v3532_v5 = vadd.f32 %v5067_v14, %v7346_v55 }
 0xec4   : > { %v4360_v52 = vsel %vm612_vm1, %v7400_v53, -inf  ;;  %v3545_v10 = vmul.f32 %v3537_v11, %v3537_v11  ;;  %v3543_v30 = vmul.f32 %v3529_v15, %v3529_v15 }
 0xec5   : > { %v3546_v26 = vmul.f32 %v3540_v51, %v3540_v51  ;;  %v3544_v29 = vmul.f32 %v3532_v5, %v3532_v5 }
 0xec6   : > { %4358 = vmax.xlane.f32.xlu1 %v4357_v38  ;;  %4355 = vmax.xlane.f32.xlu0 %v4354_v8 }
 0xeca   : > { %4152 = vmax.xlane.f32.xlu0 %v4151_v47 }
 0xece   : > { %4361 = vmax.xlane.f32.xlu0 %v4360_v52 }
 0xf21   : > { %v5347_v17 = vpop.f32.mrb[52].mxu0 }
 0xf22   : > { %v3750_v45 = vadd.f32 %v5347_v17, %v5071_v24  ;;  %v3741_v34 = vpop.f32.mrb[53].mxu0 }
 0xf23   : > { %v3742_v41 = vadd.f32 %v5071_v24, %v3741_v34  ;;  %v5348_v12 = vpop.f32.mrb[54].mxu0 }
 0xf24   : > { %v3758_v27 = vadd.f32 %v3750_v45, %v3537_v11  ;;  %v3762_v25 = vmul.f32 %v3750_v45, %v3750_v45  ;;  %v3753_v63 = vadd.f32 %v5348_v12, %v5071_v24  ;;  %v3744_v46 = vpop.f32.mrb[55].mxu0 }
 0xf25   : > { %v3756_v18 = vadd.f32 %v3742_v41, %v3529_v15  ;;  %v3760_v54 = vmul.f32 %v3742_v41, %v3742_v41  ;;  %v3745_v44 = vadd.f32 %v5071_v24, %v3744_v46 }
 0xf26   : > { %v3766_v23 = vadd.f32 %v3762_v25, %v3545_v10  ;;  %v3770_v9 = vmul.f32 %v3758_v27, %v3758_v27  ;;  %v3759_v43 = vadd.f32 %v3753_v63, %v3540_v51  ;;  %v3763_v55 = vmul.f32 %v3753_v63, %v3753_v63 }
 0xf27   : > { %v3764_v58 = vadd.f32 %v3760_v54, %v3543_v30  ;;  %v3768_v50 = vmul.f32 %v3756_v18, %v3756_v18  ;;  %v3757_v56 = vadd.f32 %v3745_v44, %v3532_v5  ;;  %v3761_v21 = vmul.f32 %v3745_v44, %v3745_v44 }
 0xf28   : > { %v3774_v22 = vsub.f32 %v3770_v9, %v3766_v23  ;;  %v3767_v36 = vadd.f32 %v3763_v55, %v3546_v26  ;;  %v3771_v1 = vmul.f32 %v3759_v43, %v3759_v43  ;;  %v3875_v28 = vpack.c.bf16 %v3759_v43, %v3758_v27 }
 0xf29   : > { %v3772_v60 = vsub.f32 %v3768_v50, %v3764_v58  ;;  %v3765_v62 = vadd.f32 %v3761_v21, %v3544_v29  ;;  %v3769_v7 = vmul.f32 %v3757_v56, %v3757_v56  ;;  %v3874_v31 = vpack.c.bf16 %v3757_v56, %v3756_v18  ;;  %v7828_v50 = vld [vmem:[#allocation28_spill] sm:$0xff] }
 0xf2a   : > { %v3775_v35 = vsub.f32 %v3771_v1, %v3767_v36  ;;  %v3778_v6 = vmul.f32 0.5, %v3774_v22  ;;  %v3268_v56 = vsel %vm612_vm1, %v7321_v32, 0.0  ;;  %v3262_v21 = vsel %vm612_vm1, %v7323_v39, 0.0 }
 0xf2b   : > { %v3773_v59 = vsub.f32 %v3769_v7, %v3765_v62  ;;  %5361 = vmatprep.mubr.msk.bf16.mxu1 %vm612_vm1, %v3874_v31  ;;  %v3776_v40 = vmul.f32 0.5, %v3772_v60  ;;  %v3271_v22 = vsel %vm612_vm1, %v7326_v19, 0.0  ;;  %v3265_v36 = vsel %vm612_vm1, %v7328_v2, 0.0 }
 0xf2c   : > { %v3779_v20 = vmul.f32 0.5, %v3775_v35  ;;  %5362 = vmatmul.mubr.msk.bf16.vlgmr.msra.gmra.mrb[56].mxu1 %vm612_vm1, %v3875_v28 }
 0xf2d   : > { %v3777_v3 = vmul.f32 0.5, %v3773_v59  ;;  %5374 = vmatpush3.bf16.msra.mxu1 %v7089_v42 }
 0xf2e   : > { %v3781_v38 = vpack.c.bf16 %v3779_v20, %v3778_v6  ;;  %5375 = vmatprep.subr.bf16.mxu1 %v7109_v0  ;;  %v5776_v20 = vld [vmem:[%s6150_s23 + $0x40] sm:$0xff] }
 0xf2f   : > { %v3780_v8 = vpack.c.bf16 %v3777_v3, %v3776_v40  ;;  %v5777_v3 = vld [vmem:[%s6150_s23 + $0x48] sm:$0xff] }
 0xf31   : > { %5376 = vmatpush3.bf16.msra.mxu1 %v7109_v0  ;;  %5353 = vmatprep.mubr.msk.bf16.mxu0 %vm612_vm1, %v3780_v8 }
 0xf32   : > { %5354 = vmatmul.mubr.msk.bf16.vlgmr.msra.gmra.mrb[56].mxu0 %vm612_vm1, %v3781_v38 }
 0xf4b   : > { %v4144_v16 = vpop.xlane.xlu0 %4143  ;;  %v4147_v47 = vpop.xlane.xlu1 %4146 }
 0xf4c   : > { %v4154_v52 = vsub.f32 %v7358_v61, %v4144_v16  ;;  %v4155_v14 = vsub.f32 %v7362_v48, %v4147_v47 }
 0xf4e   : > { %v4158_v11 = vmul.f32 1.442695, %v4154_v52  ;;  %v4160_v15 = vmul.f32 1.442695, %v4155_v14 }
 0xf4f   : > { %v4353_v24 = vpop.xlane.xlu0 %4352  ;;  %v4150_v42 = vpop.xlane.xlu1 %4149 }
 0xf50   : > { %5696 = vpow2.f32 %v4158_v11  ;;  %v4363_v51 = vsub.f32 %v7374_v57, %v4353_v24  ;;  %v4156_v5 = vsub.f32 %v7370_v13, %v4150_v42  ;;  %v5089_v11 = vld [vmem:[%s7716_s8 + $0x4] ss:$0 sm:$0xff] }
 0xf51   : > { %5698 = vpow2.f32 %v4160_v15 }
 0xf52   : > { %v4162_v0 = vmul.f32 1.442695, %v4156_v5  ;;  %v4367_v17 = vmul.f32 1.442695, %v4363_v51 }
 0xf53   : > { %v4356_v45 = vpop.xlane.xlu0 %4355  ;;  %v4359_v34 = vpop.xlane.xlu1 %4358 }
 0xf54   : > { %v4365_v10 = vsub.f32 %v7382_v4, %v4359_v34  ;;  %5700 = vpow2.f32 %v4162_v0  ;;  %v4364_v61 = vsub.f32 %v7386_v33, %v4356_v45 }
 0xf55   : > { %5702 = vpow2.f32 %v4367_v17 }
 0xf56   : > { %v4371_v48 = vmul.f32 1.442695, %v4365_v10  ;;  %v4369_v26 = vmul.f32 1.442695, %v4364_v61 }
 0xf57   : > { %v4153_v30 = vpop.xlane.xlu0 %4152 }
 0xf58   : > { %v4157_v41 = vsub.f32 %v7394_v37, %v4153_v30  ;;  %5704 = vpow2.f32 %v4371_v48 }
 0xf5a   : > { %v5697_v12 = vpop.eup %5696  ;;  %v4164_v57 = vmul.f32 1.442695, %v4157_v41 }
 0xf5b   : > { %v5699_v27 = vpop.eup %5698  ;;  %v4362_v13 = vpop.xlane.xlu0 %4361  ;;  %v4166_v25 = vsel %vm612_vm1, %v5697_v12, 0.0 }
 0xf5c   : > { %5706 = vpow2.f32 %v4164_v57  ;;  %v4366_v63 = vsub.f32 %v7400_v53, %v4362_v13  ;;  %4167 = vadd.xlane.f32.xlu1 %v4166_v25  ;;  %v4169_v4 = vsel %vm612_vm1, %v5699_v27, 0.0  ;;  %v5779_v25 = vld [vmem:[%s6150_s23 + $0x58] sm:$0xff] }
 0xf5d   : > { %4170 = vadd.xlane.f32.xlu0 %v4169_v4  ;;  %5708 = vpow2.f32 %v4369_v26 }
 0xf5e   : > { %v4373_v33 = vmul.f32 1.442695, %v4366_v63  ;;  %v5701_v46 = vpop.eup %5700 }
 0xf5f   : > { %v4172_v37 = vsel %vm612_vm1, %v5701_v46, 0.0  ;;  %v7428_v29 = vpop.eup %5702 }
 0xf60   : > { %4173 = vadd.xlane.f32.xlu1 %v4172_v37  ;;  %5710 = vpow2.f32 %v4373_v33  ;;  %v4375_v18 = vsel %vm612_vm1, %v7428_v29, 0.0 }
 0xf62   : > { %v7432_v54 = vpop.eup %5704 }
 0xf63   : > { %v4381_v9 = vsel %vm612_vm1, %v7432_v54, 0.0 }
 0xf64   : > { %4376 = vadd.xlane.f32.xlu1 %v4375_v18 }
 0xf66   : > { %v5707_v53 = vpop.eup %5706 }
 0xf67   : > { %v4175_v44 = vsel %vm612_vm1, %v5707_v53, 0.0  ;;  %v7435_v23 = vpop.eup %5708 }
 0xf68   : > { %4176 = vadd.xlane.f32.xlu0 %v4175_v44  ;;  %4382 = vadd.xlane.f32.xlu1 %v4381_v9  ;;  %v4378_v43 = vsel %vm612_vm1, %v7435_v23, 0.0  ;;  %v7831_v44 = vld [vmem:[#allocation26_spill] sm:$0xff] }
 0xf6a   : > { %v7441_v55 = vpop.eup %5710 }
 0xf6b   : > { %v4384_v58 = vsel %vm612_vm1, %v7441_v55, 0.0 }
 0xf6c   : > { %4379 = vadd.xlane.f32.xlu0 %v4378_v43  ;;  %v5780_v43 = vld [vmem:[%s6150_s23 + $0x90] sm:$0xff] }
 0xf70   : > { %4385 = vadd.xlane.f32.xlu0 %v4384_v58 }
 0xf79   : > { %4202 = vrot.lane.b32.xlu1 %v6990_v49, %s5922_s14 }
 0xf86   : > { %4204 = vrot.lane.b32.xlu0 %v7828_v50, %s5922_s14  ;;  %s5094_s14 = sld [smem:[#allocation3 + $0x4]] }
 0xf8c   : > { %v7464_v30 = vstv %s5094_s14 }
 0xf8d   : > { %v3977_v9 = vmul.f32 %v7464_v30, %v7831_v44 }
 0xf9d   : > { %3269 = vadd.xlane.f32.xlu1 %v3268_v56 }
 0xfa1   : > { %3263 = vadd.xlane.f32.xlu1 %v3262_v21 }
 0xfa5   : > { %3272 = vadd.xlane.f32.xlu0 %v3271_v22  ;;  %v5781_v22 = vld [vmem:[%s6150_s23 + $0x80] sm:$0xff] }
 0xfa9   : > { %3266 = vadd.xlane.f32.xlu0 %v3265_v36 }
 0xfe9   : > { %v4168_v49 = vpop.xlane.xlu1 %4167 }
 0xfea   : > { %v4171_v1 = vpop.xlane.xlu0 %4170  ;;  %5712 = vrcp.f32 %v4168_v49 }
 0xfeb   : > { %5714 = vrcp.f32 %v4171_v1 }
 0xfed   : > { %v4174_v28 = vpop.xlane.xlu1 %4173 }
 0xfee   : > { %5716 = vrcp.f32 %v4174_v28 }
 0xff1   : > { %v4377_v60 = vpop.xlane.xlu1 %4376 }
 0xff2   : > { %5718 = vrcp.f32 %v4377_v60 }
 0xff4   : > { %v5713_v62 = vpop.eup %5712 }
 0xff5   : > { %v5715_v7 = vpop.eup %5714  ;;  %v4177_v31 = vpop.xlane.xlu0 %4176  ;;  %v4179_v35 = vmul.f32 %v5713_v62, %v5697_v12 }
 0xff6   : > { %5720 = vrcp.f32 %v4177_v31  ;;  %v4383_v59 = vpop.xlane.xlu1 %4382  ;;  %v4181_v6 = vmul.f32 %v5715_v7, %v5699_v27  ;;  %v5778_v27 = vld [vmem:[%s6150_s23 + $0x50] sm:$0xff] }
 0xff7   : > { %5722 = vrcp.f32 %v4383_v59  ;;  %v4186_v40 = vmul.f32 %v5776_v20, %v4179_v35 }
 0xff8   : > { %v4187_v38 = vmul.f32 %v5777_v3, %v4181_v6  ;;  %v5717_v52 = vpop.eup %5716  ;;  %v5782_v3 = vld [vmem:[%s6150_s23 + $0x88] sm:$0xff] }
 0xff9   : > { %v4380_v8 = vpop.xlane.xlu0 %4379  ;;  %v4183_v24 = vmul.f32 %v5717_v52, %v5701_v46  ;;  %v5079_v46 = vld [vmem:[%s7714_s6 + $0x4] ss:$0 sm:$0xff] }
 0xffa   : > { %5724 = vrcp.f32 %v4380_v8  ;;  %v4203_v16 = vpop.permute.xlu1 %4202  ;;  %v4190_v47 = vpack.c.bf16 %v4187_v38, %v4186_v40 }
 0xffb   : > { %5365 = vmatprep.subr.bf16.mxu0 %v4203_v16  ;;  %v4188_v13 = vmul.f32 %v5778_v27, %v4183_v24 }
 0xffc   : > { %5366 = vmatpush3.bf16.msra.mxu0 %v4203_v16  ;;  %5369 = vmatprep.mubr.msk.bf16.mxu0 %vm612_vm1, %v4190_v47  ;;  %v5719_v15 = vpop.eup %5718 }
 0xffd   : > { %v4386_v14 = vpop.xlane.xlu0 %4385  ;;  %v4388_v48 = vmul.f32 %v5719_v15, %v7428_v29  ;;  %v7829_v29 = vld [vmem:[#allocation27_spill] sm:$0xff] }
 0xffe   : > { %5726 = vrcp.f32 %v4386_v14  ;;  %v3976_v18 = vmul.f32 %v7464_v30, %v7829_v29 }
 0xfff   : > { %v5363_v42 = vpop.f32.mrb[56].mxu1  ;;  %v4395_v36 = vmul.f32 %v5781_v22, %v4388_v48 }
0x1000   : > { %v5721_v51 = vpop.eup %5720  ;;  %v3950_v5 = vadd.f32 %v5363_v42, %v5089_v11  ;;  %v3941_v0 = vpop.f32.mrb[57].mxu1 }
0x1001   : > { %v5723_v17 = vpop.eup %5722  ;;  %v4185_v45 = vmul.f32 %v5721_v51, %v5707_v53  ;;  %v3942_v34 = vadd.f32 %v5089_v11, %v3941_v0  ;;  %v5364_v10 = vpop.f32.mrb[58].mxu1 }
0x1002   : > { %v4205_v61 = vpop.permute.xlu0 %4204  ;;  %v4392_v41 = vmul.f32 %v5723_v17, %v7432_v54  ;;  %vm3958_vm13 = vcmp.gt.f32.partialorder %v3950_v5, 0.0  ;;  %v3962_v12 = vmul.f32 0.01, %v3950_v5  ;;  %v3953_v26 = vadd.f32 %v5364_v10, %v5089_v11  ;;  %v3944_v57 = vpop.f32.mrb[59].mxu1  ;;  %v7830_v54 = vld [vmem:[#allocation24_spill] sm:$0xff] }
0x1003   : > { %5367 = vmatprep.subr.bf16.mxu0 %v4205_v61  ;;  %v4189_v63 = vmul.f32 %v5779_v25, %v4185_v45  ;;  %v3960_v4 = vmul.f32 0.01, %v3942_v34  ;;  %v3945_v33 = vadd.f32 %v5089_v11, %v3944_v57  ;;  %vm3956_vm0 = vcmp.gt.f32.partialorder %v3942_v34, 0.0  ;;  %v5783_v11 = vld [vmem:[%s6150_s23 + $0x98] sm:$0xff] }
0x1004   : > { %5368 = vmatpush3.bf16.msra.mxu0 %v4205_v61  ;;  %v5725_v37 = vpop.eup %5724  ;;  %v3974_v53 = vmul.f32 %v7464_v30, %v7830_v54  ;;  %v4397_v58 = vmul.f32 %v5780_v43, %v4392_v41  ;;  %v3966_v50 = vsel %vm3958_vm13, %v3950_v5, %v3962_v12  ;;  %vm3959_vm6 = vcmp.gt.f32.partialorder %v3953_v26, 0.0  ;;  %v7832_v12 = vld [vmem:[#allocation25_spill] sm:$0xff] }
0x1005   : > { %v5355_v56 = vpop.f32.mrb[56].mxu0  ;;  %v4191_v21 = vpack.c.bf16 %v4189_v63, %v4188_v13  ;;  %v3963_v49 = vmul.f32 0.01, %v3953_v26  ;;  %v4390_v60 = vmul.f32 %v5725_v37, %v7435_v23  ;;  %v3964_v62 = vsel %vm3956_vm0, %v3942_v34, %v3960_v4 }
0x1006   : > { %v3856_v1 = vadd.f32 %v5355_v56, %v5079_v46  ;;  %v3847_v28 = vpop.f32.mrb[57].mxu0  ;;  %vm3957_vm8 = vcmp.gt.f32.partialorder %v3945_v33, 0.0  ;;  %v3961_v7 = vmul.f32 0.01, %v3945_v33  ;;  %v3975_v57 = vmul.f32 %v7464_v30, %v7832_v12 }
0x1007   : > { %v3848_v31 = vadd.f32 %v5079_v46, %v3847_v28  ;;  %v5356_v35 = vpop.f32.mrb[58].mxu0  ;;  %5370 = vmatmul.mubr.msk.bf16.vlgmr.msra.gmra.mrb[60].mxu0 %vm612_vm1, %v4191_v21  ;;  %v4396_v38 = vmul.f32 %v5782_v3, %v4390_v60  ;;  %v3967_v51 = vsel %vm3959_vm6, %v3953_v26, %v3963_v49  ;;  %v5541_v49 = vld [vmem:[%s7715_s7 + $0x58] sm:$0xff]  }
0x1008   : > { %v5727_v59 = vpop.eup %5726  ;;  %vm3864_vm12 = vcmp.gt.f32.partialorder %v3856_v1, 0.0  ;;  %v3868_v6 = vmul.f32 0.01, %v3856_v1  ;;  %v3859_v20 = vadd.f32 %v5356_v35, %v5079_v46  ;;  %v3850_v40 = vpop.f32.mrb[59].mxu0  ;;  %v5543_v28 = vld [vmem:[%s7713_s5 + $0x58] sm:$0xff]  }
0x1009   : > { %v4394_v8 = vmul.f32 %v5727_v59, %v7441_v55  ;;  %vm3862_vm4 = vcmp.gt.f32.partialorder %v3848_v31, 0.0  ;;  %v3866_v23 = vmul.f32 0.01, %v3848_v31  ;;  %v3851_v16 = vadd.f32 %v5079_v46, %v3850_v40 }
0x100a   : > { %v3872_v47 = vsel %vm3864_vm12, %v3856_v1, %v3868_v6  ;;  %vm3865_vm15 = vcmp.gt.f32.partialorder %v3859_v20, 0.0  ;;  %v3869_v52 = vmul.f32 0.01, %v3859_v20  ;;  %v4399_v14 = vpack.c.bf16 %v4396_v38, %v4395_v36  ;;  %v5540_v36 = vld [vmem:[%s7715_s7 + $0x50] sm:$0xff]  }
0x100b   : > { %v4398_v15 = vmul.f32 %v5783_v11, %v4394_v8  ;;  %v3870_v24 = vsel %vm3862_vm4, %v3848_v31, %v3866_v23  ;;  %vm3863_vm2 = vcmp.gt.f32.partialorder %v3851_v16, 0.0  ;;  %v3867_v42 = vmul.f32 0.01, %v3851_v16  ;;  %5389 = vmatprep.subr.bf16.mxu1 %v5540_v36  ;;  %v5542_v1 = vld [vmem:[%s7713_s5 + $0x50] sm:$0xff]  }
0x100c   : > { %v3873_v5 = vsel %vm3865_vm15, %v3859_v20, %v3869_v52  ;;  %5377 = vmatprep.mubr.msk.bf16.mxu1 %vm612_vm1, %v4399_v14  ;;  %v3970_v0 = vadd.f32 %v3966_v50, %v3872_v47  ;;  %v3968_v17 = vadd.f32 %v3964_v62, %v3870_v24  ;;  %v3965_v55 = vsel %vm3957_vm8, %v3945_v33, %v3961_v7  ;;  %v5064_v24 = vld [vmem:[%s7717_s9 + $0x3] ss:$0 sm:$0xff] }
0x100d   : > { %v3871_v45 = vsel %vm3863_vm2, %v3851_v16, %v3867_v42  ;;  %v4400_v34 = vpack.c.bf16 %v4398_v15, %v4397_v58  ;;  %v3971_v10 = vadd.f32 %v3967_v51, %v3873_v5  ;;  %5381 = vmatprep.subr.bf16.mxu0 %v5542_v1 }
0x100e   : > { %v7490_v61 = vadd.f32 %v3976_v18, %v3970_v0  ;;  %v7492_v48 = vadd.f32 %v3974_v53, %v3968_v17  ;;  %v3969_v41 = vadd.f32 %v3965_v55, %v3871_v45  ;;  %5382 = vmatpush3.bf16.msra.mxu0 %v5542_v1  ;;  %v5065_v55 = vld [vmem:[#allocation9 + $0x3] ss:$0 sm:$0xff] }
0x100f   : > { %5378 = vmatmul.mubr.msk.bf16.vlgmr.msra.gmra.mrb[60].mxu1 %vm612_vm1, %v4400_v34  ;;  %v7497_v26 = vadd.f32 %v3977_v9, %v3971_v10  ;;  %5383 = vmatprep.subr.bf16.mxu0 %v5543_v28 }
0x1010   : > { %v7499_v27 = vadd.f32 %v3975_v57, %v3969_v41  ;;  %v3988_v50 = vsel %vm612_vm1, %v7490_v61, 0.0  ;;  %v3982_v21 = vsel %vm612_vm1, %v7492_v48, 0.0  ;;  %5390 = vmatpush3.bf16.msra.mxu1 %v5540_v36 }
0x1011   : > { %5391 = vmatprep.subr.bf16.mxu1 %v5541_v49 }
0x1012   : > { %v3985_v22 = vsel %vm612_vm1, %v7499_v27, 0.0  ;;  %5384 = vmatpush3.bf16.msra.mxu0 %v5543_v28 }
0x1014   : > { %5392 = vmatpush3.bf16.msra.mxu1 %v5541_v49  ;;  %v4767_v49 = vld [vmem:[%s7719_s11 + $0x8] sm:$0xff] }
0x102a   : > { %v3270_v13 = vpop.xlane.xlu1 %3269 }
0x102b   : > { %v3276_v25 = vmul.f32 0.03125, %v3270_v13 }
0x102d   : > { %v7502_v63 = vsub.f32 %v7321_v32, %v3276_v25 }
0x102e   : > { %v3264_v4 = vpop.xlane.xlu1 %3263 }
0x102f   : > { %v3274_v33 = vmul.f32 0.03125, %v3264_v4  ;;  %v3284_v46 = vmul.f32 %v7502_v63, %v7502_v63 }
0x1031   : > { %v7507_v37 = vsub.f32 %v7323_v39, %v3274_v33  ;;  %v3292_v29 = vsel %vm612_vm1, %v3284_v46, 0.0 }
0x1032   : > { %v3273_v30 = vpop.xlane.xlu0 %3272  ;;  %3293 = vadd.xlane.f32.xlu1 %v3292_v29  ;;  %v4766_v29 = vld [vmem:[%s7719_s11] sm:$0xff] }
0x1033   : > { %v3277_v18 = vmul.f32 0.03125, %v3273_v30  ;;  %v3282_v54 = vmul.f32 %v7507_v37, %v7507_v37 }
0x1035   : > { %v7513_v53 = vsub.f32 %v7326_v19, %v3277_v18  ;;  %v3286_v44 = vsel %vm612_vm1, %v3282_v54, 0.0 }
0x1036   : > { %v3267_v32 = vpop.xlane.xlu0 %3266  ;;  %3287 = vadd.xlane.f32.xlu1 %v3286_v44 }
0x1037   : > { %v3275_v9 = vmul.f32 0.03125, %v3267_v32  ;;  %v3285_v39 = vmul.f32 %v7513_v53, %v7513_v53 }
0x1039   : > { %v7519_v43 = vsub.f32 %v7328_v2, %v3275_v9  ;;  %v3295_v58 = vsel %vm612_vm1, %v3285_v39, 0.0  ;;  %v3991_v2 = vsel %vm612_vm1, %v7497_v26, 0.0  ;;  %v4769_v9 = vld [vmem:[%s7719_s11 + $0x18] sm:$0xff] }
0x103a   : > { %3296 = vadd.xlane.f32.xlu0 %v3295_v58  ;;  %3989 = vadd.xlane.f32.xlu1 %v3988_v50 }
0x103b   : > { %v3283_v19 = vmul.f32 %v7519_v43, %v7519_v43 }
0x103d   : > { %v3289_v56 = vsel %vm612_vm1, %v3283_v19, 0.0 }
0x103e   : > { %3290 = vadd.xlane.f32.xlu0 %v3289_v56  ;;  %3983 = vadd.xlane.f32.xlu1 %v3982_v21 }
0x1042   : > { %3992 = vadd.xlane.f32.xlu0 %v3991_v2 }
0x1046   : > { %3986 = vadd.xlane.f32.xlu0 %v3985_v22  ;;  %v5099_v22 = vld [vmem:[%s6143_s19 + $0x7] ss:$0 sm:$0xff] }
0x10bf   : > { %v3294_v60 = vpop.xlane.xlu1 %3293 }
0x10c0   : > { %v3300_v62 = vmul.f32 0.03125, %v3294_v60  ;;  %v5103_v60 = vld [vmem:[%s6143_s19 + $0x9] ss:$0 sm:$0xff] }
0x10c2   : > { %v3304_v7 = vadd.f32 1e-05, %v3300_v62 }
0x10c3   : > { %v3288_v31 = vpop.xlane.xlu1 %3287 }
0x10c4   : > { %5728 = vrsqrt.f32 %v3304_v7  ;;  %v3298_v35 = vmul.f32 0.03125, %v3288_v31 }
0x10c6   : > { %v3302_v59 = vadd.f32 1e-05, %v3298_v35 }
0x10c7   : > { %v3297_v6 = vpop.xlane.xlu0 %3296  ;;  %v3990_v40 = vpop.xlane.xlu1 %3989 }
0x10c8   : > { %v3301_v20 = vmul.f32 0.03125, %v3297_v6  ;;  %5730 = vrsqrt.f32 %v3302_v59  ;;  %v3996_v3 = vmul.f32 0.03125, %v3990_v40 }
0x10ca   : > { %v3305_v38 = vadd.f32 1e-05, %v3301_v20  ;;  %v7546_v8 = vsub.f32 %v7490_v61, %v3996_v3 }
0x10cb   : > { %v3291_v23 = vpop.xlane.xlu0 %3290  ;;  %v3984_v47 = vpop.xlane.xlu1 %3983 }
0x10cc   : > { %5732 = vrsqrt.f32 %v3305_v38  ;;  %v3299_v16 = vmul.f32 0.03125, %v3291_v23  ;;  %v3994_v52 = vmul.f32 0.03125, %v3984_v47  ;;  %v4004_v14 = vmul.f32 %v7546_v8, %v7546_v8 }
0x10ce   : > { %v3303_v11 = vadd.f32 1e-05, %v3299_v16  ;;  %v5729_v15 = vpop.eup %5728  ;;  %v7554_v42 = vsub.f32 %v7492_v48, %v3994_v52  ;;  %v4012_v5 = vsel %vm612_vm1, %v4004_v14, 0.0  ;;  %v4768_v48 = vld [vmem:[%s7719_s11 + $0x10] sm:$0xff] }
0x10cf   : > { %v3993_v51 = vpop.xlane.xlu0 %3992  ;;  %v3312_v0 = vmul.f32 %v5729_v15, %v7502_v63  ;;  %4013 = vadd.xlane.f32.xlu1 %v4012_v5 }
0x10d0   : > { %5734 = vrsqrt.f32 %v3303_v11  ;;  %v3997_v17 = vmul.f32 0.03125, %v3993_v51  ;;  %v4002_v45 = vmul.f32 %v7554_v42, %v7554_v42 }
0x10d1   : > { %v3324_v34 = vmul.f32 %v5064_v24, %v3312_v0 }
0x10d2   : > { %v7561_v10 = vsub.f32 %v7497_v26, %v3997_v17  ;;  %v5731_v61 = vpop.eup %5730  ;;  %v4006_v12 = vsel %vm612_vm1, %v4002_v45, 0.0 }
0x10d3   : > { %v3987_v41 = vpop.xlane.xlu0 %3986  ;;  %v3336_v57 = vadd.f32 %v5065_v55, %v3324_v34  ;;  %v3310_v13 = vmul.f32 %v5731_v61, %v7507_v37  ;;  %4007 = vadd.xlane.f32.xlu1 %v4006_v12 }
0x10d4   : > { %v3995_v25 = vmul.f32 0.03125, %v3987_v41  ;;  %v4005_v63 = vmul.f32 %v7561_v10, %v7561_v10 }
0x10d5   : > { %v4780_v33 = vadd.f32 %v4768_v48, %v3336_v57  ;;  %v3322_v26 = vmul.f32 %v5064_v24, %v3310_v13 }
0x10d6   : > { %v5733_v4 = vpop.eup %5732  ;;  %v7571_v46 = vsub.f32 %v7499_v27, %v3995_v25  ;;  %v4015_v30 = vsel %vm612_vm1, %v4005_v63, 0.0 }
0x10d7   : > { %v3313_v18 = vmul.f32 %v5733_v4, %v7513_v53  ;;  %4016 = vadd.xlane.f32.xlu0 %v4015_v30  ;;  %4792 = vst.msk [vmem:[%s7719_s11 + $0x10] sm:$0xff] %vm612_vm1, %v4780_v33  ;;  %v3334_v37 = vadd.f32 %v5065_v55, %v3322_v26 }
0x10d8   : > { %v4003_v27 = vmul.f32 %v7571_v46, %v7571_v46 }
0x10d9   : > { %v3325_v54 = vmul.f32 %v5064_v24, %v3313_v18  ;;  %v4778_v44 = vadd.f32 %v4766_v29, %v3334_v37 }
0x10da   : > { %v5735_v32 = vpop.eup %5734  ;;  %v5371_v39 = vpop.f32.mrb[60].mxu0  ;;  %v4009_v53 = vsel %vm612_vm1, %v4003_v27, 0.0 }
0x10db   : > { %v3337_v58 = vadd.f32 %v5065_v55, %v3325_v54  ;;  %v3311_v50 = vmul.f32 %v5735_v32, %v7519_v43  ;;  %4010 = vadd.xlane.f32.xlu0 %v4009_v53  ;;  %v4248_v19 = vpop.f32.mrb[61].mxu0  ;;  %4790 = vst.msk [vmem:[%s7719_s11] sm:$0xff] %vm612_vm1, %v4778_v44  ;;  %v4257_v1 = vadd.f32 %v5371_v39, %v5099_v22 }
0x10dc   : > { %v5372_v56 = vpop.f32.mrb[62].mxu0  ;;  %v4249_v28 = vadd.f32 %v5099_v22, %v4248_v19 }
0x10dd   : > { %v4781_v21 = vadd.f32 %v4769_v9, %v3337_v58  ;;  %v3323_v2 = vmul.f32 %v5064_v24, %v3311_v50  ;;  %v4251_v36 = vpop.f32.mrb[63].mxu0  ;;  %v4260_v7 = vadd.f32 %v5372_v56, %v5099_v22  ;;  %v4265_v20 = vmul.f32 %v4257_v1, %v4257_v1 }
0x10de   : > { %v4252_v31 = vadd.f32 %v5099_v22, %v4251_v36  ;;  %v4263_v40 = vmul.f32 %v4249_v28, %v4249_v28 }
0x10df   : > { %4793 = vst.msk [vmem:[%s7719_s11 + $0x18] sm:$0xff] %vm612_vm1, %v4781_v21  ;;  %v3335_v43 = vadd.f32 %v5065_v55, %v3323_v2  ;;  %v4266_v23 = vmul.f32 %v4260_v7, %v4260_v7 }
0x10e0   : > { %v4264_v11 = vmul.f32 %v4252_v31, %v4252_v31 }
0x10e1   : > { %v4779_v62 = vadd.f32 %v4767_v49, %v3335_v43  ;;  %v5096_v43 = vld [vmem:[%s7717_s9 + $0x4] ss:$0 sm:$0xff] }
0x10e2   : > { %v5379_v35 = vpop.f32.mrb[60].mxu1 }
0x10e3   : > { %4791 = vst.msk [vmem:[%s7719_s11 + $0x8] sm:$0xff] %vm612_vm1, %v4779_v62  ;;  %v4458_v59 = vadd.f32 %v5379_v35, %v5103_v60  ;;  %v4449_v6 = vpop.f32.mrb[61].mxu1 }
0x10e4   : > { %v4450_v3 = vadd.f32 %v5103_v60, %v4449_v6  ;;  %v5380_v38 = vpop.f32.mrb[62].mxu1 }
0x10e5   : > { %v4466_v16 = vadd.f32 %v4458_v59, %v4257_v1  ;;  %v4470_v47 = vmul.f32 %v4458_v59, %v4458_v59  ;;  %v4461_v52 = vadd.f32 %v5380_v38, %v5103_v60  ;;  %v4452_v14 = vpop.f32.mrb[63].mxu1 }
0x10e6   : > { %v4464_v15 = vadd.f32 %v4450_v3, %v4249_v28  ;;  %v4468_v24 = vmul.f32 %v4450_v3, %v4450_v3  ;;  %v4453_v51 = vadd.f32 %v5103_v60, %v4452_v14  ;;  %v5097_v28 = vld [vmem:[#allocation9 + $0x4] ss:$0 sm:$0xff] }
0x10e7   : > { %v4474_v5 = vadd.f32 %v4470_v47, %v4265_v20  ;;  %v4478_v0 = vmul.f32 %v4466_v16, %v4466_v16  ;;  %v4467_v17 = vadd.f32 %v4461_v52, %v4260_v7  ;;  %v4471_v55 = vmul.f32 %v4461_v52, %v4461_v52  ;;  %v4772_v7 = vld [vmem:[%s7719_s11 + $0x30] sm:$0xff] }
0x10e8   : > { %v4472_v45 = vadd.f32 %v4468_v24, %v4263_v40  ;;  %v4476_v34 = vmul.f32 %v4464_v15, %v4464_v15  ;;  %v4465_v61 = vadd.f32 %v4453_v51, %v4252_v31  ;;  %v4469_v48 = vmul.f32 %v4453_v51, %v4453_v51  ;;  %v4770_v40 = vld [vmem:[%s7719_s11 + $0x20] sm:$0xff] }
0x10e9   : > { %v4482_v41 = vsub.f32 %v4478_v0, %v4474_v5  ;;  %v4475_v12 = vadd.f32 %v4471_v55, %v4266_v23  ;;  %v4479_v57 = vmul.f32 %v4467_v17, %v4467_v17  ;;  %v4583_v13 = vpack.c.bf16 %v4467_v17, %v4466_v16 }
0x10ea   : > { %v4480_v25 = vsub.f32 %v4476_v34, %v4472_v45  ;;  %v4473_v63 = vadd.f32 %v4469_v48, %v4264_v11  ;;  %v4477_v4 = vmul.f32 %v4465_v61, %v4465_v61  ;;  %v4582_v33 = vpack.c.bf16 %v4465_v61, %v4464_v15  ;;  %v4771_v11 = vld [vmem:[%s7719_s11 + $0x28] sm:$0xff]  ;;  %v5111_v48 = vld [vmem:[%s7714_s6 + $0x5] ss:$0 sm:$0xff] }
0x10eb   : > { %v4483_v26 = vsub.f32 %v4479_v57, %v4475_v12  ;;  %v4486_v29 = vmul.f32 0.5, %v4482_v41  ;;  %v4681_v41 = vstv %s5126_s18 }
0x10ec   : > { %v4481_v30 = vsub.f32 %v4477_v4, %v4473_v63  ;;  %5393 = vmatprep.mubr.msk.bf16.mxu1 %vm612_vm1, %v4582_v33  ;;  %v4484_v37 = vmul.f32 0.5, %v4480_v25  ;;  %v7833_v4 = vld [vmem:[#allocation29_spill] sm:$0xff] }
0x10ed   : > { %v4487_v18 = vmul.f32 0.5, %v4483_v26  ;;  %5394 = vmatmul.mubr.msk.bf16.vlgmr.msra.gmra.mrb[64].mxu1 %vm612_vm1, %v4583_v13  ;;  %v4682_v33 = vmul.f32 %v4681_v41, %v7833_v4  ;;  %v7834_v26 = vld [vmem:[#allocation32_spill] sm:$0xff] }
0x10ee   : > { %v4485_v27 = vmul.f32 0.5, %v4481_v30  ;;  %v4684_v30 = vmul.f32 %v4681_v41, %v7834_v26 }
0x10ef   : > { %v4489_v54 = vpack.c.bf16 %v4487_v18, %v4486_v29 }
0x10f0   : > { %v4488_v32 = vpack.c.bf16 %v4485_v27, %v4484_v37 }
0x10f2   : > { %5385 = vmatprep.mubr.msk.bf16.mxu0 %vm612_vm1, %v4488_v32 }
0x10f3   : > { %5386 = vmatmul.mubr.msk.bf16.vlgmr.msra.gmra.mrb[64].mxu0 %vm612_vm1, %v4489_v54 }
0x115c   : > { %v4014_v44 = vpop.xlane.xlu1 %4013 }
0x115d   : > { %v4020_v9 = vmul.f32 0.03125, %v4014_v44 }
0x115f   : > { %v4024_v39 = vadd.f32 1e-05, %v4020_v9 }
0x1160   : > { %v4008_v53 = vpop.xlane.xlu1 %4007 }
0x1161   : > { %5736 = vrsqrt.f32 %v4024_v39  ;;  %v4018_v58 = vmul.f32 0.03125, %v4008_v53 }
0x1163   : > { %v4022_v50 = vadd.f32 1e-05, %v4018_v58 }
0x1164   : > { %v4017_v19 = vpop.xlane.xlu0 %4016 }
0x1165   : > { %v4021_v56 = vmul.f32 0.03125, %v4017_v19  ;;  %5738 = vrsqrt.f32 %v4022_v50 }
0x1167   : > { %v4025_v21 = vadd.f32 1e-05, %v4021_v56 }
0x1168   : > { %v4011_v2 = vpop.xlane.xlu0 %4010 }
0x1169   : > { %5740 = vrsqrt.f32 %v4025_v21  ;;  %v4019_v22 = vmul.f32 0.03125, %v4011_v2 }
0x116b   : > { %v4023_v36 = vadd.f32 1e-05, %v4019_v22  ;;  %v5737_v49 = vpop.eup %5736 }
0x116c   : > { %v4032_v1 = vmul.f32 %v5737_v49, %v7546_v8 }
0x116d   : > { %5742 = vrsqrt.f32 %v4023_v36 }
0x116e   : > { %v4044_v60 = vmul.f32 %v5096_v43, %v4032_v1 }
0x116f   : > { %v5739_v62 = vpop.eup %5738 }
0x1170   : > { %v4056_v31 = vadd.f32 %v5097_v28, %v4044_v60  ;;  %v4030_v35 = vmul.f32 %v5739_v62, %v7554_v42  ;;  %v4773_v42 = vld [vmem:[%s7719_s11 + $0x38] sm:$0xff] }
0x1172   : > { %v4784_v6 = vadd.f32 %v4772_v7, %v4056_v31  ;;  %v4042_v20 = vmul.f32 %v5096_v43, %v4030_v35 }
0x1173   : > { %v5741_v59 = vpop.eup %5740 }
0x1174   : > { %v4033_v8 = vmul.f32 %v5741_v59, %v7561_v10  ;;  %4796 = vst.msk [vmem:[%s7719_s11 + $0x30] sm:$0xff] %vm612_vm1, %v4784_v6  ;;  %v4054_v3 = vadd.f32 %v5097_v28, %v4042_v20  ;;  %v7836_v59 = vld [vmem:[#allocation30_spill] sm:$0xff] }
0x1175   : > { %v4683_v6 = vmul.f32 %v4681_v41, %v7836_v59 }
0x1176   : > { %v4045_v38 = vmul.f32 %v5096_v43, %v4033_v8  ;;  %v4782_v16 = vadd.f32 %v4770_v40, %v4054_v3 }
0x1177   : > { %v5743_v23 = vpop.eup %5742 }
0x1178   : > { %v4057_v47 = vadd.f32 %v5097_v28, %v4045_v38  ;;  %v4031_v52 = vmul.f32 %v5743_v23, %v7571_v46  ;;  %4794 = vst.msk [vmem:[%s7719_s11 + $0x20] sm:$0xff] %vm612_vm1, %v4782_v16  ;;  %v5121_v46 = vld [vmem:[%s7716_s8 + $0x5] ss:$0 sm:$0xff] }
0x117a   : > { %v4785_v10 = vadd.f32 %v4773_v42, %v4057_v47  ;;  %v4043_v14 = vmul.f32 %v5096_v43, %v4031_v52  ;;  %v7835_v43 = vld [vmem:[#allocation31_spill] sm:$0xff] }
0x117b   : > { %v4685_v1 = vmul.f32 %v4681_v41, %v7835_v43 }
0x117c   : > { %4797 = vst.msk [vmem:[%s7719_s11 + $0x38] sm:$0xff] %vm612_vm1, %v4785_v10  ;;  %v4055_v15 = vadd.f32 %v5097_v28, %v4043_v14 }
0x117e   : > { %v4783_v24 = vadd.f32 %v4771_v11, %v4055_v15 }
0x1180   : > { %4795 = vst.msk [vmem:[%s7719_s11 + $0x28] sm:$0xff] %vm612_vm1, %v4783_v24 }
0x11c0   : > { %v5395_v51 = vpop.f32.mrb[64].mxu1 }
0x11c1   : > { %v4658_v5 = vadd.f32 %v5395_v51, %v5121_v46  ;;  %v4649_v0 = vpop.f32.mrb[65].mxu1 }
0x11c2   : > { %v4650_v17 = vadd.f32 %v5121_v46, %v4649_v0  ;;  %v5396_v55 = vpop.f32.mrb[66].mxu1 }
0x11c3   : > { %v4652_v45 = vpop.f32.mrb[67].mxu1  ;;  %v4670_v34 = vmul.f32 0.01, %v4658_v5  ;;  %v4661_v61 = vadd.f32 %v5396_v55, %v5121_v46  ;;  %vm4666_vm5 = vcmp.gt.f32.partialorder %v4658_v5, 0.0 }
0x11c4   : > { %v4668_v12 = vmul.f32 0.01, %v4650_v17  ;;  %vm4664_vm7 = vcmp.gt.f32.partialorder %v4650_v17, 0.0  ;;  %v4653_v57 = vadd.f32 %v5121_v46, %v4652_v45 }
0x11c5   : > { %v4674_v29 = vsel %vm4666_vm5, %v4658_v5, %v4670_v34  ;;  %vm4667_vm14 = vcmp.gt.f32.partialorder %v4661_v61, 0.0  ;;  %v4671_v18 = vmul.f32 0.01, %v4661_v61 }
0x11c6   : > { %v5387_v13 = vpop.f32.mrb[64].mxu0  ;;  %v4672_v54 = vsel %vm4664_vm7, %v4650_v17, %v4668_v12  ;;  %v4669_v39 = vmul.f32 0.01, %v4653_v57  ;;  %vm4665_vm11 = vcmp.gt.f32.partialorder %v4653_v57, 0.0 }
0x11c7   : > { %v4564_v25 = vadd.f32 %v5387_v13, %v5111_v48  ;;  %v4555_v63 = vpop.f32.mrb[65].mxu0  ;;  %v4675_v22 = vsel %vm4667_vm14, %v4661_v61, %v4671_v18 }
0x11c8   : > { %v4556_v37 = vadd.f32 %v5111_v48, %v4555_v63  ;;  %v5388_v27 = vpop.f32.mrb[66].mxu0  ;;  %v4673_v28 = vsel %vm4665_vm11, %v4653_v57, %v4669_v39 }
0x11c9   : > { %vm4572_vm9 = vcmp.gt.f32.partialorder %v4564_v25, 0.0  ;;  %v4576_v32 = vmul.f32 0.01, %v4564_v25  ;;  %v4567_v44 = vadd.f32 %v5388_v27, %v5111_v48  ;;  %v4558_v9 = vpop.f32.mrb[67].mxu0 }
0x11ca   : > { %vm4570_vm10 = vcmp.gt.f32.partialorder %v4556_v37, 0.0  ;;  %v4574_v53 = vmul.f32 0.01, %v4556_v37  ;;  %v4559_v58 = vadd.f32 %v5111_v48, %v4558_v9  ;;  %v5129_v9 = vld [vmem:[#allocation9 + $0x5] ss:$0 sm:$0xff] }
0x11cb   : > { %v4580_v50 = vsel %vm4572_vm9, %v4564_v25, %v4576_v32  ;;  %vm4573_vm3 = vcmp.gt.f32.partialorder %v4567_v44, 0.0  ;;  %v4577_v19 = vmul.f32 0.01, %v4567_v44 }
0x11cc   : > { %v4578_v56 = vsel %vm4570_vm10, %v4556_v37, %v4574_v53  ;;  %vm4571_vm13 = vcmp.gt.f32.partialorder %v4559_v58, 0.0  ;;  %v4575_v21 = vmul.f32 0.01, %v4559_v58  ;;  %v4678_v2 = vadd.f32 %v4674_v29, %v4580_v50  ;;  %v4774_v50 = vld [vmem:[%s7719_s11 + $0x40] sm:$0xff] }
0x11cd   : > { %v4581_v36 = vsel %vm4573_vm3, %v4567_v44, %v4577_v19  ;;  %v4676_v49 = vadd.f32 %v4672_v54, %v4578_v56  ;;  %v5128_v54 = vld [vmem:[%s7717_s9 + $0x5] ss:$0 sm:$0xff] }
0x11ce   : > { %v4579_v60 = vsel %vm4571_vm13, %v4559_v58, %v4575_v21  ;;  %v4688_v62 = vadd.f32 %v4684_v30, %v4678_v2  ;;  %v4679_v7 = vadd.f32 %v4675_v22, %v4581_v36  ;;  %v4775_v22 = vld [vmem:[%s7719_s11 + $0x48] sm:$0xff] }
0x11cf   : > { %v4686_v31 = vadd.f32 %v4682_v33, %v4676_v49  ;;  %v4677_v35 = vadd.f32 %v4673_v28, %v4579_v60  ;;  %v4776_v28 = vld [vmem:[%s7719_s11 + $0x50] sm:$0xff] }
0x11d0   : > { %v4689_v20 = vadd.f32 %v4685_v1, %v4679_v7  ;;  %v4696_v38 = vsel %vm612_vm1, %v4688_v62, 0.0 }
0x11d1   : > { %v4690_v40 = vsel %vm612_vm1, %v4686_v31, 0.0  ;;  %v4687_v8 = vadd.f32 %v4683_v6, %v4677_v35 }
0x11d2   : > { %4691 = vadd.xlane.f32.xlu1 %v4690_v40  ;;  %v4699_v23 = vsel %vm612_vm1, %v4689_v20, 0.0 }
0x11d3   : > { %v4693_v3 = vsel %vm612_vm1, %v4687_v8, 0.0 }
0x11d4   : > { %4694 = vadd.xlane.f32.xlu0 %v4693_v3 }
0x11d6   : > { %4697 = vadd.xlane.f32.xlu1 %v4696_v38 }
0x11d8   : > { %4700 = vadd.xlane.f32.xlu0 %v4699_v23 }
0x125f   : > { %v4692_v16 = vpop.xlane.xlu1 %4691 }
0x1260   : > { %v4702_v42 = vmul.f32 0.03125, %v4692_v16 }
0x1261   : > { %v4695_v47 = vpop.xlane.xlu0 %4694 }
0x1262   : > { %v4706_v52 = vsub.f32 %v4686_v31, %v4702_v42  ;;  %v4703_v10 = vmul.f32 0.03125, %v4695_v47  ;;  %v4777_v31 = vld [vmem:[%s7719_s11 + $0x58] sm:$0xff] }
0x1263   : > { %v4698_v14 = vpop.xlane.xlu1 %4697 }
0x1264   : > { %v4707_v11 = vsub.f32 %v4687_v8, %v4703_v10  ;;  %v4704_v15 = vmul.f32 0.03125, %v4698_v14  ;;  %v4710_v24 = vmul.f32 %v4706_v52, %v4706_v52 }
0x1265   : > { %v4701_v46 = vpop.xlane.xlu0 %4700 }
0x1266   : > { %v4708_v51 = vsub.f32 %v4688_v62, %v4704_v15  ;;  %v4705_v5 = vmul.f32 0.03125, %v4701_v46  ;;  %v4714_v0 = vsel %vm612_vm1, %v4710_v24, 0.0  ;;  %v4711_v17 = vmul.f32 %v4707_v11, %v4707_v11 }
0x1267   : > { %4715 = vadd.xlane.f32.xlu1 %v4714_v0 }
0x1268   : > { %v4709_v55 = vsub.f32 %v4689_v20, %v4705_v5  ;;  %v4717_v45 = vsel %vm612_vm1, %v4711_v17, 0.0  ;;  %v4712_v34 = vmul.f32 %v4708_v51, %v4708_v51 }
0x1269   : > { %4718 = vadd.xlane.f32.xlu0 %v4717_v45 }
0x126a   : > { %v4720_v61 = vsel %vm612_vm1, %v4712_v34, 0.0  ;;  %v4713_v48 = vmul.f32 %v4709_v55, %v4709_v55 }
0x126b   : > { %4721 = vadd.xlane.f32.xlu1 %v4720_v61 }
0x126c   : > { %v4723_v41 = vsel %vm612_vm1, %v4713_v48, 0.0 }
0x126d   : > { %4724 = vadd.xlane.f32.xlu0 %v4723_v41 }
0x12f4   : > { %v4716_v12 = vpop.xlane.xlu1 %4715 }
0x12f5   : > { %v4726_v57 = vmul.f32 0.03125, %v4716_v12 }
0x12f6   : > { %v4719_v13 = vpop.xlane.xlu0 %4718 }
0x12f7   : > { %v4730_v25 = vadd.f32 1e-05, %v4726_v57  ;;  %v4727_v63 = vmul.f32 0.03125, %v4719_v13 }
0x12f8   : > { %v4722_v4 = vpop.xlane.xlu1 %4721 }
0x12f9   : > { %5744 = vrsqrt.f32 %v4730_v25  ;;  %v4731_v33 = vadd.f32 1e-05, %v4727_v63  ;;  %v4728_v26 = vmul.f32 0.03125, %v4722_v4 }
0x12fa   : > { %v4725_v30 = vpop.xlane.xlu0 %4724 }
0x12fb   : > { %5746 = vrsqrt.f32 %v4731_v33  ;;  %v4732_v29 = vadd.f32 1e-05, %v4728_v26  ;;  %v4729_v18 = vmul.f32 0.03125, %v4725_v30 }
0x12fd   : > { %5748 = vrsqrt.f32 %v4732_v29  ;;  %v4733_v37 = vadd.f32 1e-05, %v4729_v18 }
0x12ff   : > { %5750 = vrsqrt.f32 %v4733_v37 }
0x1303   : > { %v5745_v27 = vpop.eup %5744 }
0x1304   : > { %v4738_v32 = vmul.f32 %v5745_v27, %v4706_v52 }
0x1305   : > { %v5747_v44 = vpop.eup %5746 }
0x1306   : > { %v4750_v39 = vmul.f32 %v5128_v54, %v4738_v32  ;;  %v4739_v53 = vmul.f32 %v5747_v44, %v4707_v11 }
0x1307   : > { %v5749_v58 = vpop.eup %5748 }
0x1308   : > { %v4762_v19 = vadd.f32 %v5129_v9, %v4750_v39  ;;  %v4751_v56 = vmul.f32 %v5128_v54, %v4739_v53  ;;  %v4740_v21 = vmul.f32 %v5749_v58, %v4708_v51 }
0x1309   : > { %v5751_v2 = vpop.eup %5750 }
0x130a   : > { %v4786_v36 = vadd.f32 %v4774_v50, %v4762_v19  ;;  %v4763_v49 = vadd.f32 %v5129_v9, %v4751_v56  ;;  %v4752_v43 = vmul.f32 %v5128_v54, %v4740_v21  ;;  %v4741_v1 = vmul.f32 %v5751_v2, %v4709_v55 }
0x130c   : > { %4798 = vst.msk [vmem:[%s7719_s11 + $0x40] sm:$0xff] %vm612_vm1, %v4786_v36  ;;  %v4787_v60 = vadd.f32 %v4775_v22, %v4763_v49  ;;  %v4764_v62 = vadd.f32 %v5129_v9, %v4752_v43  ;;  %v4753_v7 = vmul.f32 %v5128_v54, %v4741_v1 }
0x130e   : > { %4799 = vst.msk [vmem:[%s7719_s11 + $0x48] sm:$0xff] %vm612_vm1, %v4787_v60  ;;  %v4788_v35 = vadd.f32 %v4776_v28, %v4764_v62  ;;  %v4765_v59 = vadd.f32 %v5129_v9, %v4753_v7 }
0x1310   : > { %4800 = vst.msk [vmem:[%s7719_s11 + $0x50] sm:$0xff] %vm612_vm1, %v4788_v35  ;;  %v4789_v6 = vadd.f32 %v4777_v31, %v4765_v59 }
0x1312   : > { %4801 = vst.msk [vmem:[%s7719_s11 + $0x58] sm:$0xff] %vm612_vm1, %v4789_v6 }
0x1313 PF: > { %s7837_s25 = sld [smem:[#allocation17_spill]]  ;;  %p28_p9 = scmp.ge.s32.totalorder %s6017_s12, 5  }
0x1314   : > { %s7838_s27 = smov %s5886_s28  ;;  %s7839_s28 = smov %s5890_s29 }
0x1315   : > { %s7841_s30 = smov %s6017_s12  ;;  %30 = sbr.rel (!%p28_p9) target bundleno = 18 (0x12), region = 215 }
0x1319   : > { %s7840_s29 = smov %s7837_s25 }
0x131c   :  { %4813 = vsyncpa [#allocation6], 1 }
0x131d   :  { %4815 = vsyncpa [#allocation6 + $0x1], 1 }
0x131e   :  { %4816 = vsyncpa [#allocation8], 1 }
0x131f   :  { %4818 = vsyncpa [#allocation8 + $0x1], 1 }

</bundles_post_ra>
